<compile_context>
chip_gen: v6e
topology: v6e:2x2x1
jax: 0.10.0
libtpu: 0.0.40
codegen_flags: <defaults>
</compile_context>

<pallas_src>
import jax
import jax.numpy as jnp
from jax import lax
from jax.experimental import pallas as pl
from jax.experimental.pallas import tpu as pltpu


# ----------------------------- Pallas kernel --------------------------------

def bigru_kernel(lengths_ref,                 # (Bp, 1)  int32
                 x_ref,                       # (T, Bp, Hp) bf16 (embedded, padded)
                 wih_f_ref, whh_f_ref,        # (Hp, 3Hp) bf16   x @ W / h @ W layout
                 gib_f_ref, bhn_f_ref,        # (1, 3Hp), (1, Hp) f32
                 wih_b_ref, whh_b_ref,        # backward-direction params
                 gib_b_ref, bhn_b_ref,
                 out_ref,                     # (T, Bp, Hp) f32 -> fwd + bwd outputs
                 hid_ref,                     # (2, Bp, Hp) f32 -> final hidden (fwd, bwd)
                 gi_f_scratch,                # (T, Bp, 3Hp) bf16
                 gi_b_scratch,                # (T, Bp, 3Hp) bf16
                 out_b_scratch):              # (floor(T/2), Bp, Hp) f32
    T, Bp, Hp = x_ref.shape
    split = T // 2                  # iterations t >= split can add bwd in place
    scratch_base = (T + 1) // 2     # bwd slots >= scratch_base are buffered

    # ---- phase 1: hoisted input projections (one bf16 MXU GEMM per direction) ----
    # Compute-then-store per direction to keep only one (T*Bp, 3Hp) result live.
    x_flat = x_ref[...].reshape(T * Bp, Hp)                      # bf16
    gi = jnp.dot(x_flat, wih_f_ref[...],
                 preferred_element_type=jnp.float32) + gib_f_ref[...]
    gi_f_scratch[...] = gi.reshape(T, Bp, 3 * Hp).astype(jnp.bfloat16)
    gi = jnp.dot(x_flat, wih_b_ref[...],
                 preferred_element_type=jnp.float32) + gib_b_ref[...]
    gi_b_scratch[...] = gi.reshape(T, Bp, 3 * Hp).astype(jnp.bfloat16)

    # ---- hoisted loop-invariants ----
    lengths = lengths_ref[...]                      # (Bp, 1) int32, loaded once
    whh_f = whh_f_ref[...]                          # bf16, loaded once
    whh_b = whh_b_ref[...]
    bhn_f = jnp.broadcast_to(bhn_f_ref[...], (Bp, Hp))   # pre-broadcast once
    bhn_b = jnp.broadcast_to(bhn_b_ref[...], (Bp, Hp))

    # TODO(synk): optionally hold whh_f/whh_b resident in MXU staging registers
    # across the time loop (pltpu.matmul_push_rhs once, matmul_acc_lhs/pop per step).
    def gru_step(gi_t, h, whh, bhn):
        # One fused recurrent matmul (bf16 operands, f32 accumulate).
        gh = jnp.dot(h.astype(jnp.bfloat16), whh,
                     preferred_element_type=jnp.float32)
        r = jax.nn.sigmoid(gi_t[:, :Hp] + gh[:, :Hp])
        z = jax.nn.sigmoid(gi_t[:, Hp:2 * Hp] + gh[:, Hp:2 * Hp])
        n = jnp.tanh(gi_t[:, 2 * Hp:] + r * (gh[:, 2 * Hp:] + bhn))
        return (1.0 - z) * n + z * h

    def fwd_step(t, h_f):
        hf_new = gru_step(gi_f_scratch[t], h_f, whh_f, bhn_f)
        vf = jnp.broadcast_to(lengths > t, (Bp, Hp))   # hoisted mask, reused twice
        out_ref[t] = jnp.where(vf, hf_new, 0.0)        # pad_packed_sequence zero-pads
        return jnp.where(vf, hf_new, h_f)

    def bwd_step(tb, h_b):
        hb_new = gru_step(gi_b_scratch[tb], h_b, whh_b, bhn_b)
        vb = jnp.broadcast_to(lengths > tb, (Bp, Hp))
        return jnp.where(vb, hb_new, 0.0), jnp.where(vb, hb_new, h_b)

    # ---- phase 2a: first half; bwd value lands before fwd has written its slot ----
    def body_a(t, carry):
        h_f, h_b = carry
        tb = T - 1 - t
        h_f = fwd_step(t, h_f)
        ob, h_b = bwd_step(tb, h_b)
        out_b_scratch[tb - scratch_base] = ob
        return (h_f, h_b)

    # ---- phase 2b: second half; fwd value in slot tb is final -> add in place ----
    def body_b(t, carry):
        h_f, h_b = carry
        tb = T - 1 - t
        h_f = fwd_step(t, h_f)
        ob, h_b = bwd_step(tb, h_b)
        out_ref[tb] = out_ref[tb] + ob
        return (h_f, h_b)

    h0 = jnp.zeros((Bp, Hp), jnp.float32)
    carry = lax.fori_loop(0, split, body_a, (h0, h0), unroll=4)
    h_f, h_b = lax.fori_loop(split, T, body_b, carry, unroll=4)

    hid_ref[0] = h_f                               # fwd final hidden (at t = len-1)
    hid_ref[1] = h_b                               # bwd final hidden (at t = 0)

    # ---- epilogue: fold the buffered first-half backward outputs (half of T) ----
    nb = T - scratch_base
    if nb > 0:
        sl = pl.ds(scratch_base, nb)
        out_ref[sl] = out_ref[sl] + out_b_scratch[pl.ds(0, nb)]


# ------------------------------ wrapper --------------------------------------

def encoder_rnn_forward(input_seq, input_lengths, params):
    """input_seq: (T, B) int32 ; input_lengths: (B,) int32 (sorted descending)."""
    T, B = input_seq.shape
    H = params["hidden_size"]
    Bp = max(8, ((B + 7) // 8) * 8)                # sublane-aligned batch
    Hp = ((H + 127) // 128) * 128                  # lane-aligned hidden

    # Embedding lookup (glue).  bf16 MXU operand; padded rows/lanes stay zero.
    emb = params["embedding"][input_seq].astype(jnp.float32)          # (T, B, H)
    x = jnp.zeros((T, Bp, Hp), jnp.bfloat16).at[:, :B, :H].set(emb.astype(jnp.bfloat16))

    def pad2(m, r, c):
        return jnp.zeros((r, c), jnp.float32).at[:m.shape[0], :m.shape[1]].set(m)

    def padv(v):
        return jnp.zeros((Hp,), jnp.float32).at[:H].set(v)

    def prep(w_ih, w_hh, b_ih, b_hh):
        # PyTorch layout: (3H, H) stacked [r, z, n]; biases (3H,).
        wih_g = w_ih.reshape(3, H, H)
        whh_g = w_hh.reshape(3, H, H)
        bih_g = b_ih.reshape(3, H)
        bhh_g = b_hh.reshape(3, H)
        # Per-gate transpose+pad, concatenated along output dim -> x @ W layout (Hp, 3Hp).
        wih_cat = jnp.concatenate([pad2(wih_g[g].T, Hp, Hp) for g in range(3)],
                                  axis=1).astype(jnp.bfloat16)
        whh_cat = jnp.concatenate([pad2(whh_g[g].T, Hp, Hp) for g in range(3)],
                                  axis=1).astype(jnp.bfloat16)
        # Fold b_ih (all gates) + b_hh for r,z into the precomputed input projection.
        gib = jnp.concatenate([padv(bih_g[0] + bhh_g[0]),
                               padv(bih_g[1] + bhh_g[1]),
                               padv(bih_g[2])]).reshape(1, 3 * Hp)
        bhn = padv(bhh_g[2]).reshape(1, Hp)        # b_hh_n stays separate (scaled by r)
        return wih_cat, whh_cat, gib, bhn

    wih_f, whh_f, gib_f, bhn_f = prep(params["w_ih_f"], params["w_hh_f"],
                                      params["b_ih_f"], params["b_hh_f"])
    wih_b, whh_b, gib_b, bhn_b = prep(params["w_ih_b"], params["w_hh_b"],
                                      params["b_ih_b"], params["b_hh_b"])

    lengths_p = jnp.zeros((Bp, 1), jnp.int32).at[:B, 0].set(input_lengths.astype(jnp.int32))

    nb = max(1, T - (T + 1) // 2)                  # backward buffer: floor(T/2) steps
    scratch_shapes = [pltpu.VMEM((T, Bp, 3 * Hp), jnp.bfloat16),
                      pltpu.VMEM((T, Bp, 3 * Hp), jnp.bfloat16),
                      pltpu.VMEM((nb, Bp, Hp), jnp.float32)]

    # Size the scoped-VMEM limit from the actual footprint (with generous margin).
    scratch_bytes = 2 * (T * Bp * 3 * Hp * 2) + nb * Bp * Hp * 4
    io_bytes = (T * Bp * Hp * 2                      # x (bf16)
                + 4 * (Hp * 3 * Hp * 2)              # wih/whh, both directions (bf16)
                + 2 * (3 * Hp + Hp) * 4              # folded biases (f32)
                + Bp * 4                             # lengths
                + T * Bp * Hp * 4 + 2 * Bp * Hp * 4) # outputs (f32)
    vmem_limit = int(min(max(2 * (scratch_bytes + io_bytes) + (8 << 20), 16 << 20),
                         48 << 20))

    vmem_spec = pl.BlockSpec(memory_space=pltpu.MemorySpace.VMEM)
    # TODO(synk): for production hidden_size=500 / long T, tile the time axis with
    # grid=(T//Tc,) ("arbitrary"), carry h_f/h_b in persistent VMEM scratch across
    # grid steps and compute each chunk's gi in-step (bounds VMEM to O(Tc); mandatory
    # on v7x's 64 MiB).  On v7x, additionally split fwd/bwd across the two
    # TensorCores with a leading size-2 "parallel" grid axis.
    out_p, hid_p = pl.pallas_call(
        bigru_kernel,
        out_shape=(jax.ShapeDtypeStruct((T, Bp, Hp), jnp.float32),
                   jax.ShapeDtypeStruct((2, Bp, Hp), jnp.float32)),
        in_specs=[vmem_spec] * 10,
        out_specs=(vmem_spec, vmem_spec),
        scratch_shapes=scratch_shapes,
        compiler_params=pltpu.CompilerParams(vmem_limit_bytes=vmem_limit),
    )(lengths_p, x,
      wih_f, whh_f, gib_f, bhn_f,
      wih_b, whh_b, gib_b, bhn_b)

    outputs = out_p[:, :B, :H]
    hidden = hid_p[:, :B, :H]
    return outputs, hidden


# --------------------------- pure-JAX reference -------------------------------

def reference_forward(input_seq, input_lengths, params):
    H = params["hidden_size"]
    emb = params["embedding"][input_seq].astype(jnp.float32)
    T, B, _ = emb.shape
    lengths = input_lengths.astype(jnp.int32)

    def cell(x, h, w_ih, w_hh, b_ih, b_hh):
        gi = x @ w_ih.T + b_ih
        gh = h @ w_hh.T + b_hh
        r = jax.nn.sigmoid(gi[:, :H] + gh[:, :H])
        z = jax.nn.sigmoid(gi[:, H:2 * H] + gh[:, H:2 * H])
        n = jnp.tanh(gi[:, 2 * H:] + r * gh[:, 2 * H:])
        return (1 - z) * n + z * h

    out = jnp.zeros((T, B, H), jnp.float32)
    h = jnp.zeros((B, H), jnp.float32)
    for t in range(T):
        h_new = cell(emb[t], h, params["w_ih_f"], params["w_hh_f"],
                     params["b_ih_f"], params["b_hh_f"])
        valid = (lengths > t)[:, None]
        h = jnp.where(valid, h_new, h)
        out = out.at[t].set(jnp.where(valid, h_new, 0.0))
    h_fwd = h

    h = jnp.zeros((B, H), jnp.float32)
    for t in range(T - 1, -1, -1):
        h_new = cell(emb[t], h, params["w_ih_b"], params["w_hh_b"],
                     params["b_ih_b"], params["b_hh_b"])
        valid = (lengths > t)[:, None]
        h = jnp.where(valid, h_new, h)
        out = out.at[t].add(jnp.where(valid, h_new, 0.0))
    h_bwd = h
    return out, jnp.stack([h_fwd, h_bwd], axis=0)


# ------------------------------------ main ------------------------------------

if __name__ == "__main__":
    T, B, H, V = 8, 4, 32, 50   # small shapes consistent with the module

    key = jax.random.PRNGKey(0)
    ks = jax.random.split(key, 12)
    scale = 1.0 / jnp.sqrt(H)

    params = {
        "hidden_size": H,
        "embedding": jax.random.uniform(ks[0], (V, H), jnp.float32, -scale, scale),
        "w_ih_f": jax.random.uniform(ks[1], (3 * H, H), jnp.float32, -scale, scale),
        "w_hh_f": jax.random.uniform(ks[2], (3 * H, H), jnp.float32, -scale, scale),
        "b_ih_f": jax.random.uniform(ks[3], (3 * H,), jnp.float32, -scale, scale),
        "b_hh_f": jax.random.uniform(ks[4], (3 * H,), jnp.float32, -scale, scale),
        "w_ih_b": jax.random.uniform(ks[5], (3 * H, H), jnp.float32, -scale, scale),
        "w_hh_b": jax.random.uniform(ks[6], (3 * H, H), jnp.float32, -scale, scale),
        "b_ih_b": jax.random.uniform(ks[7], (3 * H,), jnp.float32, -scale, scale),
        "b_hh_b": jax.random.uniform(ks[8], (3 * H,), jnp.float32, -scale, scale),
    }

    input_seq = jax.random.randint(ks[9], (T, B), 0, V, dtype=jnp.int32)
    input_lengths = jnp.array([8, 6, 5, 3], dtype=jnp.int32)   # sorted desc (pack_padded_sequence)

    outputs, hidden = encoder_rnn_forward(input_seq, input_lengths, params)
    outputs = jax.block_until_ready(outputs)
    hidden = jax.block_until_ready(hidden)

    ref_out, ref_hid = reference_forward(input_seq, input_lengths, params)
    assert outputs.shape == (T, B, H) and hidden.shape == (2, B, H)
    # bf16 MXU operands -> slightly relaxed tolerance vs the f32 reference.
    assert jnp.allclose(outputs, ref_out, atol=2e-2, rtol=2e-2)
    assert jnp.allclose(hidden, ref_hid, atol=2e-2, rtol=2e-2)

    print("KERNEL_OK")
</pallas_src>

<mosaic_0001>
module attributes {stable_mosaic.version = 11 : i64} {
  func.func @bigru_kernel(%arg0: memref<8x1xi32, #tpu.memory_space<vmem>>, %arg1: memref<8x8x128xbf16, #tpu.memory_space<vmem>>, %arg2: memref<128x384xbf16, #tpu.memory_space<vmem>>, %arg3: memref<128x384xbf16, #tpu.memory_space<vmem>>, %arg4: memref<1x384xf32, #tpu.memory_space<vmem>>, %arg5: memref<1x128xf32, #tpu.memory_space<vmem>>, %arg6: memref<128x384xbf16, #tpu.memory_space<vmem>>, %arg7: memref<128x384xbf16, #tpu.memory_space<vmem>>, %arg8: memref<1x384xf32, #tpu.memory_space<vmem>>, %arg9: memref<1x128xf32, #tpu.memory_space<vmem>>, %arg10: memref<8x8x128xf32, #tpu.memory_space<vmem>>, %arg11: memref<2x8x128xf32, #tpu.memory_space<vmem>>, %arg12: memref<8x8x384xbf16, #tpu.memory_space<vmem>>, %arg13: memref<8x8x384xbf16, #tpu.memory_space<vmem>>, %arg14: memref<4x8x128xf32, #tpu.memory_space<vmem>>) attributes {dimension_semantics = [], scalar_prefetch = 0 : i64, scratch_operands = 3 : i64, tpu.core_type = #tpu.core_type<tc>} {
    %c0 = arith.constant 0 : index
    %c0_0 = arith.constant 0 : index
    %c0_1 = arith.constant 0 : index
    %0 = vector.load %arg1[%c0, %c0_0, %c0_1] : memref<8x8x128xbf16, #tpu.memory_space<vmem>>, vector<8x8x128xbf16>
    %1 = vector.shape_cast %0 : vector<8x8x128xbf16> to vector<64x128xbf16>
    %c0_2 = arith.constant 0 : index
    %c0_3 = arith.constant 0 : index
    %2 = vector.load %arg2[%c0_2, %c0_3] : memref<128x384xbf16, #tpu.memory_space<vmem>>, vector<128x384xbf16>
    %cst = arith.constant dense<0.000000e+00> : vector<64x384xf32>
    %3 = tpu.matmul %1, %2, %cst {dimension_numbers = #tpu.dot_dimension_numbers<[1], [0], [0], [1], [0, 0, 1, 1], [], []>} : vector<64x128xbf16>, vector<128x384xbf16>, vector<64x384xf32> -> vector<64x384xf32>
    %c0_4 = arith.constant 0 : index
    %c0_5 = arith.constant 0 : index
    %4 = vector.load %arg4[%c0_4, %c0_5] : memref<1x384xf32, #tpu.memory_space<vmem>>, vector<1x384xf32>
    %5 = vector.broadcast %4 : vector<1x384xf32> to vector<64x384xf32>
    %6 = arith.addf %3, %5 : vector<64x384xf32>
    %7 = vector.shape_cast %6 : vector<64x384xf32> to vector<8x8x384xf32>
    %8 = arith.truncf %7 : vector<8x8x384xf32> to vector<8x8x384xbf16>
    %c0_6 = arith.constant 0 : index
    %c0_7 = arith.constant 0 : index
    %c0_8 = arith.constant 0 : index
    %9 = vector.load %arg12[%c0_6, %c0_7, %c0_8] : memref<8x8x384xbf16, #tpu.memory_space<vmem>>, vector<8x8x384xbf16>
    tpu.vector_store %arg12[%c0_6, %c0_7, %c0_8], %8 {strides = array<i32>} : memref<8x8x384xbf16, #tpu.memory_space<vmem>>, vector<8x8x384xbf16>,
    %c0_9 = arith.constant 0 : index
    %c0_10 = arith.constant 0 : index
    %10 = vector.load %arg6[%c0_9, %c0_10] : memref<128x384xbf16, #tpu.memory_space<vmem>>, vector<128x384xbf16>
    %cst_11 = arith.constant dense<0.000000e+00> : vector<64x384xf32>
    %11 = tpu.matmul %1, %10, %cst_11 {dimension_numbers = #tpu.dot_dimension_numbers<[1], [0], [0], [1], [0, 0, 1, 1], [], []>} : vector<64x128xbf16>, vector<128x384xbf16>, vector<64x384xf32> -> vector<64x384xf32>
    %c0_12 = arith.constant 0 : index
    %c0_13 = arith.constant 0 : index
    %12 = vector.load %arg8[%c0_12, %c0_13] : memref<1x384xf32, #tpu.memory_space<vmem>>, vector<1x384xf32>
    %13 = vector.broadcast %12 : vector<1x384xf32> to vector<64x384xf32>
    %14 = arith.addf %11, %13 : vector<64x384xf32>
    %15 = vector.shape_cast %14 : vector<64x384xf32> to vector<8x8x384xf32>
    %16 = arith.truncf %15 : vector<8x8x384xf32> to vector<8x8x384xbf16>
    %c0_14 = arith.constant 0 : index
    %c0_15 = arith.constant 0 : index
    %c0_16 = arith.constant 0 : index
    %17 = vector.load %arg13[%c0_14, %c0_15, %c0_16] : memref<8x8x384xbf16, #tpu.memory_space<vmem>>, vector<8x8x384xbf16>
    tpu.vector_store %arg13[%c0_14, %c0_15, %c0_16], %16 {strides = array<i32>} : memref<8x8x384xbf16, #tpu.memory_space<vmem>>, vector<8x8x384xbf16>,
    %c0_17 = arith.constant 0 : index
    %c0_18 = arith.constant 0 : index
    %18 = vector.load %arg0[%c0_17, %c0_18] : memref<8x1xi32, #tpu.memory_space<vmem>>, vector<8x1xi32>
    %c0_19 = arith.constant 0 : index
    %c0_20 = arith.constant 0 : index
    %19 = vector.load %arg3[%c0_19, %c0_20] : memref<128x384xbf16, #tpu.memory_space<vmem>>, vector<128x384xbf16>
    %c0_21 = arith.constant 0 : index
    %c0_22 = arith.constant 0 : index
    %20 = vector.load %arg7[%c0_21, %c0_22] : memref<128x384xbf16, #tpu.memory_space<vmem>>, vector<128x384xbf16>
    %c0_23 = arith.constant 0 : index
    %c0_24 = arith.constant 0 : index
    %21 = vector.load %arg5[%c0_23, %c0_24] : memref<1x128xf32, #tpu.memory_space<vmem>>, vector<1x128xf32>
    %22 = vector.shape_cast %21 : vector<1x128xf32> to vector<1x128xf32>
    %23 = vector.broadcast %22 : vector<1x128xf32> to vector<8x128xf32>
    %c0_25 = arith.constant 0 : index
    %c0_26 = arith.constant 0 : index
    %24 = vector.load %arg9[%c0_25, %c0_26] : memref<1x128xf32, #tpu.memory_space<vmem>>, vector<1x128xf32>
    %25 = vector.shape_cast %24 : vector<1x128xf32> to vector<1x128xf32>
    %26 = vector.broadcast %25 : vector<1x128xf32> to vector<8x128xf32>
    %cst_27 = arith.constant 0.000000e+00 : f32
    %27 = vector.broadcast %cst_27 : f32 to vector<8x128xf32>
    %c0_i32 = arith.constant 0 : i32
    %c7_i32 = arith.constant 7 : i32
    %28 = arith.subi %c7_i32, %c0_i32 : i32
    %29 = arith.index_cast %c0_i32 : i32 to index
    %c0_28 = arith.constant 0 : index
    %c0_29 = arith.constant 0 : index
    %30 = vector.load %arg12[%29, %c0_28, %c0_29] : memref<8x8x384xbf16, #tpu.memory_space<vmem>>, vector<1x8x384xbf16>
    %31 = vector.shape_cast %30 : vector<1x8x384xbf16> to vector<8x384xbf16>
    %32 = arith.truncf %27 : vector<8x128xf32> to vector<8x128xbf16>
    %cst_30 = arith.constant dense<0.000000e+00> : vector<8x384xf32>
    %33 = tpu.matmul %32, %19, %cst_30 {dimension_numbers = #tpu.dot_dimension_numbers<[1], [0], [0], [1], [0, 0, 1, 1], [], []>} : vector<8x128xbf16>, vector<128x384xbf16>, vector<8x384xf32> -> vector<8x384xf32>
    %34 = vector.extract_strided_slice %31 {offsets = [0, 0], sizes = [8, 128], strides = [1, 1]} : vector<8x384xbf16> to vector<8x128xbf16>
    %35 = vector.extract_strided_slice %33 {offsets = [0, 0], sizes = [8, 128], strides = [1, 1]} : vector<8x384xf32> to vector<8x128xf32>
    %36 = arith.extf %34 : vector<8x128xbf16> to vector<8x128xf32>
    %37 = arith.addf %36, %35 : vector<8x128xf32>
    %38 = arith.negf %37 : vector<8x128xf32>
    %39 = math.exp %38 : vector<8x128xf32>
    %cst_31 = arith.constant 1.000000e+00 : f32
    %40 = vector.broadcast %cst_31 : f32 to vector<8x128xf32>
    %41 = arith.addf %40, %39 : vector<8x128xf32>
    %42 = arith.divf %40, %41 : vector<8x128xf32>
    %43 = vector.extract_strided_slice %31 {offsets = [0, 128], sizes = [8, 128], strides = [1, 1]} : vector<8x384xbf16> to vector<8x128xbf16>
    %44 = vector.extract_strided_slice %33 {offsets = [0, 128], sizes = [8, 128], strides = [1, 1]} : vector<8x384xf32> to vector<8x128xf32>
    %45 = arith.extf %43 : vector<8x128xbf16> to vector<8x128xf32>
    %46 = arith.addf %45, %44 : vector<8x128xf32>
    %47 = arith.negf %46 : vector<8x128xf32>
    %48 = math.exp %47 : vector<8x128xf32>
    %cst_32 = arith.constant 1.000000e+00 : f32
    %49 = vector.broadcast %cst_32 : f32 to vector<8x128xf32>
    %50 = arith.addf %49, %48 : vector<8x128xf32>
    %51 = arith.divf %49, %50 : vector<8x128xf32>
    %52 = vector.extract_strided_slice %31 {offsets = [0, 256], sizes = [8, 128], strides = [1, 1]} : vector<8x384xbf16> to vector<8x128xbf16>
    %53 = vector.extract_strided_slice %33 {offsets = [0, 256], sizes = [8, 128], strides = [1, 1]} : vector<8x384xf32> to vector<8x128xf32>
    %54 = arith.addf %53, %23 : vector<8x128xf32>
    %55 = arith.mulf %42, %54 : vector<8x128xf32>
    %56 = arith.extf %52 : vector<8x128xbf16> to vector<8x128xf32>
    %57 = arith.addf %56, %55 : vector<8x128xf32>
    %58 = math.tanh %57 : vector<8x128xf32>
    %cst_33 = arith.constant 1.000000e+00 : f32
    %59 = vector.broadcast %cst_33 : f32 to vector<8x128xf32>
    %60 = arith.subf %59, %51 : vector<8x128xf32>
    %61 = arith.mulf %60, %58 : vector<8x128xf32>
    %62 = arith.mulf %51, %27 : vector<8x128xf32>
    %63 = arith.addf %61, %62 : vector<8x128xf32>
    %64 = vector.broadcast %c0_i32 : i32 to vector<8x1xi32>
    %65 = arith.cmpi sgt, %18, %64 : vector<8x1xi32>
    %66 = vector.shape_cast %65 : vector<8x1xi1> to vector<8x1xi1>
    %67 = vector.broadcast %66 : vector<8x1xi1> to vector<8x128xi1>
    %cst_34 = arith.constant 0.000000e+00 : f32
    %68 = vector.broadcast %cst_34 : f32 to vector<8x128xf32>
    %69 = arith.select %67, %63, %68 : vector<8x128xi1>, vector<8x128xf32>
    %70 = arith.index_cast %c0_i32 : i32 to index
    %c0_35 = arith.constant 0 : index
    %c0_36 = arith.constant 0 : index
    %71 = vector.load %arg10[%70, %c0_35, %c0_36] : memref<8x8x128xf32, #tpu.memory_space<vmem>>, vector<1x8x128xf32>
    %72 = vector.shape_cast %71 : vector<1x8x128xf32> to vector<8x128xf32>
    %73 = vector.shape_cast %69 : vector<8x128xf32> to vector<1x8x128xf32>
    tpu.vector_store %arg10[%70, %c0_35, %c0_36], %73 {strides = array<i32>} : memref<8x8x128xf32, #tpu.memory_space<vmem>>, vector<1x8x128xf32>,
    %74 = arith.select %67, %63, %27 : vector<8x128xi1>, vector<8x128xf32>
    %75 = arith.index_cast %28 : i32 to index
    %c0_37 = arith.constant 0 : index
    %c0_38 = arith.constant 0 : index
    %76 = vector.load %arg13[%75, %c0_37, %c0_38] : memref<8x8x384xbf16, #tpu.memory_space<vmem>>, vector<1x8x384xbf16>
    %77 = vector.shape_cast %76 : vector<1x8x384xbf16> to vector<8x384xbf16>
    %78 = arith.truncf %27 : vector<8x128xf32> to vector<8x128xbf16>
    %cst_39 = arith.constant dense<0.000000e+00> : vector<8x384xf32>
    %79 = tpu.matmul %78, %20, %cst_39 {dimension_numbers = #tpu.dot_dimension_numbers<[1], [0], [0], [1], [0, 0, 1, 1], [], []>} : vector<8x128xbf16>, vector<128x384xbf16>, vector<8x384xf32> -> vector<8x384xf32>
    %80 = vector.extract_strided_slice %77 {offsets = [0, 0], sizes = [8, 128], strides = [1, 1]} : vector<8x384xbf16> to vector<8x128xbf16>
    %81 = vector.extract_strided_slice %79 {offsets = [0, 0], sizes = [8, 128], strides = [1, 1]} : vector<8x384xf32> to vector<8x128xf32>
    %82 = arith.extf %80 : vector<8x128xbf16> to vector<8x128xf32>
    %83 = arith.addf %82, %81 : vector<8x128xf32>
    %84 = arith.negf %83 : vector<8x128xf32>
    %85 = math.exp %84 : vector<8x128xf32>
    %cst_40 = arith.constant 1.000000e+00 : f32
    %86 = vector.broadcast %cst_40 : f32 to vector<8x128xf32>
    %87 = arith.addf %86, %85 : vector<8x128xf32>
    %88 = arith.divf %86, %87 : vector<8x128xf32>
    %89 = vector.extract_strided_slice %77 {offsets = [0, 128], sizes = [8, 128], strides = [1, 1]} : vector<8x384xbf16> to vector<8x128xbf16>
    %90 = vector.extract_strided_slice %79 {offsets = [0, 128], sizes = [8, 128], strides = [1, 1]} : vector<8x384xf32> to vector<8x128xf32>
    %91 = arith.extf %89 : vector<8x128xbf16> to vector<8x128xf32>
    %92 = arith.addf %91, %90 : vector<8x128xf32>
    %93 = arith.negf %92 : vector<8x128xf32>
    %94 = math.exp %93 : vector<8x128xf32>
    %cst_41 = arith.constant 1.000000e+00 : f32
    %95 = vector.broadcast %cst_41 : f32 to vector<8x128xf32>
    %96 = arith.addf %95, %94 : vector<8x128xf32>
    %97 = arith.divf %95, %96 : vector<8x128xf32>
    %98 = vector.extract_strided_slice %77 {offsets = [0, 256], sizes = [8, 128], strides = [1, 1]} : vector<8x384xbf16> to vector<8x128xbf16>
    %99 = vector.extract_strided_slice %79 {offsets = [0, 256], sizes = [8, 128], strides = [1, 1]} : vector<8x384xf32> to vector<8x128xf32>
    %100 = arith.addf %99, %26 : vector<8x128xf32>
    %101 = arith.mulf %88, %100 : vector<8x128xf32>
    %102 = arith.extf %98 : vector<8x128xbf16> to vector<8x128xf32>
    %103 = arith.addf %102, %101 : vector<8x128xf32>
    %104 = math.tanh %103 : vector<8x128xf32>
    %cst_42 = arith.constant 1.000000e+00 : f32
    %105 = vector.broadcast %cst_42 : f32 to vector<8x128xf32>
    %106 = arith.subf %105, %97 : vector<8x128xf32>
    %107 = arith.mulf %106, %104 : vector<8x128xf32>
    %108 = arith.mulf %97, %27 : vector<8x128xf32>
    %109 = arith.addf %107, %108 : vector<8x128xf32>
    %110 = vector.broadcast %28 : i32 to vector<8x1xi32>
    %111 = arith.cmpi sgt, %18, %110 : vector<8x1xi32>
    %112 = vector.shape_cast %111 : vector<8x1xi1> to vector<8x1xi1>
    %113 = vector.broadcast %112 : vector<8x1xi1> to vector<8x128xi1>
    %cst_43 = arith.constant 0.000000e+00 : f32
    %114 = vector.broadcast %cst_43 : f32 to vector<8x128xf32>
    %115 = arith.select %113, %109, %114 : vector<8x128xi1>, vector<8x128xf32>
    %116 = arith.select %113, %109, %27 : vector<8x128xi1>, vector<8x128xf32>
    %c4_i32 = arith.constant 4 : i32
    %117 = arith.subi %28, %c4_i32 : i32
    %118 = arith.index_cast %117 : i32 to index
    %c0_44 = arith.constant 0 : index
    %c0_45 = arith.constant 0 : index
    %119 = vector.load %arg14[%118, %c0_44, %c0_45] : memref<4x8x128xf32, #tpu.memory_space<vmem>>, vector<1x8x128xf32>
    %120 = vector.shape_cast %119 : vector<1x8x128xf32> to vector<8x128xf32>
    %121 = vector.shape_cast %115 : vector<8x128xf32> to vector<1x8x128xf32>
    tpu.vector_store %arg14[%118, %c0_44, %c0_45], %121 {strides = array<i32>} : memref<4x8x128xf32, #tpu.memory_space<vmem>>, vector<1x8x128xf32>,
    %c1_i32 = arith.constant 1 : i32
    %c7_i32_46 = arith.constant 7 : i32
    %122 = arith.subi %c7_i32_46, %c1_i32 : i32
    %123 = arith.index_cast %c1_i32 : i32 to index
    %c0_47 = arith.constant 0 : index
    %c0_48 = arith.constant 0 : index
    %124 = vector.load %arg12[%123, %c0_47, %c0_48] : memref<8x8x384xbf16, #tpu.memory_space<vmem>>, vector<1x8x384xbf16>
    %125 = vector.shape_cast %124 : vector<1x8x384xbf16> to vector<8x384xbf16>
    %126 = arith.truncf %74 : vector<8x128xf32> to vector<8x128xbf16>
    %cst_49 = arith.constant dense<0.000000e+00> : vector<8x384xf32>
    %127 = tpu.matmul %126, %19, %cst_49 {dimension_numbers = #tpu.dot_dimension_numbers<[1], [0], [0], [1], [0, 0, 1, 1], [], []>} : vector<8x128xbf16>, vector<128x384xbf16>, vector<8x384xf32> -> vector<8x384xf32>
    %128 = vector.extract_strided_slice %125 {offsets = [0, 0], sizes = [8, 128], strides = [1, 1]} : vector<8x384xbf16> to vector<8x128xbf16>
    %129 = vector.extract_strided_slice %127 {offsets = [0, 0], sizes = [8, 128], strides = [1, 1]} : vector<8x384xf32> to vector<8x128xf32>
    %130 = arith.extf %128 : vector<8x128xbf16> to vector<8x128xf32>
    %131 = arith.addf %130, %129 : vector<8x128xf32>
    %132 = arith.negf %131 : vector<8x128xf32>
    %133 = math.exp %132 : vector<8x128xf32>
    %cst_50 = arith.constant 1.000000e+00 : f32
    %134 = vector.broadcast %cst_50 : f32 to vector<8x128xf32>
    %135 = arith.addf %134, %133 : vector<8x128xf32>
    %136 = arith.divf %134, %135 : vector<8x128xf32>
    %137 = vector.extract_strided_slice %125 {offsets = [0, 128], sizes = [8, 128], strides = [1, 1]} : vector<8x384xbf16> to vector<8x128xbf16>
    %138 = vector.extract_strided_slice %127 {offsets = [0, 128], sizes = [8, 128], strides = [1, 1]} : vector<8x384xf32> to vector<8x128xf32>
    %139 = arith.extf %137 : vector<8x128xbf16> to vector<8x128xf32>
    %140 = arith.addf %139, %138 : vector<8x128xf32>
    %141 = arith.negf %140 : vector<8x128xf32>
    %142 = math.exp %141 : vector<8x128xf32>
    %cst_51 = arith.constant 1.000000e+00 : f32
    %143 = vector.broadcast %cst_51 : f32 to vector<8x128xf32>
    %144 = arith.addf %143, %142 : vector<8x128xf32>
    %145 = arith.divf %143, %144 : vector<8x128xf32>
    %146 = vector.extract_strided_slice %125 {offsets = [0, 256], sizes = [8, 128], strides = [1, 1]} : vector<8x384xbf16> to vector<8x128xbf16>
    %147 = vector.extract_strided_slice %127 {offsets = [0, 256], sizes = [8, 128], strides = [1, 1]} : vector<8x384xf32> to vector<8x128xf32>
    %148 = arith.addf %147, %23 : vector<8x128xf32>
    %149 = arith.mulf %136, %148 : vector<8x128xf32>
    %150 = arith.extf %146 : vector<8x128xbf16> to vector<8x128xf32>
    %151 = arith.addf %150, %149 : vector<8x128xf32>
    %152 = math.tanh %151 : vector<8x128xf32>
    %cst_52 = arith.constant 1.000000e+00 : f32
    %153 = vector.broadcast %cst_52 : f32 to vector<8x128xf32>
    %154 = arith.subf %153, %145 : vector<8x128xf32>
    %155 = arith.mulf %154, %152 : vector<8x128xf32>
    %156 = arith.mulf %145, %74 : vector<8x128xf32>
    %157 = arith.addf %155, %156 : vector<8x128xf32>
    %158 = vector.broadcast %c1_i32 : i32 to vector<8x1xi32>
    %159 = arith.cmpi sgt, %18, %158 : vector<8x1xi32>
    %160 = vector.shape_cast %159 : vector<8x1xi1> to vector<8x1xi1>
    %161 = vector.broadcast %160 : vector<8x1xi1> to vector<8x128xi1>
    %cst_53 = arith.constant 0.000000e+00 : f32
    %162 = vector.broadcast %cst_53 : f32 to vector<8x128xf32>
    %163 = arith.select %161, %157, %162 : vector<8x128xi1>, vector<8x128xf32>
    %164 = arith.index_cast %c1_i32 : i32 to index
    %c0_54 = arith.constant 0 : index
    %c0_55 = arith.constant 0 : index
    %165 = vector.load %arg10[%164, %c0_54, %c0_55] : memref<8x8x128xf32, #tpu.memory_space<vmem>>, vector<1x8x128xf32>
    %166 = vector.shape_cast %165 : vector<1x8x128xf32> to vector<8x128xf32>
    %167 = vector.shape_cast %163 : vector<8x128xf32> to vector<1x8x128xf32>
    tpu.vector_store %arg10[%164, %c0_54, %c0_55], %167 {strides = array<i32>} : memref<8x8x128xf32, #tpu.memory_space<vmem>>, vector<1x8x128xf32>,
    %168 = arith.select %161, %157, %74 : vector<8x128xi1>, vector<8x128xf32>
    %169 = arith.index_cast %122 : i32 to index
    %c0_56 = arith.constant 0 : index
    %c0_57 = arith.constant 0 : index
    %170 = vector.load %arg13[%169, %c0_56, %c0_57] : memref<8x8x384xbf16, #tpu.memory_space<vmem>>, vector<1x8x384xbf16>
    %171 = vector.shape_cast %170 : vector<1x8x384xbf16> to vector<8x384xbf16>
    %172 = arith.truncf %116 : vector<8x128xf32> to vector<8x128xbf16>
    %cst_58 = arith.constant dense<0.000000e+00> : vector<8x384xf32>
    %173 = tpu.matmul %172, %20, %cst_58 {dimension_numbers = #tpu.dot_dimension_numbers<[1], [0], [0], [1], [0, 0, 1, 1], [], []>} : vector<8x128xbf16>, vector<128x384xbf16>, vector<8x384xf32> -> vector<8x384xf32>
    %174 = vector.extract_strided_slice %171 {offsets = [0, 0], sizes = [8, 128], strides = [1, 1]} : vector<8x384xbf16> to vector<8x128xbf16>
    %175 = vector.extract_strided_slice %173 {offsets = [0, 0], sizes = [8, 128], strides = [1, 1]} : vector<8x384xf32> to vector<8x128xf32>
    %176 = arith.extf %174 : vector<8x128xbf16> to vector<8x128xf32>
    %177 = arith.addf %176, %175 : vector<8x128xf32>
    %178 = arith.negf %177 : vector<8x128xf32>
    %179 = math.exp %178 : vector<8x128xf32>
    %cst_59 = arith.constant 1.000000e+00 : f32
    %180 = vector.broadcast %cst_59 : f32 to vector<8x128xf32>
    %181 = arith.addf %180, %179 : vector<8x128xf32>
    %182 = arith.divf %180, %181 : vector<8x128xf32>
    %183 = vector.extract_strided_slice %171 {offsets = [0, 128], sizes = [8, 128], strides = [1, 1]} : vector<8x384xbf16> to vector<8x128xbf16>
    %184 = vector.extract_strided_slice %173 {offsets = [0, 128], sizes = [8, 128], strides = [1, 1]} : vector<8x384xf32> to vector<8x128xf32>
    %185 = arith.extf %183 : vector<8x128xbf16> to vector<8x128xf32>
    %186 = arith.addf %185, %184 : vector<8x128xf32>
    %187 = arith.negf %186 : vector<8x128xf32>
    %188 = math.exp %187 : vector<8x128xf32>
    %cst_60 = arith.constant 1.000000e+00 : f32
    %189 = vector.broadcast %cst_60 : f32 to vector<8x128xf32>
    %190 = arith.addf %189, %188 : vector<8x128xf32>
    %191 = arith.divf %189, %190 : vector<8x128xf32>
    %192 = vector.extract_strided_slice %171 {offsets = [0, 256], sizes = [8, 128], strides = [1, 1]} : vector<8x384xbf16> to vector<8x128xbf16>
    %193 = vector.extract_strided_slice %173 {offsets = [0, 256], sizes = [8, 128], strides = [1, 1]} : vector<8x384xf32> to vector<8x128xf32>
    %194 = arith.addf %193, %26 : vector<8x128xf32>
    %195 = arith.mulf %182, %194 : vector<8x128xf32>
    %196 = arith.extf %192 : vector<8x128xbf16> to vector<8x128xf32>
    %197 = arith.addf %196, %195 : vector<8x128xf32>
    %198 = math.tanh %197 : vector<8x128xf32>
    %cst_61 = arith.constant 1.000000e+00 : f32
    %199 = vector.broadcast %cst_61 : f32 to vector<8x128xf32>
    %200 = arith.subf %199, %191 : vector<8x128xf32>
    %201 = arith.mulf %200, %198 : vector<8x128xf32>
    %202 = arith.mulf %191, %116 : vector<8x128xf32>
    %203 = arith.addf %201, %202 : vector<8x128xf32>
    %204 = vector.broadcast %122 : i32 to vector<8x1xi32>
    %205 = arith.cmpi sgt, %18, %204 : vector<8x1xi32>
    %206 = vector.shape_cast %205 : vector<8x1xi1> to vector<8x1xi1>
    %207 = vector.broadcast %206 : vector<8x1xi1> to vector<8x128xi1>
    %cst_62 = arith.constant 0.000000e+00 : f32
    %208 = vector.broadcast %cst_62 : f32 to vector<8x128xf32>
    %209 = arith.select %207, %203, %208 : vector<8x128xi1>, vector<8x128xf32>
    %210 = arith.select %207, %203, %116 : vector<8x128xi1>, vector<8x128xf32>
    %c4_i32_63 = arith.constant 4 : i32
    %211 = arith.subi %122, %c4_i32_63 : i32
    %212 = arith.index_cast %211 : i32 to index
    %c0_64 = arith.constant 0 : index
    %c0_65 = arith.constant 0 : index
    %213 = vector.load %arg14[%212, %c0_64, %c0_65] : memref<4x8x128xf32, #tpu.memory_space<vmem>>, vector<1x8x128xf32>
    %214 = vector.shape_cast %213 : vector<1x8x128xf32> to vector<8x128xf32>
    %215 = vector.shape_cast %209 : vector<8x128xf32> to vector<1x8x128xf32>
    tpu.vector_store %arg14[%212, %c0_64, %c0_65], %215 {strides = array<i32>} : memref<4x8x128xf32, #tpu.memory_space<vmem>>, vector<1x8x128xf32>,
    %c2_i32 = arith.constant 2 : i32
    %c7_i32_66 = arith.constant 7 : i32
    %216 = arith.subi %c7_i32_66, %c2_i32 : i32
    %217 = arith.index_cast %c2_i32 : i32 to index
    %c0_67 = arith.constant 0 : index
    %c0_68 = arith.constant 0 : index
    %218 = vector.load %arg12[%217, %c0_67, %c0_68] : memref<8x8x384xbf16, #tpu.memory_space<vmem>>, vector<1x8x384xbf16>
    %219 = vector.shape_cast %218 : vector<1x8x384xbf16> to vector<8x384xbf16>
    %220 = arith.truncf %168 : vector<8x128xf32> to vector<8x128xbf16>
    %cst_69 = arith.constant dense<0.000000e+00> : vector<8x384xf32>
    %221 = tpu.matmul %220, %19, %cst_69 {dimension_numbers = #tpu.dot_dimension_numbers<[1], [0], [0], [1], [0, 0, 1, 1], [], []>} : vector<8x128xbf16>, vector<128x384xbf16>, vector<8x384xf32> -> vector<8x384xf32>
    %222 = vector.extract_strided_slice %219 {offsets = [0, 0], sizes = [8, 128], strides = [1, 1]} : vector<8x384xbf16> to vector<8x128xbf16>
    %223 = vector.extract_strided_slice %221 {offsets = [0, 0], sizes = [8, 128], strides = [1, 1]} : vector<8x384xf32> to vector<8x128xf32>
    %224 = arith.extf %222 : vector<8x128xbf16> to vector<8x128xf32>
    %225 = arith.addf %224, %223 : vector<8x128xf32>
    %226 = arith.negf %225 : vector<8x128xf32>
    %227 = math.exp %226 : vector<8x128xf32>
    %cst_70 = arith.constant 1.000000e+00 : f32
    %228 = vector.broadcast %cst_70 : f32 to vector<8x128xf32>
    %229 = arith.addf %228, %227 : vector<8x128xf32>
    %230 = arith.divf %228, %229 : vector<8x128xf32>
    %231 = vector.extract_strided_slice %219 {offsets = [0, 128], sizes = [8, 128], strides = [1, 1]} : vector<8x384xbf16> to vector<8x128xbf16>
    %232 = vector.extract_strided_slice %221 {offsets = [0, 128], sizes = [8, 128], strides = [1, 1]} : vector<8x384xf32> to vector<8x128xf32>
    %233 = arith.extf %231 : vector<8x128xbf16> to vector<8x128xf32>
    %234 = arith.addf %233, %232 : vector<8x128xf32>
    %235 = arith.negf %234 : vector<8x128xf32>
    %236 = math.exp %235 : vector<8x128xf32>
    %cst_71 = arith.constant 1.000000e+00 : f32
    %237 = vector.broadcast %cst_71 : f32 to vector<8x128xf32>
    %238 = arith.addf %237, %236 : vector<8x128xf32>
    %239 = arith.divf %237, %238 : vector<8x128xf32>
    %240 = vector.extract_strided_slice %219 {offsets = [0, 256], sizes = [8, 128], strides = [1, 1]} : vector<8x384xbf16> to vector<8x128xbf16>
    %241 = vector.extract_strided_slice %221 {offsets = [0, 256], sizes = [8, 128], strides = [1, 1]} : vector<8x384xf32> to vector<8x128xf32>
    %242 = arith.addf %241, %23 : vector<8x128xf32>
    %243 = arith.mulf %230, %242 : vector<8x128xf32>
    %244 = arith.extf %240 : vector<8x128xbf16> to vector<8x128xf32>
    %245 = arith.addf %244, %243 : vector<8x128xf32>
    %246 = math.tanh %245 : vector<8x128xf32>
    %cst_72 = arith.constant 1.000000e+00 : f32
    %247 = vector.broadcast %cst_72 : f32 to vector<8x128xf32>
    %248 = arith.subf %247, %239 : vector<8x128xf32>
    %249 = arith.mulf %248, %246 : vector<8x128xf32>
    %250 = arith.mulf %239, %168 : vector<8x128xf32>
    %251 = arith.addf %249, %250 : vector<8x128xf32>
    %252 = vector.broadcast %c2_i32 : i32 to vector<8x1xi32>
    %253 = arith.cmpi sgt, %18, %252 : vector<8x1xi32>
    %254 = vector.shape_cast %253 : vector<8x1xi1> to vector<8x1xi1>
    %255 = vector.broadcast %254 : vector<8x1xi1> to vector<8x128xi1>
    %cst_73 = arith.constant 0.000000e+00 : f32
    %256 = vector.broadcast %cst_73 : f32 to vector<8x128xf32>
    %257 = arith.select %255, %251, %256 : vector<8x128xi1>, vector<8x128xf32>
    %258 = arith.index_cast %c2_i32 : i32 to index
    %c0_74 = arith.constant 0 : index
    %c0_75 = arith.constant 0 : index
    %259 = vector.load %arg10[%258, %c0_74, %c0_75] : memref<8x8x128xf32, #tpu.memory_space<vmem>>, vector<1x8x128xf32>
    %260 = vector.shape_cast %259 : vector<1x8x128xf32> to vector<8x128xf32>
    %261 = vector.shape_cast %257 : vector<8x128xf32> to vector<1x8x128xf32>
    tpu.vector_store %arg10[%258, %c0_74, %c0_75], %261 {strides = array<i32>} : memref<8x8x128xf32, #tpu.memory_space<vmem>>, vector<1x8x128xf32>,
    %262 = arith.select %255, %251, %168 : vector<8x128xi1>, vector<8x128xf32>
    %263 = arith.index_cast %216 : i32 to index
    %c0_76 = arith.constant 0 : index
    %c0_77 = arith.constant 0 : index
    %264 = vector.load %arg13[%263, %c0_76, %c0_77] : memref<8x8x384xbf16, #tpu.memory_space<vmem>>, vector<1x8x384xbf16>
    %265 = vector.shape_cast %264 : vector<1x8x384xbf16> to vector<8x384xbf16>
    %266 = arith.truncf %210 : vector<8x128xf32> to vector<8x128xbf16>
    %cst_78 = arith.constant dense<0.000000e+00> : vector<8x384xf32>
    %267 = tpu.matmul %266, %20, %cst_78 {dimension_numbers = #tpu.dot_dimension_numbers<[1], [0], [0], [1], [0, 0, 1, 1], [], []>} : vector<8x128xbf16>, vector<128x384xbf16>, vector<8x384xf32> -> vector<8x384xf32>
    %268 = vector.extract_strided_slice %265 {offsets = [0, 0], sizes = [8, 128], strides = [1, 1]} : vector<8x384xbf16> to vector<8x128xbf16>
    %269 = vector.extract_strided_slice %267 {offsets = [0, 0], sizes = [8, 128], strides = [1, 1]} : vector<8x384xf32> to vector<8x128xf32>
    %270 = arith.extf %268 : vector<8x128xbf16> to vector<8x128xf32>
    %271 = arith.addf %270, %269 : vector<8x128xf32>
    %272 = arith.negf %271 : vector<8x128xf32>
    %273 = math.exp %272 : vector<8x128xf32>
    %cst_79 = arith.constant 1.000000e+00 : f32
    %274 = vector.broadcast %cst_79 : f32 to vector<8x128xf32>
    %275 = arith.addf %274, %273 : vector<8x128xf32>
    %276 = arith.divf %274, %275 : vector<8x128xf32>
    %277 = vector.extract_strided_slice %265 {offsets = [0, 128], sizes = [8, 128], strides = [1, 1]} : vector<8x384xbf16> to vector<8x128xbf16>
    %278 = vector.extract_strided_slice %267 {offsets = [0, 128], sizes = [8, 128], strides = [1, 1]} : vector<8x384xf32> to vector<8x128xf32>
    %279 = arith.extf %277 : vector<8x128xbf16> to vector<8x128xf32>
    %280 = arith.addf %279, %278 : vector<8x128xf32>
    %281 = arith.negf %280 : vector<8x128xf32>
    %282 = math.exp %281 : vector<8x128xf32>
    %cst_80 = arith.constant 1.000000e+00 : f32
    %283 = vector.broadcast %cst_80 : f32 to vector<8x128xf32>
    %284 = arith.addf %283, %282 : vector<8x128xf32>
    %285 = arith.divf %283, %284 : vector<8x128xf32>
    %286 = vector.extract_strided_slice %265 {offsets = [0, 256], sizes = [8, 128], strides = [1, 1]} : vector<8x384xbf16> to vector<8x128xbf16>
    %287 = vector.extract_strided_slice %267 {offsets = [0, 256], sizes = [8, 128], strides = [1, 1]} : vector<8x384xf32> to vector<8x128xf32>
    %288 = arith.addf %287, %26 : vector<8x128xf32>
    %289 = arith.mulf %276, %288 : vector<8x128xf32>
    %290 = arith.extf %286 : vector<8x128xbf16> to vector<8x128xf32>
    %291 = arith.addf %290, %289 : vector<8x128xf32>
    %292 = math.tanh %291 : vector<8x128xf32>
    %cst_81 = arith.constant 1.000000e+00 : f32
    %293 = vector.broadcast %cst_81 : f32 to vector<8x128xf32>
    %294 = arith.subf %293, %285 : vector<8x128xf32>
    %295 = arith.mulf %294, %292 : vector<8x128xf32>
    %296 = arith.mulf %285, %210 : vector<8x128xf32>
    %297 = arith.addf %295, %296 : vector<8x128xf32>
    %298 = vector.broadcast %216 : i32 to vector<8x1xi32>
    %299 = arith.cmpi sgt, %18, %298 : vector<8x1xi32>
    %300 = vector.shape_cast %299 : vector<8x1xi1> to vector<8x1xi1>
    %301 = vector.broadcast %300 : vector<8x1xi1> to vector<8x128xi1>
    %cst_82 = arith.constant 0.000000e+00 : f32
    %302 = vector.broadcast %cst_82 : f32 to vector<8x128xf32>
    %303 = arith.select %301, %297, %302 : vector<8x128xi1>, vector<8x128xf32>
    %304 = arith.select %301, %297, %210 : vector<8x128xi1>, vector<8x128xf32>
    %c4_i32_83 = arith.constant 4 : i32
    %305 = arith.subi %216, %c4_i32_83 : i32
    %306 = arith.index_cast %305 : i32 to index
    %c0_84 = arith.constant 0 : index
    %c0_85 = arith.constant 0 : index
    %307 = vector.load %arg14[%306, %c0_84, %c0_85] : memref<4x8x128xf32, #tpu.memory_space<vmem>>, vector<1x8x128xf32>
    %308 = vector.shape_cast %307 : vector<1x8x128xf32> to vector<8x128xf32>
    %309 = vector.shape_cast %303 : vector<8x128xf32> to vector<1x8x128xf32>
    tpu.vector_store %arg14[%306, %c0_84, %c0_85], %309 {strides = array<i32>} : memref<4x8x128xf32, #tpu.memory_space<vmem>>, vector<1x8x128xf32>,
    %c3_i32 = arith.constant 3 : i32
    %c7_i32_86 = arith.constant 7 : i32
    %310 = arith.subi %c7_i32_86, %c3_i32 : i32
    %311 = arith.index_cast %c3_i32 : i32 to index
    %c0_87 = arith.constant 0 : index
    %c0_88 = arith.constant 0 : index
    %312 = vector.load %arg12[%311, %c0_87, %c0_88] : memref<8x8x384xbf16, #tpu.memory_space<vmem>>, vector<1x8x384xbf16>
    %313 = vector.shape_cast %312 : vector<1x8x384xbf16> to vector<8x384xbf16>
    %314 = arith.truncf %262 : vector<8x128xf32> to vector<8x128xbf16>
    %cst_89 = arith.constant dense<0.000000e+00> : vector<8x384xf32>
    %315 = tpu.matmul %314, %19, %cst_89 {dimension_numbers = #tpu.dot_dimension_numbers<[1], [0], [0], [1], [0, 0, 1, 1], [], []>} : vector<8x128xbf16>, vector<128x384xbf16>, vector<8x384xf32> -> vector<8x384xf32>
    %316 = vector.extract_strided_slice %313 {offsets = [0, 0], sizes = [8, 128], strides = [1, 1]} : vector<8x384xbf16> to vector<8x128xbf16>
    %317 = vector.extract_strided_slice %315 {offsets = [0, 0], sizes = [8, 128], strides = [1, 1]} : vector<8x384xf32> to vector<8x128xf32>
    %318 = arith.extf %316 : vector<8x128xbf16> to vector<8x128xf32>
    %319 = arith.addf %318, %317 : vector<8x128xf32>
    %320 = arith.negf %319 : vector<8x128xf32>
    %321 = math.exp %320 : vector<8x128xf32>
    %cst_90 = arith.constant 1.000000e+00 : f32
    %322 = vector.broadcast %cst_90 : f32 to vector<8x128xf32>
    %323 = arith.addf %322, %321 : vector<8x128xf32>
    %324 = arith.divf %322, %323 : vector<8x128xf32>
    %325 = vector.extract_strided_slice %313 {offsets = [0, 128], sizes = [8, 128], strides = [1, 1]} : vector<8x384xbf16> to vector<8x128xbf16>
    %326 = vector.extract_strided_slice %315 {offsets = [0, 128], sizes = [8, 128], strides = [1, 1]} : vector<8x384xf32> to vector<8x128xf32>
    %327 = arith.extf %325 : vector<8x128xbf16> to vector<8x128xf32>
    %328 = arith.addf %327, %326 : vector<8x128xf32>
    %329 = arith.negf %328 : vector<8x128xf32>
    %330 = math.exp %329 : vector<8x128xf32>
    %cst_91 = arith.constant 1.000000e+00 : f32
    %331 = vector.broadcast %cst_91 : f32 to vector<8x128xf32>
    %332 = arith.addf %331, %330 : vector<8x128xf32>
    %333 = arith.divf %331, %332 : vector<8x128xf32>
    %334 = vector.extract_strided_slice %313 {offsets = [0, 256], sizes = [8, 128], strides = [1, 1]} : vector<8x384xbf16> to vector<8x128xbf16>
    %335 = vector.extract_strided_slice %315 {offsets = [0, 256], sizes = [8, 128], strides = [1, 1]} : vector<8x384xf32> to vector<8x128xf32>
    %336 = arith.addf %335, %23 : vector<8x128xf32>
    %337 = arith.mulf %324, %336 : vector<8x128xf32>
    %338 = arith.extf %334 : vector<8x128xbf16> to vector<8x128xf32>
    %339 = arith.addf %338, %337 : vector<8x128xf32>
    %340 = math.tanh %339 : vector<8x128xf32>
    %cst_92 = arith.constant 1.000000e+00 : f32
    %341 = vector.broadcast %cst_92 : f32 to vector<8x128xf32>
    %342 = arith.subf %341, %333 : vector<8x128xf32>
    %343 = arith.mulf %342, %340 : vector<8x128xf32>
    %344 = arith.mulf %333, %262 : vector<8x128xf32>
    %345 = arith.addf %343, %344 : vector<8x128xf32>
    %346 = vector.broadcast %c3_i32 : i32 to vector<8x1xi32>
    %347 = arith.cmpi sgt, %18, %346 : vector<8x1xi32>
    %348 = vector.shape_cast %347 : vector<8x1xi1> to vector<8x1xi1>
    %349 = vector.broadcast %348 : vector<8x1xi1> to vector<8x128xi1>
    %cst_93 = arith.constant 0.000000e+00 : f32
    %350 = vector.broadcast %cst_93 : f32 to vector<8x128xf32>
    %351 = arith.select %349, %345, %350 : vector<8x128xi1>, vector<8x128xf32>
    %352 = arith.index_cast %c3_i32 : i32 to index
    %c0_94 = arith.constant 0 : index
    %c0_95 = arith.constant 0 : index
    %353 = vector.load %arg10[%352, %c0_94, %c0_95] : memref<8x8x128xf32, #tpu.memory_space<vmem>>, vector<1x8x128xf32>
    %354 = vector.shape_cast %353 : vector<1x8x128xf32> to vector<8x128xf32>
    %355 = vector.shape_cast %351 : vector<8x128xf32> to vector<1x8x128xf32>
    tpu.vector_store %arg10[%352, %c0_94, %c0_95], %355 {strides = array<i32>} : memref<8x8x128xf32, #tpu.memory_space<vmem>>, vector<1x8x128xf32>,
    %356 = arith.select %349, %345, %262 : vector<8x128xi1>, vector<8x128xf32>
    %357 = arith.index_cast %310 : i32 to index
    %c0_96 = arith.constant 0 : index
    %c0_97 = arith.constant 0 : index
    %358 = vector.load %arg13[%357, %c0_96, %c0_97] : memref<8x8x384xbf16, #tpu.memory_space<vmem>>, vector<1x8x384xbf16>
    %359 = vector.shape_cast %358 : vector<1x8x384xbf16> to vector<8x384xbf16>
    %360 = arith.truncf %304 : vector<8x128xf32> to vector<8x128xbf16>
    %cst_98 = arith.constant dense<0.000000e+00> : vector<8x384xf32>
    %361 = tpu.matmul %360, %20, %cst_98 {dimension_numbers = #tpu.dot_dimension_numbers<[1], [0], [0], [1], [0, 0, 1, 1], [], []>} : vector<8x128xbf16>, vector<128x384xbf16>, vector<8x384xf32> -> vector<8x384xf32>
    %362 = vector.extract_strided_slice %359 {offsets = [0, 0], sizes = [8, 128], strides = [1, 1]} : vector<8x384xbf16> to vector<8x128xbf16>
    %363 = vector.extract_strided_slice %361 {offsets = [0, 0], sizes = [8, 128], strides = [1, 1]} : vector<8x384xf32> to vector<8x128xf32>
    %364 = arith.extf %362 : vector<8x128xbf16> to vector<8x128xf32>
    %365 = arith.addf %364, %363 : vector<8x128xf32>
    %366 = arith.negf %365 : vector<8x128xf32>
    %367 = math.exp %366 : vector<8x128xf32>
    %cst_99 = arith.constant 1.000000e+00 : f32
    %368 = vector.broadcast %cst_99 : f32 to vector<8x128xf32>
    %369 = arith.addf %368, %367 : vector<8x128xf32>
    %370 = arith.divf %368, %369 : vector<8x128xf32>
    %371 = vector.extract_strided_slice %359 {offsets = [0, 128], sizes = [8, 128], strides = [1, 1]} : vector<8x384xbf16> to vector<8x128xbf16>
    %372 = vector.extract_strided_slice %361 {offsets = [0, 128], sizes = [8, 128], strides = [1, 1]} : vector<8x384xf32> to vector<8x128xf32>
    %373 = arith.extf %371 : vector<8x128xbf16> to vector<8x128xf32>
    %374 = arith.addf %373, %372 : vector<8x128xf32>
    %375 = arith.negf %374 : vector<8x128xf32>
    %376 = math.exp %375 : vector<8x128xf32>
    %cst_100 = arith.constant 1.000000e+00 : f32
    %377 = vector.broadcast %cst_100 : f32 to vector<8x128xf32>
    %378 = arith.addf %377, %376 : vector<8x128xf32>
    %379 = arith.divf %377, %378 : vector<8x128xf32>
    %380 = vector.extract_strided_slice %359 {offsets = [0, 256], sizes = [8, 128], strides = [1, 1]} : vector<8x384xbf16> to vector<8x128xbf16>
    %381 = vector.extract_strided_slice %361 {offsets = [0, 256], sizes = [8, 128], strides = [1, 1]} : vector<8x384xf32> to vector<8x128xf32>
    %382 = arith.addf %381, %26 : vector<8x128xf32>
    %383 = arith.mulf %370, %382 : vector<8x128xf32>
    %384 = arith.extf %380 : vector<8x128xbf16> to vector<8x128xf32>
    %385 = arith.addf %384, %383 : vector<8x128xf32>
    %386 = math.tanh %385 : vector<8x128xf32>
    %cst_101 = arith.constant 1.000000e+00 : f32
    %387 = vector.broadcast %cst_101 : f32 to vector<8x128xf32>
    %388 = arith.subf %387, %379 : vector<8x128xf32>
    %389 = arith.mulf %388, %386 : vector<8x128xf32>
    %390 = arith.mulf %379, %304 : vector<8x128xf32>
    %391 = arith.addf %389, %390 : vector<8x128xf32>
    %392 = vector.broadcast %310 : i32 to vector<8x1xi32>
    %393 = arith.cmpi sgt, %18, %392 : vector<8x1xi32>
    %394 = vector.shape_cast %393 : vector<8x1xi1> to vector<8x1xi1>
    %395 = vector.broadcast %394 : vector<8x1xi1> to vector<8x128xi1>
    %cst_102 = arith.constant 0.000000e+00 : f32
    %396 = vector.broadcast %cst_102 : f32 to vector<8x128xf32>
    %397 = arith.select %395, %391, %396 : vector<8x128xi1>, vector<8x128xf32>
    %398 = arith.select %395, %391, %304 : vector<8x128xi1>, vector<8x128xf32>
    %c4_i32_103 = arith.constant 4 : i32
    %399 = arith.subi %310, %c4_i32_103 : i32
    %400 = arith.index_cast %399 : i32 to index
    %c0_104 = arith.constant 0 : index
    %c0_105 = arith.constant 0 : index
    %401 = vector.load %arg14[%400, %c0_104, %c0_105] : memref<4x8x128xf32, #tpu.memory_space<vmem>>, vector<1x8x128xf32>
    %402 = vector.shape_cast %401 : vector<1x8x128xf32> to vector<8x128xf32>
    %403 = vector.shape_cast %397 : vector<8x128xf32> to vector<1x8x128xf32>
    tpu.vector_store %arg14[%400, %c0_104, %c0_105], %403 {strides = array<i32>} : memref<4x8x128xf32, #tpu.memory_space<vmem>>, vector<1x8x128xf32>,
    %c4_i32_106 = arith.constant 4 : i32
    %c4_i32_107 = arith.constant 4 : i32
    %c7_i32_108 = arith.constant 7 : i32
    %404 = arith.subi %c7_i32_108, %c4_i32_107 : i32
    %405 = arith.index_cast %c4_i32_107 : i32 to index
    %c0_109 = arith.constant 0 : index
    %c0_110 = arith.constant 0 : index
    %406 = vector.load %arg12[%405, %c0_109, %c0_110] : memref<8x8x384xbf16, #tpu.memory_space<vmem>>, vector<1x8x384xbf16>
    %407 = vector.shape_cast %406 : vector<1x8x384xbf16> to vector<8x384xbf16>
    %408 = arith.truncf %356 : vector<8x128xf32> to vector<8x128xbf16>
    %cst_111 = arith.constant dense<0.000000e+00> : vector<8x384xf32>
    %409 = tpu.matmul %408, %19, %cst_111 {dimension_numbers = #tpu.dot_dimension_numbers<[1], [0], [0], [1], [0, 0, 1, 1], [], []>} : vector<8x128xbf16>, vector<128x384xbf16>, vector<8x384xf32> -> vector<8x384xf32>
    %410 = vector.extract_strided_slice %407 {offsets = [0, 0], sizes = [8, 128], strides = [1, 1]} : vector<8x384xbf16> to vector<8x128xbf16>
    %411 = vector.extract_strided_slice %409 {offsets = [0, 0], sizes = [8, 128], strides = [1, 1]} : vector<8x384xf32> to vector<8x128xf32>
    %412 = arith.extf %410 : vector<8x128xbf16> to vector<8x128xf32>
    %413 = arith.addf %412, %411 : vector<8x128xf32>
    %414 = arith.negf %413 : vector<8x128xf32>
    %415 = math.exp %414 : vector<8x128xf32>
    %cst_112 = arith.constant 1.000000e+00 : f32
    %416 = vector.broadcast %cst_112 : f32 to vector<8x128xf32>
    %417 = arith.addf %416, %415 : vector<8x128xf32>
    %418 = arith.divf %416, %417 : vector<8x128xf32>
    %419 = vector.extract_strided_slice %407 {offsets = [0, 128], sizes = [8, 128], strides = [1, 1]} : vector<8x384xbf16> to vector<8x128xbf16>
    %420 = vector.extract_strided_slice %409 {offsets = [0, 128], sizes = [8, 128], strides = [1, 1]} : vector<8x384xf32> to vector<8x128xf32>
    %421 = arith.extf %419 : vector<8x128xbf16> to vector<8x128xf32>
    %422 = arith.addf %421, %420 : vector<8x128xf32>
    %423 = arith.negf %422 : vector<8x128xf32>
    %424 = math.exp %423 : vector<8x128xf32>
    %cst_113 = arith.constant 1.000000e+00 : f32
    %425 = vector.broadcast %cst_113 : f32 to vector<8x128xf32>
    %426 = arith.addf %425, %424 : vector<8x128xf32>
    %427 = arith.divf %425, %426 : vector<8x128xf32>
    %428 = vector.extract_strided_slice %407 {offsets = [0, 256], sizes = [8, 128], strides = [1, 1]} : vector<8x384xbf16> to vector<8x128xbf16>
    %429 = vector.extract_strided_slice %409 {offsets = [0, 256], sizes = [8, 128], strides = [1, 1]} : vector<8x384xf32> to vector<8x128xf32>
    %430 = arith.addf %429, %23 : vector<8x128xf32>
    %431 = arith.mulf %418, %430 : vector<8x128xf32>
    %432 = arith.extf %428 : vector<8x128xbf16> to vector<8x128xf32>
    %433 = arith.addf %432, %431 : vector<8x128xf32>
    %434 = math.tanh %433 : vector<8x128xf32>
    %cst_114 = arith.constant 1.000000e+00 : f32
    %435 = vector.broadcast %cst_114 : f32 to vector<8x128xf32>
    %436 = arith.subf %435, %427 : vector<8x128xf32>
    %437 = arith.mulf %436, %434 : vector<8x128xf32>
    %438 = arith.mulf %427, %356 : vector<8x128xf32>
    %439 = arith.addf %437, %438 : vector<8x128xf32>
    %440 = vector.broadcast %c4_i32_107 : i32 to vector<8x1xi32>
    %441 = arith.cmpi sgt, %18, %440 : vector<8x1xi32>
    %442 = vector.shape_cast %441 : vector<8x1xi1> to vector<8x1xi1>
    %443 = vector.broadcast %442 : vector<8x1xi1> to vector<8x128xi1>
    %cst_115 = arith.constant 0.000000e+00 : f32
    %444 = vector.broadcast %cst_115 : f32 to vector<8x128xf32>
    %445 = arith.select %443, %439, %444 : vector<8x128xi1>, vector<8x128xf32>
    %446 = arith.index_cast %c4_i32_107 : i32 to index
    %c0_116 = arith.constant 0 : index
    %c0_117 = arith.constant 0 : index
    %447 = vector.load %arg10[%446, %c0_116, %c0_117] : memref<8x8x128xf32, #tpu.memory_space<vmem>>, vector<1x8x128xf32>
    %448 = vector.shape_cast %447 : vector<1x8x128xf32> to vector<8x128xf32>
    %449 = vector.shape_cast %445 : vector<8x128xf32> to vector<1x8x128xf32>
    tpu.vector_store %arg10[%446, %c0_116, %c0_117], %449 {strides = array<i32>} : memref<8x8x128xf32, #tpu.memory_space<vmem>>, vector<1x8x128xf32>,
    %450 = arith.select %443, %439, %356 : vector<8x128xi1>, vector<8x128xf32>
    %451 = arith.index_cast %404 : i32 to index
    %c0_118 = arith.constant 0 : index
    %c0_119 = arith.constant 0 : index
    %452 = vector.load %arg13[%451, %c0_118, %c0_119] : memref<8x8x384xbf16, #tpu.memory_space<vmem>>, vector<1x8x384xbf16>
    %453 = vector.shape_cast %452 : vector<1x8x384xbf16> to vector<8x384xbf16>
    %454 = arith.truncf %398 : vector<8x128xf32> to vector<8x128xbf16>
    %cst_120 = arith.constant dense<0.000000e+00> : vector<8x384xf32>
    %455 = tpu.matmul %454, %20, %cst_120 {dimension_numbers = #tpu.dot_dimension_numbers<[1], [0], [0], [1], [0, 0, 1, 1], [], []>} : vector<8x128xbf16>, vector<128x384xbf16>, vector<8x384xf32> -> vector<8x384xf32>
    %456 = vector.extract_strided_slice %453 {offsets = [0, 0], sizes = [8, 128], strides = [1, 1]} : vector<8x384xbf16> to vector<8x128xbf16>
    %457 = vector.extract_strided_slice %455 {offsets = [0, 0], sizes = [8, 128], strides = [1, 1]} : vector<8x384xf32> to vector<8x128xf32>
    %458 = arith.extf %456 : vector<8x128xbf16> to vector<8x128xf32>
    %459 = arith.addf %458, %457 : vector<8x128xf32>
    %460 = arith.negf %459 : vector<8x128xf32>
    %461 = math.exp %460 : vector<8x128xf32>
    %cst_121 = arith.constant 1.000000e+00 : f32
    %462 = vector.broadcast %cst_121 : f32 to vector<8x128xf32>
    %463 = arith.addf %462, %461 : vector<8x128xf32>
    %464 = arith.divf %462, %463 : vector<8x128xf32>
    %465 = vector.extract_strided_slice %453 {offsets = [0, 128], sizes = [8, 128], strides = [1, 1]} : vector<8x384xbf16> to vector<8x128xbf16>
    %466 = vector.extract_strided_slice %455 {offsets = [0, 128], sizes = [8, 128], strides = [1, 1]} : vector<8x384xf32> to vector<8x128xf32>
    %467 = arith.extf %465 : vector<8x128xbf16> to vector<8x128xf32>
    %468 = arith.addf %467, %466 : vector<8x128xf32>
    %469 = arith.negf %468 : vector<8x128xf32>
    %470 = math.exp %469 : vector<8x128xf32>
    %cst_122 = arith.constant 1.000000e+00 : f32
    %471 = vector.broadcast %cst_122 : f32 to vector<8x128xf32>
    %472 = arith.addf %471, %470 : vector<8x128xf32>
    %473 = arith.divf %471, %472 : vector<8x128xf32>
    %474 = vector.extract_strided_slice %453 {offsets = [0, 256], sizes = [8, 128], strides = [1, 1]} : vector<8x384xbf16> to vector<8x128xbf16>
    %475 = vector.extract_strided_slice %455 {offsets = [0, 256], sizes = [8, 128], strides = [1, 1]} : vector<8x384xf32> to vector<8x128xf32>
    %476 = arith.addf %475, %26 : vector<8x128xf32>
    %477 = arith.mulf %464, %476 : vector<8x128xf32>
    %478 = arith.extf %474 : vector<8x128xbf16> to vector<8x128xf32>
    %479 = arith.addf %478, %477 : vector<8x128xf32>
    %480 = math.tanh %479 : vector<8x128xf32>
    %cst_123 = arith.constant 1.000000e+00 : f32
    %481 = vector.broadcast %cst_123 : f32 to vector<8x128xf32>
    %482 = arith.subf %481, %473 : vector<8x128xf32>
    %483 = arith.mulf %482, %480 : vector<8x128xf32>
    %484 = arith.mulf %473, %398 : vector<8x128xf32>
    %485 = arith.addf %483, %484 : vector<8x128xf32>
    %486 = vector.broadcast %404 : i32 to vector<8x1xi32>
    %487 = arith.cmpi sgt, %18, %486 : vector<8x1xi32>
    %488 = vector.shape_cast %487 : vector<8x1xi1> to vector<8x1xi1>
    %489 = vector.broadcast %488 : vector<8x1xi1> to vector<8x128xi1>
    %cst_124 = arith.constant 0.000000e+00 : f32
    %490 = vector.broadcast %cst_124 : f32 to vector<8x128xf32>
    %491 = arith.select %489, %485, %490 : vector<8x128xi1>, vector<8x128xf32>
    %492 = arith.select %489, %485, %398 : vector<8x128xi1>, vector<8x128xf32>
    %493 = arith.index_cast %404 : i32 to index
    %c0_125 = arith.constant 0 : index
    %c0_126 = arith.constant 0 : index
    %494 = vector.load %arg10[%493, %c0_125, %c0_126] : memref<8x8x128xf32, #tpu.memory_space<vmem>>, vector<1x8x128xf32>
    %495 = vector.shape_cast %494 : vector<1x8x128xf32> to vector<8x128xf32>
    %496 = arith.addf %495, %491 : vector<8x128xf32>
    %497 = arith.index_cast %404 : i32 to index
    %c0_127 = arith.constant 0 : index
    %c0_128 = arith.constant 0 : index
    %498 = vector.load %arg10[%497, %c0_127, %c0_128] : memref<8x8x128xf32, #tpu.memory_space<vmem>>, vector<1x8x128xf32>
    %499 = vector.shape_cast %498 : vector<1x8x128xf32> to vector<8x128xf32>
    %500 = vector.shape_cast %496 : vector<8x128xf32> to vector<1x8x128xf32>
    tpu.vector_store %arg10[%497, %c0_127, %c0_128], %500 {strides = array<i32>} : memref<8x8x128xf32, #tpu.memory_space<vmem>>, vector<1x8x128xf32>,
    %c5_i32 = arith.constant 5 : i32
    %c7_i32_129 = arith.constant 7 : i32
    %501 = arith.subi %c7_i32_129, %c5_i32 : i32
    %502 = arith.index_cast %c5_i32 : i32 to index
    %c0_130 = arith.constant 0 : index
    %c0_131 = arith.constant 0 : index
    %503 = vector.load %arg12[%502, %c0_130, %c0_131] : memref<8x8x384xbf16, #tpu.memory_space<vmem>>, vector<1x8x384xbf16>
    %504 = vector.shape_cast %503 : vector<1x8x384xbf16> to vector<8x384xbf16>
    %505 = arith.truncf %450 : vector<8x128xf32> to vector<8x128xbf16>
    %cst_132 = arith.constant dense<0.000000e+00> : vector<8x384xf32>
    %506 = tpu.matmul %505, %19, %cst_132 {dimension_numbers = #tpu.dot_dimension_numbers<[1], [0], [0], [1], [0, 0, 1, 1], [], []>} : vector<8x128xbf16>, vector<128x384xbf16>, vector<8x384xf32> -> vector<8x384xf32>
    %507 = vector.extract_strided_slice %504 {offsets = [0, 0], sizes = [8, 128], strides = [1, 1]} : vector<8x384xbf16> to vector<8x128xbf16>
    %508 = vector.extract_strided_slice %506 {offsets = [0, 0], sizes = [8, 128], strides = [1, 1]} : vector<8x384xf32> to vector<8x128xf32>
    %509 = arith.extf %507 : vector<8x128xbf16> to vector<8x128xf32>
    %510 = arith.addf %509, %508 : vector<8x128xf32>
    %511 = arith.negf %510 : vector<8x128xf32>
    %512 = math.exp %511 : vector<8x128xf32>
    %cst_133 = arith.constant 1.000000e+00 : f32
    %513 = vector.broadcast %cst_133 : f32 to vector<8x128xf32>
    %514 = arith.addf %513, %512 : vector<8x128xf32>
    %515 = arith.divf %513, %514 : vector<8x128xf32>
    %516 = vector.extract_strided_slice %504 {offsets = [0, 128], sizes = [8, 128], strides = [1, 1]} : vector<8x384xbf16> to vector<8x128xbf16>
    %517 = vector.extract_strided_slice %506 {offsets = [0, 128], sizes = [8, 128], strides = [1, 1]} : vector<8x384xf32> to vector<8x128xf32>
    %518 = arith.extf %516 : vector<8x128xbf16> to vector<8x128xf32>
    %519 = arith.addf %518, %517 : vector<8x128xf32>
    %520 = arith.negf %519 : vector<8x128xf32>
    %521 = math.exp %520 : vector<8x128xf32>
    %cst_134 = arith.constant 1.000000e+00 : f32
    %522 = vector.broadcast %cst_134 : f32 to vector<8x128xf32>
    %523 = arith.addf %522, %521 : vector<8x128xf32>
    %524 = arith.divf %522, %523 : vector<8x128xf32>
    %525 = vector.extract_strided_slice %504 {offsets = [0, 256], sizes = [8, 128], strides = [1, 1]} : vector<8x384xbf16> to vector<8x128xbf16>
    %526 = vector.extract_strided_slice %506 {offsets = [0, 256], sizes = [8, 128], strides = [1, 1]} : vector<8x384xf32> to vector<8x128xf32>
    %527 = arith.addf %526, %23 : vector<8x128xf32>
    %528 = arith.mulf %515, %527 : vector<8x128xf32>
    %529 = arith.extf %525 : vector<8x128xbf16> to vector<8x128xf32>
    %530 = arith.addf %529, %528 : vector<8x128xf32>
    %531 = math.tanh %530 : vector<8x128xf32>
    %cst_135 = arith.constant 1.000000e+00 : f32
    %532 = vector.broadcast %cst_135 : f32 to vector<8x128xf32>
    %533 = arith.subf %532, %524 : vector<8x128xf32>
    %534 = arith.mulf %533, %531 : vector<8x128xf32>
    %535 = arith.mulf %524, %450 : vector<8x128xf32>
    %536 = arith.addf %534, %535 : vector<8x128xf32>
    %537 = vector.broadcast %c5_i32 : i32 to vector<8x1xi32>
    %538 = arith.cmpi sgt, %18, %537 : vector<8x1xi32>
    %539 = vector.shape_cast %538 : vector<8x1xi1> to vector<8x1xi1>
    %540 = vector.broadcast %539 : vector<8x1xi1> to vector<8x128xi1>
    %cst_136 = arith.constant 0.000000e+00 : f32
    %541 = vector.broadcast %cst_136 : f32 to vector<8x128xf32>
    %542 = arith.select %540, %536, %541 : vector<8x128xi1>, vector<8x128xf32>
    %543 = arith.index_cast %c5_i32 : i32 to index
    %c0_137 = arith.constant 0 : index
    %c0_138 = arith.constant 0 : index
    %544 = vector.load %arg10[%543, %c0_137, %c0_138] : memref<8x8x128xf32, #tpu.memory_space<vmem>>, vector<1x8x128xf32>
    %545 = vector.shape_cast %544 : vector<1x8x128xf32> to vector<8x128xf32>
    %546 = vector.shape_cast %542 : vector<8x128xf32> to vector<1x8x128xf32>
    tpu.vector_store %arg10[%543, %c0_137, %c0_138], %546 {strides = array<i32>} : memref<8x8x128xf32, #tpu.memory_space<vmem>>, vector<1x8x128xf32>,
    %547 = arith.select %540, %536, %450 : vector<8x128xi1>, vector<8x128xf32>
    %548 = arith.index_cast %501 : i32 to index
    %c0_139 = arith.constant 0 : index
    %c0_140 = arith.constant 0 : index
    %549 = vector.load %arg13[%548, %c0_139, %c0_140] : memref<8x8x384xbf16, #tpu.memory_space<vmem>>, vector<1x8x384xbf16>
    %550 = vector.shape_cast %549 : vector<1x8x384xbf16> to vector<8x384xbf16>
    %551 = arith.truncf %492 : vector<8x128xf32> to vector<8x128xbf16>
    %cst_141 = arith.constant dense<0.000000e+00> : vector<8x384xf32>
    %552 = tpu.matmul %551, %20, %cst_141 {dimension_numbers = #tpu.dot_dimension_numbers<[1], [0], [0], [1], [0, 0, 1, 1], [], []>} : vector<8x128xbf16>, vector<128x384xbf16>, vector<8x384xf32> -> vector<8x384xf32>
    %553 = vector.extract_strided_slice %550 {offsets = [0, 0], sizes = [8, 128], strides = [1, 1]} : vector<8x384xbf16> to vector<8x128xbf16>
    %554 = vector.extract_strided_slice %552 {offsets = [0, 0], sizes = [8, 128], strides = [1, 1]} : vector<8x384xf32> to vector<8x128xf32>
    %555 = arith.extf %553 : vector<8x128xbf16> to vector<8x128xf32>
    %556 = arith.addf %555, %554 : vector<8x128xf32>
    %557 = arith.negf %556 : vector<8x128xf32>
    %558 = math.exp %557 : vector<8x128xf32>
    %cst_142 = arith.constant 1.000000e+00 : f32
    %559 = vector.broadcast %cst_142 : f32 to vector<8x128xf32>
    %560 = arith.addf %559, %558 : vector<8x128xf32>
    %561 = arith.divf %559, %560 : vector<8x128xf32>
    %562 = vector.extract_strided_slice %550 {offsets = [0, 128], sizes = [8, 128], strides = [1, 1]} : vector<8x384xbf16> to vector<8x128xbf16>
    %563 = vector.extract_strided_slice %552 {offsets = [0, 128], sizes = [8, 128], strides = [1, 1]} : vector<8x384xf32> to vector<8x128xf32>
    %564 = arith.extf %562 : vector<8x128xbf16> to vector<8x128xf32>
    %565 = arith.addf %564, %563 : vector<8x128xf32>
    %566 = arith.negf %565 : vector<8x128xf32>
    %567 = math.exp %566 : vector<8x128xf32>
    %cst_143 = arith.constant 1.000000e+00 : f32
    %568 = vector.broadcast %cst_143 : f32 to vector<8x128xf32>
    %569 = arith.addf %568, %567 : vector<8x128xf32>
    %570 = arith.divf %568, %569 : vector<8x128xf32>
    %571 = vector.extract_strided_slice %550 {offsets = [0, 256], sizes = [8, 128], strides = [1, 1]} : vector<8x384xbf16> to vector<8x128xbf16>
    %572 = vector.extract_strided_slice %552 {offsets = [0, 256], sizes = [8, 128], strides = [1, 1]} : vector<8x384xf32> to vector<8x128xf32>
    %573 = arith.addf %572, %26 : vector<8x128xf32>
    %574 = arith.mulf %561, %573 : vector<8x128xf32>
    %575 = arith.extf %571 : vector<8x128xbf16> to vector<8x128xf32>
    %576 = arith.addf %575, %574 : vector<8x128xf32>
    %577 = math.tanh %576 : vector<8x128xf32>
    %cst_144 = arith.constant 1.000000e+00 : f32
    %578 = vector.broadcast %cst_144 : f32 to vector<8x128xf32>
    %579 = arith.subf %578, %570 : vector<8x128xf32>
    %580 = arith.mulf %579, %577 : vector<8x128xf32>
    %581 = arith.mulf %570, %492 : vector<8x128xf32>
    %582 = arith.addf %580, %581 : vector<8x128xf32>
    %583 = vector.broadcast %501 : i32 to vector<8x1xi32>
    %584 = arith.cmpi sgt, %18, %583 : vector<8x1xi32>
    %585 = vector.shape_cast %584 : vector<8x1xi1> to vector<8x1xi1>
    %586 = vector.broadcast %585 : vector<8x1xi1> to vector<8x128xi1>
    %cst_145 = arith.constant 0.000000e+00 : f32
    %587 = vector.broadcast %cst_145 : f32 to vector<8x128xf32>
    %588 = arith.select %586, %582, %587 : vector<8x128xi1>, vector<8x128xf32>
    %589 = arith.select %586, %582, %492 : vector<8x128xi1>, vector<8x128xf32>
    %590 = arith.index_cast %501 : i32 to index
    %c0_146 = arith.constant 0 : index
    %c0_147 = arith.constant 0 : index
    %591 = vector.load %arg10[%590, %c0_146, %c0_147] : memref<8x8x128xf32, #tpu.memory_space<vmem>>, vector<1x8x128xf32>
    %592 = vector.shape_cast %591 : vector<1x8x128xf32> to vector<8x128xf32>
    %593 = arith.addf %592, %588 : vector<8x128xf32>
    %594 = arith.index_cast %501 : i32 to index
    %c0_148 = arith.constant 0 : index
    %c0_149 = arith.constant 0 : index
    %595 = vector.load %arg10[%594, %c0_148, %c0_149] : memref<8x8x128xf32, #tpu.memory_space<vmem>>, vector<1x8x128xf32>
    %596 = vector.shape_cast %595 : vector<1x8x128xf32> to vector<8x128xf32>
    %597 = vector.shape_cast %593 : vector<8x128xf32> to vector<1x8x128xf32>
    tpu.vector_store %arg10[%594, %c0_148, %c0_149], %597 {strides = array<i32>} : memref<8x8x128xf32, #tpu.memory_space<vmem>>, vector<1x8x128xf32>,
    %c6_i32 = arith.constant 6 : i32
    %c7_i32_150 = arith.constant 7 : i32
    %598 = arith.subi %c7_i32_150, %c6_i32 : i32
    %599 = arith.index_cast %c6_i32 : i32 to index
    %c0_151 = arith.constant 0 : index
    %c0_152 = arith.constant 0 : index
    %600 = vector.load %arg12[%599, %c0_151, %c0_152] : memref<8x8x384xbf16, #tpu.memory_space<vmem>>, vector<1x8x384xbf16>
    %601 = vector.shape_cast %600 : vector<1x8x384xbf16> to vector<8x384xbf16>
    %602 = arith.truncf %547 : vector<8x128xf32> to vector<8x128xbf16>
    %cst_153 = arith.constant dense<0.000000e+00> : vector<8x384xf32>
    %603 = tpu.matmul %602, %19, %cst_153 {dimension_numbers = #tpu.dot_dimension_numbers<[1], [0], [0], [1], [0, 0, 1, 1], [], []>} : vector<8x128xbf16>, vector<128x384xbf16>, vector<8x384xf32> -> vector<8x384xf32>
    %604 = vector.extract_strided_slice %601 {offsets = [0, 0], sizes = [8, 128], strides = [1, 1]} : vector<8x384xbf16> to vector<8x128xbf16>
    %605 = vector.extract_strided_slice %603 {offsets = [0, 0], sizes = [8, 128], strides = [1, 1]} : vector<8x384xf32> to vector<8x128xf32>
    %606 = arith.extf %604 : vector<8x128xbf16> to vector<8x128xf32>
    %607 = arith.addf %606, %605 : vector<8x128xf32>
    %608 = arith.negf %607 : vector<8x128xf32>
    %609 = math.exp %608 : vector<8x128xf32>
    %cst_154 = arith.constant 1.000000e+00 : f32
    %610 = vector.broadcast %cst_154 : f32 to vector<8x128xf32>
    %611 = arith.addf %610, %609 : vector<8x128xf32>
    %612 = arith.divf %610, %611 : vector<8x128xf32>
    %613 = vector.extract_strided_slice %601 {offsets = [0, 128], sizes = [8, 128], strides = [1, 1]} : vector<8x384xbf16> to vector<8x128xbf16>
    %614 = vector.extract_strided_slice %603 {offsets = [0, 128], sizes = [8, 128], strides = [1, 1]} : vector<8x384xf32> to vector<8x128xf32>
    %615 = arith.extf %613 : vector<8x128xbf16> to vector<8x128xf32>
    %616 = arith.addf %615, %614 : vector<8x128xf32>
    %617 = arith.negf %616 : vector<8x128xf32>
    %618 = math.exp %617 : vector<8x128xf32>
    %cst_155 = arith.constant 1.000000e+00 : f32
    %619 = vector.broadcast %cst_155 : f32 to vector<8x128xf32>
    %620 = arith.addf %619, %618 : vector<8x128xf32>
    %621 = arith.divf %619, %620 : vector<8x128xf32>
    %622 = vector.extract_strided_slice %601 {offsets = [0, 256], sizes = [8, 128], strides = [1, 1]} : vector<8x384xbf16> to vector<8x128xbf16>
    %623 = vector.extract_strided_slice %603 {offsets = [0, 256], sizes = [8, 128], strides = [1, 1]} : vector<8x384xf32> to vector<8x128xf32>
    %624 = arith.addf %623, %23 : vector<8x128xf32>
    %625 = arith.mulf %612, %624 : vector<8x128xf32>
    %626 = arith.extf %622 : vector<8x128xbf16> to vector<8x128xf32>
    %627 = arith.addf %626, %625 : vector<8x128xf32>
    %628 = math.tanh %627 : vector<8x128xf32>
    %cst_156 = arith.constant 1.000000e+00 : f32
    %629 = vector.broadcast %cst_156 : f32 to vector<8x128xf32>
    %630 = arith.subf %629, %621 : vector<8x128xf32>
    %631 = arith.mulf %630, %628 : vector<8x128xf32>
    %632 = arith.mulf %621, %547 : vector<8x128xf32>
    %633 = arith.addf %631, %632 : vector<8x128xf32>
    %634 = vector.broadcast %c6_i32 : i32 to vector<8x1xi32>
    %635 = arith.cmpi sgt, %18, %634 : vector<8x1xi32>
    %636 = vector.shape_cast %635 : vector<8x1xi1> to vector<8x1xi1>
    %637 = vector.broadcast %636 : vector<8x1xi1> to vector<8x128xi1>
    %cst_157 = arith.constant 0.000000e+00 : f32
    %638 = vector.broadcast %cst_157 : f32 to vector<8x128xf32>
    %639 = arith.select %637, %633, %638 : vector<8x128xi1>, vector<8x128xf32>
    %640 = arith.index_cast %c6_i32 : i32 to index
    %c0_158 = arith.constant 0 : index
    %c0_159 = arith.constant 0 : index
    %641 = vector.load %arg10[%640, %c0_158, %c0_159] : memref<8x8x128xf32, #tpu.memory_space<vmem>>, vector<1x8x128xf32>
    %642 = vector.shape_cast %641 : vector<1x8x128xf32> to vector<8x128xf32>
    %643 = vector.shape_cast %639 : vector<8x128xf32> to vector<1x8x128xf32>
    tpu.vector_store %arg10[%640, %c0_158, %c0_159], %643 {strides = array<i32>} : memref<8x8x128xf32, #tpu.memory_space<vmem>>, vector<1x8x128xf32>,
    %644 = arith.select %637, %633, %547 : vector<8x128xi1>, vector<8x128xf32>
    %645 = arith.index_cast %598 : i32 to index
    %c0_160 = arith.constant 0 : index
    %c0_161 = arith.constant 0 : index
    %646 = vector.load %arg13[%645, %c0_160, %c0_161] : memref<8x8x384xbf16, #tpu.memory_space<vmem>>, vector<1x8x384xbf16>
    %647 = vector.shape_cast %646 : vector<1x8x384xbf16> to vector<8x384xbf16>
    %648 = arith.truncf %589 : vector<8x128xf32> to vector<8x128xbf16>
    %cst_162 = arith.constant dense<0.000000e+00> : vector<8x384xf32>
    %649 = tpu.matmul %648, %20, %cst_162 {dimension_numbers = #tpu.dot_dimension_numbers<[1], [0], [0], [1], [0, 0, 1, 1], [], []>} : vector<8x128xbf16>, vector<128x384xbf16>, vector<8x384xf32> -> vector<8x384xf32>
    %650 = vector.extract_strided_slice %647 {offsets = [0, 0], sizes = [8, 128], strides = [1, 1]} : vector<8x384xbf16> to vector<8x128xbf16>
    %651 = vector.extract_strided_slice %649 {offsets = [0, 0], sizes = [8, 128], strides = [1, 1]} : vector<8x384xf32> to vector<8x128xf32>
    %652 = arith.extf %650 : vector<8x128xbf16> to vector<8x128xf32>
    %653 = arith.addf %652, %651 : vector<8x128xf32>
    %654 = arith.negf %653 : vector<8x128xf32>
    %655 = math.exp %654 : vector<8x128xf32>
    %cst_163 = arith.constant 1.000000e+00 : f32
    %656 = vector.broadcast %cst_163 : f32 to vector<8x128xf32>
    %657 = arith.addf %656, %655 : vector<8x128xf32>
    %658 = arith.divf %656, %657 : vector<8x128xf32>
    %659 = vector.extract_strided_slice %647 {offsets = [0, 128], sizes = [8, 128], strides = [1, 1]} : vector<8x384xbf16> to vector<8x128xbf16>
    %660 = vector.extract_strided_slice %649 {offsets = [0, 128], sizes = [8, 128], strides = [1, 1]} : vector<8x384xf32> to vector<8x128xf32>
    %661 = arith.extf %659 : vector<8x128xbf16> to vector<8x128xf32>
    %662 = arith.addf %661, %660 : vector<8x128xf32>
    %663 = arith.negf %662 : vector<8x128xf32>
    %664 = math.exp %663 : vector<8x128xf32>
    %cst_164 = arith.constant 1.000000e+00 : f32
    %665 = vector.broadcast %cst_164 : f32 to vector<8x128xf32>
    %666 = arith.addf %665, %664 : vector<8x128xf32>
    %667 = arith.divf %665, %666 : vector<8x128xf32>
    %668 = vector.extract_strided_slice %647 {offsets = [0, 256], sizes = [8, 128], strides = [1, 1]} : vector<8x384xbf16> to vector<8x128xbf16>
    %669 = vector.extract_strided_slice %649 {offsets = [0, 256], sizes = [8, 128], strides = [1, 1]} : vector<8x384xf32> to vector<8x128xf32>
    %670 = arith.addf %669, %26 : vector<8x128xf32>
    %671 = arith.mulf %658, %670 : vector<8x128xf32>
    %672 = arith.extf %668 : vector<8x128xbf16> to vector<8x128xf32>
    %673 = arith.addf %672, %671 : vector<8x128xf32>
    %674 = math.tanh %673 : vector<8x128xf32>
    %cst_165 = arith.constant 1.000000e+00 : f32
    %675 = vector.broadcast %cst_165 : f32 to vector<8x128xf32>
    %676 = arith.subf %675, %667 : vector<8x128xf32>
    %677 = arith.mulf %676, %674 : vector<8x128xf32>
    %678 = arith.mulf %667, %589 : vector<8x128xf32>
    %679 = arith.addf %677, %678 : vector<8x128xf32>
    %680 = vector.broadcast %598 : i32 to vector<8x1xi32>
    %681 = arith.cmpi sgt, %18, %680 : vector<8x1xi32>
    %682 = vector.shape_cast %681 : vector<8x1xi1> to vector<8x1xi1>
    %683 = vector.broadcast %682 : vector<8x1xi1> to vector<8x128xi1>
    %cst_166 = arith.constant 0.000000e+00 : f32
    %684 = vector.broadcast %cst_166 : f32 to vector<8x128xf32>
    %685 = arith.select %683, %679, %684 : vector<8x128xi1>, vector<8x128xf32>
    %686 = arith.select %683, %679, %589 : vector<8x128xi1>, vector<8x128xf32>
    %687 = arith.index_cast %598 : i32 to index
    %c0_167 = arith.constant 0 : index
    %c0_168 = arith.constant 0 : index
    %688 = vector.load %arg10[%687, %c0_167, %c0_168] : memref<8x8x128xf32, #tpu.memory_space<vmem>>, vector<1x8x128xf32>
    %689 = vector.shape_cast %688 : vector<1x8x128xf32> to vector<8x128xf32>
    %690 = arith.addf %689, %685 : vector<8x128xf32>
    %691 = arith.index_cast %598 : i32 to index
    %c0_169 = arith.constant 0 : index
    %c0_170 = arith.constant 0 : index
    %692 = vector.load %arg10[%691, %c0_169, %c0_170] : memref<8x8x128xf32, #tpu.memory_space<vmem>>, vector<1x8x128xf32>
    %693 = vector.shape_cast %692 : vector<1x8x128xf32> to vector<8x128xf32>
    %694 = vector.shape_cast %690 : vector<8x128xf32> to vector<1x8x128xf32>
    tpu.vector_store %arg10[%691, %c0_169, %c0_170], %694 {strides = array<i32>} : memref<8x8x128xf32, #tpu.memory_space<vmem>>, vector<1x8x128xf32>,
    %c7_i32_171 = arith.constant 7 : i32
    %c7_i32_172 = arith.constant 7 : i32
    %695 = arith.subi %c7_i32_172, %c7_i32_171 : i32
    %696 = arith.index_cast %c7_i32_171 : i32 to index
    %c0_173 = arith.constant 0 : index
    %c0_174 = arith.constant 0 : index
    %697 = vector.load %arg12[%696, %c0_173, %c0_174] : memref<8x8x384xbf16, #tpu.memory_space<vmem>>, vector<1x8x384xbf16>
    %698 = vector.shape_cast %697 : vector<1x8x384xbf16> to vector<8x384xbf16>
    %699 = arith.truncf %644 : vector<8x128xf32> to vector<8x128xbf16>
    %cst_175 = arith.constant dense<0.000000e+00> : vector<8x384xf32>
    %700 = tpu.matmul %699, %19, %cst_175 {dimension_numbers = #tpu.dot_dimension_numbers<[1], [0], [0], [1], [0, 0, 1, 1], [], []>} : vector<8x128xbf16>, vector<128x384xbf16>, vector<8x384xf32> -> vector<8x384xf32>
    %701 = vector.extract_strided_slice %698 {offsets = [0, 0], sizes = [8, 128], strides = [1, 1]} : vector<8x384xbf16> to vector<8x128xbf16>
    %702 = vector.extract_strided_slice %700 {offsets = [0, 0], sizes = [8, 128], strides = [1, 1]} : vector<8x384xf32> to vector<8x128xf32>
    %703 = arith.extf %701 : vector<8x128xbf16> to vector<8x128xf32>
    %704 = arith.addf %703, %702 : vector<8x128xf32>
    %705 = arith.negf %704 : vector<8x128xf32>
    %706 = math.exp %705 : vector<8x128xf32>
    %cst_176 = arith.constant 1.000000e+00 : f32
    %707 = vector.broadcast %cst_176 : f32 to vector<8x128xf32>
    %708 = arith.addf %707, %706 : vector<8x128xf32>
    %709 = arith.divf %707, %708 : vector<8x128xf32>
    %710 = vector.extract_strided_slice %698 {offsets = [0, 128], sizes = [8, 128], strides = [1, 1]} : vector<8x384xbf16> to vector<8x128xbf16>
    %711 = vector.extract_strided_slice %700 {offsets = [0, 128], sizes = [8, 128], strides = [1, 1]} : vector<8x384xf32> to vector<8x128xf32>
    %712 = arith.extf %710 : vector<8x128xbf16> to vector<8x128xf32>
    %713 = arith.addf %712, %711 : vector<8x128xf32>
    %714 = arith.negf %713 : vector<8x128xf32>
    %715 = math.exp %714 : vector<8x128xf32>
    %cst_177 = arith.constant 1.000000e+00 : f32
    %716 = vector.broadcast %cst_177 : f32 to vector<8x128xf32>
    %717 = arith.addf %716, %715 : vector<8x128xf32>
    %718 = arith.divf %716, %717 : vector<8x128xf32>
    %719 = vector.extract_strided_slice %698 {offsets = [0, 256], sizes = [8, 128], strides = [1, 1]} : vector<8x384xbf16> to vector<8x128xbf16>
    %720 = vector.extract_strided_slice %700 {offsets = [0, 256], sizes = [8, 128], strides = [1, 1]} : vector<8x384xf32> to vector<8x128xf32>
    %721 = arith.addf %720, %23 : vector<8x128xf32>
    %722 = arith.mulf %709, %721 : vector<8x128xf32>
    %723 = arith.extf %719 : vector<8x128xbf16> to vector<8x128xf32>
    %724 = arith.addf %723, %722 : vector<8x128xf32>
    %725 = math.tanh %724 : vector<8x128xf32>
    %cst_178 = arith.constant 1.000000e+00 : f32
    %726 = vector.broadcast %cst_178 : f32 to vector<8x128xf32>
    %727 = arith.subf %726, %718 : vector<8x128xf32>
    %728 = arith.mulf %727, %725 : vector<8x128xf32>
    %729 = arith.mulf %718, %644 : vector<8x128xf32>
    %730 = arith.addf %728, %729 : vector<8x128xf32>
    %731 = vector.broadcast %c7_i32_171 : i32 to vector<8x1xi32>
    %732 = arith.cmpi sgt, %18, %731 : vector<8x1xi32>
    %733 = vector.shape_cast %732 : vector<8x1xi1> to vector<8x1xi1>
    %734 = vector.broadcast %733 : vector<8x1xi1> to vector<8x128xi1>
    %cst_179 = arith.constant 0.000000e+00 : f32
    %735 = vector.broadcast %cst_179 : f32 to vector<8x128xf32>
    %736 = arith.select %734, %730, %735 : vector<8x128xi1>, vector<8x128xf32>
    %737 = arith.index_cast %c7_i32_171 : i32 to index
    %c0_180 = arith.constant 0 : index
    %c0_181 = arith.constant 0 : index
    %738 = vector.load %arg10[%737, %c0_180, %c0_181] : memref<8x8x128xf32, #tpu.memory_space<vmem>>, vector<1x8x128xf32>
    %739 = vector.shape_cast %738 : vector<1x8x128xf32> to vector<8x128xf32>
    %740 = vector.shape_cast %736 : vector<8x128xf32> to vector<1x8x128xf32>
    tpu.vector_store %arg10[%737, %c0_180, %c0_181], %740 {strides = array<i32>} : memref<8x8x128xf32, #tpu.memory_space<vmem>>, vector<1x8x128xf32>,
    %741 = arith.select %734, %730, %644 : vector<8x128xi1>, vector<8x128xf32>
    %742 = arith.index_cast %695 : i32 to index
    %c0_182 = arith.constant 0 : index
    %c0_183 = arith.constant 0 : index
    %743 = vector.load %arg13[%742, %c0_182, %c0_183] : memref<8x8x384xbf16, #tpu.memory_space<vmem>>, vector<1x8x384xbf16>
    %744 = vector.shape_cast %743 : vector<1x8x384xbf16> to vector<8x384xbf16>
    %745 = arith.truncf %686 : vector<8x128xf32> to vector<8x128xbf16>
    %cst_184 = arith.constant dense<0.000000e+00> : vector<8x384xf32>
    %746 = tpu.matmul %745, %20, %cst_184 {dimension_numbers = #tpu.dot_dimension_numbers<[1], [0], [0], [1], [0, 0, 1, 1], [], []>} : vector<8x128xbf16>, vector<128x384xbf16>, vector<8x384xf32> -> vector<8x384xf32>
    %747 = vector.extract_strided_slice %744 {offsets = [0, 0], sizes = [8, 128], strides = [1, 1]} : vector<8x384xbf16> to vector<8x128xbf16>
    %748 = vector.extract_strided_slice %746 {offsets = [0, 0], sizes = [8, 128], strides = [1, 1]} : vector<8x384xf32> to vector<8x128xf32>
    %749 = arith.extf %747 : vector<8x128xbf16> to vector<8x128xf32>
    %750 = arith.addf %749, %748 : vector<8x128xf32>
    %751 = arith.negf %750 : vector<8x128xf32>
    %752 = math.exp %751 : vector<8x128xf32>
    %cst_185 = arith.constant 1.000000e+00 : f32
    %753 = vector.broadcast %cst_185 : f32 to vector<8x128xf32>
    %754 = arith.addf %753, %752 : vector<8x128xf32>
    %755 = arith.divf %753, %754 : vector<8x128xf32>
    %756 = vector.extract_strided_slice %744 {offsets = [0, 128], sizes = [8, 128], strides = [1, 1]} : vector<8x384xbf16> to vector<8x128xbf16>
    %757 = vector.extract_strided_slice %746 {offsets = [0, 128], sizes = [8, 128], strides = [1, 1]} : vector<8x384xf32> to vector<8x128xf32>
    %758 = arith.extf %756 : vector<8x128xbf16> to vector<8x128xf32>
    %759 = arith.addf %758, %757 : vector<8x128xf32>
    %760 = arith.negf %759 : vector<8x128xf32>
    %761 = math.exp %760 : vector<8x128xf32>
    %cst_186 = arith.constant 1.000000e+00 : f32
    %762 = vector.broadcast %cst_186 : f32 to vector<8x128xf32>
    %763 = arith.addf %762, %761 : vector<8x128xf32>
    %764 = arith.divf %762, %763 : vector<8x128xf32>
    %765 = vector.extract_strided_slice %744 {offsets = [0, 256], sizes = [8, 128], strides = [1, 1]} : vector<8x384xbf16> to vector<8x128xbf16>
    %766 = vector.extract_strided_slice %746 {offsets = [0, 256], sizes = [8, 128], strides = [1, 1]} : vector<8x384xf32> to vector<8x128xf32>
    %767 = arith.addf %766, %26 : vector<8x128xf32>
    %768 = arith.mulf %755, %767 : vector<8x128xf32>
    %769 = arith.extf %765 : vector<8x128xbf16> to vector<8x128xf32>
    %770 = arith.addf %769, %768 : vector<8x128xf32>
    %771 = math.tanh %770 : vector<8x128xf32>
    %cst_187 = arith.constant 1.000000e+00 : f32
    %772 = vector.broadcast %cst_187 : f32 to vector<8x128xf32>
    %773 = arith.subf %772, %764 : vector<8x128xf32>
    %774 = arith.mulf %773, %771 : vector<8x128xf32>
    %775 = arith.mulf %764, %686 : vector<8x128xf32>
    %776 = arith.addf %774, %775 : vector<8x128xf32>
    %777 = vector.broadcast %695 : i32 to vector<8x1xi32>
    %778 = arith.cmpi sgt, %18, %777 : vector<8x1xi32>
    %779 = vector.shape_cast %778 : vector<8x1xi1> to vector<8x1xi1>
    %780 = vector.broadcast %779 : vector<8x1xi1> to vector<8x128xi1>
    %cst_188 = arith.constant 0.000000e+00 : f32
    %781 = vector.broadcast %cst_188 : f32 to vector<8x128xf32>
    %782 = arith.select %780, %776, %781 : vector<8x128xi1>, vector<8x128xf32>
    %783 = arith.select %780, %776, %686 : vector<8x128xi1>, vector<8x128xf32>
    %784 = arith.index_cast %695 : i32 to index
    %c0_189 = arith.constant 0 : index
    %c0_190 = arith.constant 0 : index
    %785 = vector.load %arg10[%784, %c0_189, %c0_190] : memref<8x8x128xf32, #tpu.memory_space<vmem>>, vector<1x8x128xf32>
    %786 = vector.shape_cast %785 : vector<1x8x128xf32> to vector<8x128xf32>
    %787 = arith.addf %786, %782 : vector<8x128xf32>
    %788 = arith.index_cast %695 : i32 to index
    %c0_191 = arith.constant 0 : index
    %c0_192 = arith.constant 0 : index
    %789 = vector.load %arg10[%788, %c0_191, %c0_192] : memref<8x8x128xf32, #tpu.memory_space<vmem>>, vector<1x8x128xf32>
    %790 = vector.shape_cast %789 : vector<1x8x128xf32> to vector<8x128xf32>
    %791 = vector.shape_cast %787 : vector<8x128xf32> to vector<1x8x128xf32>
    tpu.vector_store %arg10[%788, %c0_191, %c0_192], %791 {strides = array<i32>} : memref<8x8x128xf32, #tpu.memory_space<vmem>>, vector<1x8x128xf32>,
    %c4_i32_193 = arith.constant 4 : i32
    %c0_194 = arith.constant 0 : index
    %c0_195 = arith.constant 0 : index
    %c0_196 = arith.constant 0 : index
    %792 = vector.load %arg11[%c0_194, %c0_195, %c0_196] : memref<2x8x128xf32, #tpu.memory_space<vmem>>, vector<1x8x128xf32>
    %793 = vector.shape_cast %792 : vector<1x8x128xf32> to vector<8x128xf32>
    %794 = vector.shape_cast %741 : vector<8x128xf32> to vector<1x8x128xf32>
    tpu.vector_store %arg11[%c0_194, %c0_195, %c0_196], %794 {strides = array<i32>} : memref<2x8x128xf32, #tpu.memory_space<vmem>>, vector<1x8x128xf32>,
    %c1 = arith.constant 1 : index
    %c0_197 = arith.constant 0 : index
    %c0_198 = arith.constant 0 : index
    %795 = vector.load %arg11[%c1, %c0_197, %c0_198] : memref<2x8x128xf32, #tpu.memory_space<vmem>>, vector<1x8x128xf32>
    %796 = vector.shape_cast %795 : vector<1x8x128xf32> to vector<8x128xf32>
    %797 = vector.shape_cast %783 : vector<8x128xf32> to vector<1x8x128xf32>
    tpu.vector_store %arg11[%c1, %c0_197, %c0_198], %797 {strides = array<i32>} : memref<2x8x128xf32, #tpu.memory_space<vmem>>, vector<1x8x128xf32>,
    %c4 = arith.constant 4 : index
    %c0_199 = arith.constant 0 : index
    %c0_200 = arith.constant 0 : index
    %798 = vector.load %arg10[%c4, %c0_199, %c0_200] : memref<8x8x128xf32, #tpu.memory_space<vmem>>, vector<4x8x128xf32>
    %c0_201 = arith.constant 0 : index
    %c0_202 = arith.constant 0 : index
    %c0_203 = arith.constant 0 : index
    %799 = vector.load %arg14[%c0_201, %c0_202, %c0_203] : memref<4x8x128xf32, #tpu.memory_space<vmem>>, vector<4x8x128xf32>
    %800 = arith.addf %798, %799 : vector<4x8x128xf32>
    %c4_204 = arith.constant 4 : index
    %c0_205 = arith.constant 0 : index
    %c0_206 = arith.constant 0 : index
    %801 = vector.load %arg10[%c4_204, %c0_205, %c0_206] : memref<8x8x128xf32, #tpu.memory_space<vmem>>, vector<4x8x128xf32>
    tpu.vector_store %arg10[%c4_204, %c0_205, %c0_206], %800 {strides = array<i32>} : memref<8x8x128xf32, #tpu.memory_space<vmem>>, vector<4x8x128xf32>,
    return
  }
}

</mosaic_0001>

<bundles_post_ra>
// kernel: tpu_custom_call.1
= control target key start
LH: loop header
LB: loop body
LE: loop exit
PB: predicated region body
PF: predicated region fallthrough
CT: control target
= control target key end

     0   :  { %17 = vsyncpa [#allocation6], 0  ;;  %s5851_s0 = inlined_call_operand.vmem [shape: s32[8,1], index: 0, kind: input, shape index: {}]   ;;  %s5852_s1 = inlined_call_operand.hbm [shape: bf16[8,8,128], index: 1, kind: input, shape index: {}]   ;;  %s5853_s2 = inlined_call_operand.hbm [shape: bf16[128,384], index: 2, kind: input, shape index: {}]   ;;  %s5854_s3 = inlined_call_operand.hbm [shape: bf16[128,384], index: 3, kind: input, shape index: {}]   ;;  %s5855_s4 = inlined_call_operand.vmem [shape: f32[1,384], index: 4, kind: input, shape index: {}]   ;;  %s5856_s5 = inlined_call_operand.vmem [shape: f32[1,128], index: 5, kind: input, shape index: {}]   ;;  %s5857_s6 = inlined_call_operand.hbm [shape: bf16[128,384], index: 6, kind: input, shape index: {}]   ;;  %s5858_s7 = inlined_call_operand.hbm [shape: bf16[128,384], index: 7, kind: input, shape index: {}]   ;;  %s5859_s8 = inlined_call_operand.vmem [shape: f32[1,384], index: 8, kind: input, shape index: {}]   ;;  %s5860_s9 = inlined_call_operand.vmem [shape: f32[1,128], index: 9, kind: input, shape index: {}]   ;;  %s5861_s10 = inlined_call_operand.hbm [shape: f32[8,8,128], index: 10, kind: output, shape index: {0}]   ;;  %s5862_s11 = inlined_call_operand.hbm [shape: f32[2,8,128], index: 11, kind: output, shape index: {1}]  }
   0x1   :  { %18 = vsyncpa [#allocation9], 0 }
   0x2   :  { %19 = vsyncpa [#allocation12], 0 }
   0x3   :  { %20 = vsyncpa [#allocation7], 0 }
   0x4   :  { %21 = vsyncpa [#allocation16], 0  ;;  %s4619_s17 = smov [#allocation8]  }
   0x5   :  { %s41_s18 = sshll.u32 %s4619_s17, 4  ;;  %s42_s18 = int_to_ptr.vmem [resolvable:$true] %s41_s18 }
   0x6   :  { %s4477_s19 = scalar_lea.vmem %s42_s18, 3072  ;;  %p4482_p1 = scmp.lt.s32.totalorder %s42_s18, %s42_s18 }
   0x7   :  { %p4478_p0 = scmp.ne.s32.totalorder %s42_s18, %s4477_s19  ;;  %p4483_p2 = scmp.lt.s32.totalorder %s4477_s19, %s4477_s19 }
   0x9   :  { %p4484_p3 = por %p4483_p2, %p4482_p1 }
   0xb   :  { %p4485_p4 = pnand %p4484_p3, %p4478_p0 }
   0xd   :  { %4488 = shalt.err (!%p4485_p4)
}
   0xe   :  { %s4620_s20 = smov 192   ;;  %s4621_s21 = smov 12  }
   0xf   :  { %47 = dma.hbm_to_vmem [thread:$0]  %s5853_s2, 3072, %s42_s18, [#allocation9], %s4620_s20, %s4620_s20, %s4621_s21  }
  0x10   :  { %s4622_s24 = smov [#allocation11]   ;;  %s4623_s26 = smov [#allocation5]  }
  0x11   :  { %s69_s25 = sshll.u32 %s4622_s24, 4  ;;  %s29_s27 = sshll.u32 %s4623_s26, 4  ;;  %s70_s25 = int_to_ptr.vmem [resolvable:$true] %s69_s25  ;;  %s30_s27 = int_to_ptr.vmem [resolvable:$true] %s29_s27 }
  0x12   :  { %s4497_s28 = scalar_lea.vmem %s70_s25, 3072  ;;  %p4502_p6 = scmp.lt.s32.totalorder %s70_s25, %s70_s25 }
  0x13   :  { %p4498_p5 = scmp.ne.s32.totalorder %s70_s25, %s4497_s28  ;;  %p4503_p7 = scmp.lt.s32.totalorder %s4497_s28, %s4497_s28 }
  0x15   :  { %p4504_p8 = por %p4503_p7, %p4502_p6 }
  0x17   :  { %p4505_p9 = pnand %p4504_p8, %p4498_p5 }
  0x19   :  { %4508 = shalt.err (!%p4505_p9)
}
  0x1a   :  { %75 = dma.hbm_to_vmem [thread:$0]  %s5857_s6, 3072, %s70_s25, [#allocation12], %s4620_s20, %s4620_s20, %s4621_s21  }
  0x1b   :  { %s4517_s2 = scalar_lea.vmem %s30_s27, 512  ;;  %p4522_p11 = scmp.lt.s32.totalorder %s30_s27, %s30_s27 }
  0x1c   :  { %p4518_p10 = scmp.ne.s32.totalorder %s30_s27, %s4517_s2  ;;  %p4523_p12 = scmp.lt.s32.totalorder %s4517_s2, %s4517_s2 }
  0x1e   :  { %p4524_p13 = por %p4523_p12, %p4522_p11 }
  0x20   :  { %p4525_p0 = pnand %p4524_p13, %p4518_p10 }
  0x22   :  { %4528 = shalt.err (!%p4525_p0)
}
  0x23   :  { %s4624_s12 = smov 64   ;;  %s4625_s13 = smov 4  }
  0x24   :  { %35 = dma.hbm_to_vmem [thread:$0]  %s5852_s1, 512, %s30_s27, [#allocation6], %s4624_s12, %s4624_s12, %s4625_s13  }
  0x25   :  { %s4626_s16 = smov [#allocation10]   ;;  %s4627_s18 = smov [#allocation13]  }
  0x26   :  { %s53_s17 = sshll.u32 %s4626_s16, 4  ;;  %s81_s19 = sshll.u32 %s4627_s18, 4  ;;  %s54_s17 = int_to_ptr.vmem [resolvable:$true] %s53_s17  ;;  %s82_s19 = int_to_ptr.vmem [resolvable:$true] %s81_s19 }
  0x27   :  { %s4537_s6 = scalar_lea.vmem %s54_s17, 3072  ;;  %p4542_p2 = scmp.lt.s32.totalorder %s54_s17, %s54_s17 }
  0x28   :  { %p4538_p1 = scmp.ne.s32.totalorder %s54_s17, %s4537_s6  ;;  %p4543_p3 = scmp.lt.s32.totalorder %s4537_s6, %s4537_s6 }
  0x2a   :  { %p4544_p4 = por %p4543_p3, %p4542_p2 }
  0x2c   :  { %p4545_p5 = pnand %p4544_p4, %p4538_p1 }
  0x2e   :  { %4548 = shalt.err (!%p4545_p5)
}
  0x2f   :  { %59 = dma.hbm_to_vmem [thread:$0]  %s5854_s3, 3072, %s54_s17, [#allocation9], %s4620_s20, %s4620_s20, %s4621_s21  }
  0x30   :  { %s4557_s1 = scalar_lea.vmem %s82_s19, 3072  ;;  %p4562_p7 = scmp.lt.s32.totalorder %s82_s19, %s82_s19 }
  0x31   :  { %p4558_p6 = scmp.ne.s32.totalorder %s82_s19, %s4557_s1  ;;  %p4563_p8 = scmp.lt.s32.totalorder %s4557_s1, %s4557_s1 }
  0x33   :  { %p4564_p9 = por %p4563_p8, %p4562_p7 }
  0x35   :  { %p4565_p10 = pnand %p4564_p9, %p4558_p6 }
  0x37   :  { %4568 = shalt.err (!%p4565_p10)
}
  0x38   :  { %87 = dma.hbm_to_vmem [thread:$0]  %s5858_s7, 3072, %s82_s19, [#allocation12], %s4620_s20, %s4620_s20, %s4621_s21  }
  0x39   :  { %4609 = dma.done.wait [#allocation6], 512  }
  0x3a   :  { %4610 = vsyncadd [#allocation6], 4294966784 }
  0x3b   :  { %4611 = dma.done.wait [#allocation9], 6144  }
  0x3c   :  { %4612 = vsyncadd [#allocation9], 4294961152 }
  0x3d   :  { %4613 = dma.done.wait [#allocation12], 6144  }
  0x3e   :  { %4614 = vsyncadd [#allocation12], 4294961152  ;;  %v5867_v0 = vmov 0   ;;  %v4079_v1 = vld [vmem:[#allocation8 + $0xac] ss:$12 sps:$4 sm:$0xff]   ;;  %v4725_v12 = vld [vmem:[#allocation5] sm:$0xff]  }
  0x3f   :  { %349 = vmatprep.mubr.bf16.mxu0 %v5867_v0  ;;  %4077 = vset.pattern.permute.xlu0 %v5867_v0  ;;  %v4081_v2 = vld [vmem:[#allocation8 + $0xa8] ss:$12 sps:$4 sm:$0xff]   ;;  %v4084_v4 = vld [vmem:[#allocation8 + $0x90] ss:$12 sps:$4 sm:$0xff]   ;;  %v4087_v6 = vld [vmem:[#allocation8 + $0x78] ss:$12 sps:$4 sm:$0xff]  }
  0x40   :  { %4078 = vset.pattern.permute.xlu1 %v5867_v0  ;;  %317 = vmatprep.subr.bf16.mxu0 %v4079_v1  ;;  %v4082_v3 = vld [vmem:[#allocation8 + $0x94] ss:$12 sps:$4 sm:$0xff]   ;;  %v4085_v5 = vld [vmem:[#allocation8 + $0x7c] ss:$12 sps:$4 sm:$0xff]   ;;  %v4088_v7 = vld [vmem:[#allocation8 + $0x64] ss:$12 sps:$4 sm:$0xff]  }
  0x41   :  { %318 = vmatpush1.bf16.msra.mxu0 %v4081_v2  ;;  %v4100_v8 = vld [vmem:[#allocation8 + $0xb0] ss:$12 sps:$4 sm:$0xff]   ;;  %v4090_v9 = vld [vmem:[#allocation8 + $0x60] ss:$12 sps:$4 sm:$0xff]   ;;  %v4104_v11 = vld [vmem:[#allocation8 + $0x98] ss:$12 sps:$4 sm:$0xff]   ;;  %3709 = vmatprep.mubr.bf16.mxu1 %v4725_v12 }
  0x42   :  { %319 = vmatprep.subr.bf16.mxu0 %v4082_v3  ;;  %v4091_v10 = vld [vmem:[#allocation8 + $0x4c] ss:$12 sps:$4 sm:$0xff]   ;;  %3693 = vmatprep.subr.bf16.mxu1 %v4100_v8  ;;  %v4093_v13 = vld [vmem:[#allocation8 + $0x48] ss:$12 sps:$4 sm:$0xff]   ;;  %v4096_v17 = vld [vmem:[#allocation8 + $0x30] ss:$12 sps:$4 sm:$0xff]  }
  0x43   :  { %3694 = vmatpush3.bf16.msra.mxu1 %v4100_v8  ;;  %v4109_v14 = vld [vmem:[#allocation8 + $0x80] ss:$12 sps:$4 sm:$0xff]   ;;  %v4113_v16 = vld [vmem:[#allocation8 + $0x68] ss:$12 sps:$4 sm:$0xff]   ;;  %v4118_v19 = vld [vmem:[#allocation8 + $0x50] ss:$12 sps:$4 sm:$0xff]  }
  0x44   :  { %3695 = vmatprep.subr.bf16.mxu1 %v4104_v11  ;;  %v4094_v15 = vld [vmem:[#allocation8 + $0x34] ss:$12 sps:$4 sm:$0xff]   ;;  %v4097_v18 = vld [vmem:[#allocation8 + $0x1c] ss:$12 sps:$4 sm:$0xff]   ;;  %v4099_v20 = vld [vmem:[#allocation8 + $0x18] ss:$12 sps:$4 sm:$0xff]  }
  0x45   :  { %320 = vmatpush1.bf16.msra.mxu0 %v4084_v4  ;;  %v4101_v21 = vld [vmem:[#allocation8 + $0x4] ss:$12 sps:$4 sm:$0xff]   ;;  %v4103_v23 = vld [vmem:[#allocation8] ss:$12 sps:$4 sm:$0xff]   ;;  %v4106_v26 = vld [vmem:[#allocation11 + $0xa8] ss:$12 sps:$4 sm:$0xff]  }
  0x46   :  { %321 = vmatprep.subr.bf16.mxu0 %v4085_v5  ;;  %v4122_v22 = vld [vmem:[#allocation8 + $0x38] ss:$12 sps:$4 sm:$0xff]   ;;  %v4127_v25 = vld [vmem:[#allocation8 + $0x20] ss:$12 sps:$4 sm:$0xff]   ;;  %v4131_v28 = vld [vmem:[#allocation8 + $0x8] ss:$12 sps:$4 sm:$0xff]  }
  0x47   :  { %3696 = vmatpush3.bf16.msra.mxu1 %v4104_v11  ;;  %v4108_v24 = vld [vmem:[#allocation11 + $0xac] ss:$12 sps:$4 sm:$0xff]   ;;  %v4112_v27 = vld [vmem:[#allocation11 + $0x94] ss:$12 sps:$4 sm:$0xff]   ;;  %v4110_v29 = vld [vmem:[#allocation11 + $0x90] ss:$12 sps:$4 sm:$0xff]  }
  0x48   :  { %3697 = vmatprep.subr.bf16.mxu1 %v4109_v14  ;;  %v4117_v30 = vld [vmem:[#allocation11 + $0x7c] ss:$12 sps:$4 sm:$0xff]   ;;  %v4115_v33 = vld [vmem:[#allocation11 + $0x78] ss:$12 sps:$4 sm:$0xff]   ;;  %v4119_v36 = vld [vmem:[#allocation11 + $0x60] ss:$12 sps:$4 sm:$0xff]  }
  0x49   :  { %322 = vmatpush1.bf16.msra.mxu0 %v4087_v6  ;;  %v4730_v31 = vld [vmem:[#allocation5 + $0x8] sm:$0xff]   ;;  %v4136_v32 = vld [vmem:[#allocation11 + $0xb0] ss:$12 sps:$4 sm:$0xff]   ;;  %v4140_v35 = vld [vmem:[#allocation11 + $0x98] ss:$12 sps:$4 sm:$0xff]   ;;  %v5863_v61 = vmov 0.0  }
  0x4a   :  { %323 = vmatprep.subr.bf16.mxu0 %v4088_v7  ;;  %v4121_v34 = vld [vmem:[#allocation11 + $0x64] ss:$12 sps:$4 sm:$0xff]   ;;  %v4126_v38 = vld [vmem:[#allocation11 + $0x4c] ss:$12 sps:$4 sm:$0xff]   ;;  %v4124_v40 = vld [vmem:[#allocation11 + $0x48] ss:$12 sps:$4 sm:$0xff]  }
  0x4b   :  { %3698 = vmatpush3.bf16.msra.mxu1 %v4109_v14  ;;  %v4734_v37 = vld [vmem:[#allocation5 + $0x10] sm:$0xff]   ;;  %v4144_v39 = vld [vmem:[#allocation11 + $0x80] ss:$12 sps:$4 sm:$0xff]   ;;  %v4739_v42 = vld [vmem:[#allocation5 + $0x18] sm:$0xff]   ;;  %vm4630_vm2 = vmmov 0   ;;  %s4632_s13 = smov [#allocation14]  }
  0x4c   :  { %3699 = vmatprep.subr.bf16.mxu1 %v4113_v16  ;;  %v4130_v41 = vld [vmem:[#allocation11 + $0x34] ss:$12 sps:$4 sm:$0xff]   ;;  %v4128_v44 = vld [vmem:[#allocation11 + $0x30] ss:$12 sps:$4 sm:$0xff]   ;;  %v4133_v47 = vld [vmem:[#allocation11 + $0x18] ss:$12 sps:$4 sm:$0xff]  }
  0x4d   :  { %324 = vmatpush1.bf16.msra.mxu0 %v4090_v9  ;;  %v4148_v43 = vld [vmem:[#allocation11 + $0x68] ss:$12 sps:$4 sm:$0xff]   ;;  %v4152_v46 = vld [vmem:[#allocation11 + $0x50] ss:$12 sps:$4 sm:$0xff]   ;;  %v4156_v49 = vld [vmem:[#allocation11 + $0x38] ss:$12 sps:$4 sm:$0xff]  }
  0x4e   :  { %325 = vmatprep.subr.bf16.mxu0 %v4091_v10  ;;  %v4135_v45 = vld [vmem:[#allocation11 + $0x1c] ss:$12 sps:$4 sm:$0xff]   ;;  %v4139_v48 = vld [vmem:[#allocation11 + $0x4] ss:$12 sps:$4 sm:$0xff]   ;;  %v4137_v50 = vld [vmem:[#allocation11] ss:$12 sps:$4 sm:$0xff]  }
  0x4f   :  { %3700 = vmatpush3.bf16.msra.mxu1 %v4113_v16  ;;  %v4746_v51 = vld [vmem:[#allocation10 + $0xac] ss:$12 sps:$4 sm:$0xff]   ;;  %v4748_v53 = vld [vmem:[#allocation10 + $0xa8] ss:$12 sps:$4 sm:$0xff]   ;;  %v4755_v56 = vld [vmem:[#allocation10 + $0x90] ss:$12 sps:$4 sm:$0xff]  }
  0x50   :  { %3701 = vmatprep.subr.bf16.mxu1 %v4118_v19  ;;  %v4160_v52 = vld [vmem:[#allocation11 + $0x20] ss:$12 sps:$4 sm:$0xff]   ;;  %v4164_v55 = vld [vmem:[#allocation11 + $0x8] ss:$12 sps:$4 sm:$0xff]   ;;  %v4762_v58 = vld [vmem:[#allocation10 + $0x78] ss:$12 sps:$4 sm:$0xff]  }
  0x51   :  { %326 = vmatpush1.bf16.msra.mxu0 %v4093_v13  ;;  %v4751_v54 = vld [vmem:[#allocation10 + $0x94] ss:$12 sps:$4 sm:$0xff]   ;;  %v4759_v57 = vld [vmem:[#allocation10 + $0x7c] ss:$12 sps:$4 sm:$0xff]   ;;  %v4765_v59 = vld [vmem:[#allocation10 + $0x64] ss:$12 sps:$4 sm:$0xff]  }
  0x52   :  { %327 = vmatprep.subr.bf16.mxu0 %v4094_v15  ;;  %v4767_v60 = vld [vmem:[#allocation10 + $0xb0] ss:$12 sps:$4 sm:$0xff]   ;;  %v4772_v62 = vld [vmem:[#allocation10 + $0x60] ss:$12 sps:$4 sm:$0xff]   ;;  %v4780_v1 = vld [vmem:[#allocation10 + $0x98] ss:$12 sps:$4 sm:$0xff]  }
  0x53   :  { %3702 = vmatpush3.bf16.msra.mxu1 %v4118_v19  ;;  %v4776_v63 = vld [vmem:[#allocation10 + $0x4c] ss:$12 sps:$4 sm:$0xff]   ;;  %v4787_v2 = vld [vmem:[%s5851_s0] sm:$0xff]  ;;  %v4790_v3 = vld [vmem:[#allocation10 + $0x48] ss:$12 sps:$4 sm:$0xff]   ;;  %s3285_s14 = sshll.u32 %s4632_s13, 4  ;;  %s3286_s14 = int_to_ptr.vmem [resolvable:$true] %s3285_s14 }
  0x54   :  { %3703 = vmatprep.subr.bf16.mxu1 %v4122_v22  ;;  %vm1328_vm0 = vcmp.gt.s32.totalorder %v4787_v2, 0  ;;  %v4794_v4 = vld [vmem:[#allocation10 + $0x34] ss:$12 sps:$4 sm:$0xff]   ;;  %vm1576_vm1 = vcmp.gt.s32.totalorder %v4787_v2, 7  ;;  %v4804_v7 = vld [vmem:[#allocation10 + $0x30] ss:$12 sps:$4 sm:$0xff]  }
  0x55   :  { %328 = vmatpush1.bf16.msra.mxu0 %v4096_v17  ;;  %v1329_v5 = vsel %vm1328_vm0, 1, %v5867_v0  ;;  %v4799_v6 = vld [vmem:[#allocation10 + $0x80] ss:$12 sps:$4 sm:$0xff]   ;;  %v1577_v8 = vsel %vm1576_vm1, 1, %v5867_v0  ;;  %v4809_v9 = vld [vmem:[#allocation10 + $0x1c] ss:$12 sps:$4 sm:$0xff]  }
  0x56   :  { %329 = vmatprep.subr.bf16.mxu0 %v4097_v18  ;;  %1331 = vperm.xlu0 %4077, %v1329_v5   ;;  %v4813_v10 = vld [vmem:[#allocation10 + $0x68] ss:$12 sps:$4 sm:$0xff]   ;;  %vm1944_vm3 = vcmp.gt.s32.totalorder %v4787_v2, 2  ;;  %v4820_v11 = vld [vmem:[#allocation10 + $0x18] ss:$12 sps:$4 sm:$0xff]   ;;  %vm2190_vm4 = vcmp.gt.s32.totalorder %v4787_v2, 3 }
  0x57   :  { %3704 = vmatpush3.bf16.msra.mxu1 %v4122_v22  ;;  %5923 = vst [vmem:[#allocation22_spill] sm:$0xff] %v4820_v11  ;;  %v4826_v13 = vld [vmem:[#allocation10 + $0x50] ss:$12 sps:$4 sm:$0xff]   ;;  %v1945_v14 = vsel %vm1944_vm3, 1, %v5867_v0  ;;  %v4833_v15 = vld [vmem:[#allocation10] ss:$12 sps:$4 sm:$0xff]  }
  0x58   :  { %3705 = vmatprep.subr.bf16.mxu1 %v4127_v25  ;;  %5925 = vst [vmem:[#allocation24_spill] sm:$0xff] %v4833_v15  ;;  %v4837_v16 = vld [vmem:[#allocation13 + $0xac] ss:$12 sps:$4 sm:$0xff]   ;;  %v2191_v18 = vsel %vm2190_vm4, 1, %v5867_v0  ;;  %v4845_v19 = vld [vmem:[#allocation13 + $0xa8] ss:$12 sps:$4 sm:$0xff]  }
  0x59   :  { %330 = vmatpush1.bf16.msra.mxu0 %v4099_v20  ;;  %5926 = vst [vmem:[#allocation25_spill] sm:$0xff] %v4837_v16  ;;  %v4840_v17 = vld [vmem:[#allocation10 + $0x38] ss:$12 sps:$4 sm:$0xff]   ;;  %v4848_v20 = vld [vmem:[#allocation13 + $0x94] ss:$12 sps:$4 sm:$0xff]   ;;  %vm1698_vm5 = vcmp.gt.s32.totalorder %v4787_v2, 1 }
  0x5a   :  { %331 = vmatprep.subr.bf16.mxu0 %v4101_v21  ;;  %1579 = vperm.xlu0 %4077, %v1577_v8   ;;  %v4851_v21 = vld [vmem:[#allocation10 + $0x20] ss:$12 sps:$4 sm:$0xff]   ;;  %v4856_v22 = vld [vmem:[#allocation13 + $0x90] ss:$12 sps:$4 sm:$0xff]   ;;  %vm1821_vm6 = vcmp.gt.s32.totalorder %v4787_v2, 6  ;;  %vm2067_vm7 = vcmp.gt.s32.totalorder %v4787_v2, 5 }
  0x5b   :  { %3706 = vmatpush3.bf16.msra.mxu1 %v4127_v25  ;;  %5927 = vst [vmem:[#allocation26_spill] sm:$0xff] %v4851_v21  ;;  %v4867_v25 = vld [vmem:[#allocation13 + $0x78] ss:$12 sps:$4 sm:$0xff]   ;;  %vm2313_vm8 = vcmp.gt.s32.totalorder %v4787_v2, 4 }
  0x5c   :  { %3707 = vmatprep.subr.bf16.mxu1 %v4131_v28 }
  0x5d   :  { %332 = vmatpush1.bf16.msra.mxu0 %v4103_v23  ;;  %v4860_v23 = vld [vmem:[#allocation13 + $0x7c] ss:$12 sps:$4 sm:$0xff]  }
  0x5e   :  { %752 = vmatprep.subr.bf16.mxu0 %v4108_v24  ;;  %1947 = vperm.xlu0 %4077, %v1945_v14   ;;  %v4863_v24 = vld [vmem:[#allocation10 + $0x8] ss:$12 sps:$4 sm:$0xff]  }
  0x5f   :  { %3708 = vmatpush3.bf16.msra.mxu1 %v4131_v28  ;;  %5928 = vst [vmem:[#allocation27_spill] sm:$0xff] %v4863_v24  ;;  %v4877_v28 = vld [vmem:[#allocation13 + $0x60] ss:$12 sps:$4 sm:$0xff]  }
  0x60   :  { %350 = vmatmul.mubr.bf16.vlgmr.msra.gmra.mxu0 %v4725_v12  ;;  %3717 = vmatprep.subr.bf16.mxu1 %v4136_v32 }
  0x61   :  { %753 = vmatpush1.bf16.msra.mxu0 %v4106_v26  ;;  %359 = vmatprep.mubr.bf16.mxu0 %v5867_v0  ;;  %v4870_v26 = vld [vmem:[#allocation13 + $0x64] ss:$12 sps:$4 sm:$0xff]  }
  0x62   :  { %754 = vmatprep.subr.bf16.mxu0 %v4112_v27  ;;  %3710 = vmatmul.mubr.bf16.vlgmr.msra.gmra.mxu1 %v4730_v31  ;;  %v4873_v27 = vld [vmem:[#allocation13 + $0xb0] ss:$12 sps:$4 sm:$0xff]  }
  0x63   :  { %3718 = vmatpush3.bf16.msra.mxu1 %v4136_v32  ;;  %3713 = vmatprep.mubr.bf16.mxu1 %v4734_v37  ;;  %v4893_v32 = vld [vmem:[#allocation13 + $0x34] ss:$12 sps:$4 sm:$0xff]  }
  0x64   :  { %3719 = vmatprep.subr.bf16.mxu1 %v4140_v35  ;;  %2193 = vperm.xlu0 %4077, %v2191_v18  }
  0x65   :  { %755 = vmatpush1.bf16.msra.mxu0 %v4110_v29  ;;  %v4880_v29 = vld [vmem:[#allocation13 + $0x4c] ss:$12 sps:$4 sm:$0xff]  }
  0x66   :  { %756 = vmatprep.subr.bf16.mxu0 %v4117_v30  ;;  %v4884_v30 = vld [vmem:[#allocation13 + $0x98] ss:$12 sps:$4 sm:$0xff]  }
  0x67   :  { %3720 = vmatpush3.bf16.msra.mxu1 %v4140_v35  ;;  %v4903_v35 = vld [vmem:[#allocation13 + $0x1c] ss:$12 sps:$4 sm:$0xff]  }
  0x68   :  { %360 = vmatmul.mubr.bf16.gmra.mxu0 %v4730_v31  ;;  %3721 = vmatprep.subr.bf16.mxu1 %v4144_v39 }
  0x69   :  { %757 = vmatpush1.bf16.msra.mxu0 %v4115_v33  ;;  %369 = vmatprep.mubr.bf16.mxu0 %v5867_v0  ;;  %v4896_v33 = vld [vmem:[#allocation13 + $0x80] ss:$12 sps:$4 sm:$0xff]  }
  0x6a   :  { %758 = vmatprep.subr.bf16.mxu0 %v4121_v34  ;;  %3714 = vmatmul.mubr.bf16.gmra.mxu1 %v4739_v42  ;;  %v4900_v34 = vld [vmem:[#allocation13 + $0x30] ss:$12 sps:$4 sm:$0xff]  }
  0x6b   :  { %3722 = vmatpush3.bf16.msra.mxu1 %v4144_v39  ;;  %3733 = vmatprep.mubr.bf16.mxu1 %v4725_v12  ;;  %v4916_v39 = vld [vmem:[#allocation13 + $0x50] ss:$12 sps:$4 sm:$0xff]  }
  0x6c   :  { %3723 = vmatprep.subr.bf16.mxu1 %v4148_v43 }
  0x6d   :  { %759 = vmatpush1.bf16.msra.mxu0 %v4119_v36  ;;  %v4906_v36 = vld [vmem:[#allocation13 + $0x68] ss:$12 sps:$4 sm:$0xff]  }
  0x6e   :  { %760 = vmatprep.subr.bf16.mxu0 %v4126_v38  ;;  %v4913_v38 = vld [vmem:[#allocation13 + $0x4] ss:$12 sps:$4 sm:$0xff]  }
  0x6f   :  { %3724 = vmatpush3.bf16.msra.mxu1 %v4148_v43  ;;  %v4938_v43 = vld [vmem:[#allocation13 + $0x8] ss:$12 sps:$4 sm:$0xff]  }
  0x70   :  { %370 = vmatmul.mubr.bf16.gmra.mxu0 %v4734_v37  ;;  %3725 = vmatprep.subr.bf16.mxu1 %v4152_v46 }
  0x71   :  { %761 = vmatpush1.bf16.msra.mxu0 %v4124_v40  ;;  %379 = vmatprep.mubr.bf16.mxu0 %v5867_v0  ;;  %v4920_v40 = vld [vmem:[#allocation13] ss:$12 sps:$4 sm:$0xff]  }
  0x72   :  { %762 = vmatprep.subr.bf16.mxu0 %v4130_v41  ;;  %v4924_v41 = vld [vmem:[#allocation13 + $0x38] ss:$12 sps:$4 sm:$0xff]  }
  0x73   :  { %3726 = vmatpush3.bf16.msra.mxu1 %v4152_v46 }
  0x74   :  { %3727 = vmatprep.subr.bf16.mxu1 %v4156_v49 }
  0x75   :  { %763 = vmatpush1.bf16.msra.mxu0 %v4128_v44  ;;  %v150_v44 = vlaneseq }
  0x76   :  { %764 = vmatprep.subr.bf16.mxu0 %v4135_v45 }
  0x77   :  { %3728 = vmatpush3.bf16.msra.mxu1 %v4156_v49  ;;  %v4976_v45 = vshrl.u32 %v150_v44, 7 }
  0x78   :  { %380 = vmatmul.mubr.bf16.gmra.mxu0 %v4739_v42  ;;  %3729 = vmatprep.subr.bf16.mxu1 %v4160_v52 }
  0x79   :  { %765 = vmatpush1.bf16.msra.mxu0 %v4133_v47  ;;  %784 = vmatprep.mubr.bf16.mxu0 %v5867_v0  ;;  %v5866_v46 = vsub.s32 0, %v4976_v45  ;;  %v148_v47 = vld [vmem:[%s5855_s4] sm:$0x7] }
  0x7a   :  { %766 = vmatprep.subr.bf16.mxu0 %v4139_v48  ;;  %v5865_v48 = vsub.s32 1, %v4976_v45 }
  0x7b   :  { %3730 = vmatpush3.bf16.msra.mxu1 %v4160_v52  ;;  %v4985_v49 = vrot.slane %v148_v47, %v5866_v46 }
  0x7c   :  { %3731 = vmatprep.subr.bf16.mxu1 %v4164_v55 }
  0x7d   :  { %767 = vmatpush1.bf16.msra.mxu0 %v4137_v50  ;;  %v4989_v50 = vrot.slane %v148_v47, %v5865_v48 }
  0x7e   :  { %1219 = vmatprep.subr.bf16.mxu0 %v4746_v51 }
  0x7f   :  { %3732 = vmatpush3.bf16.msra.mxu1 %v4164_v55  ;;  %v5873_v55 = vsub.s32 2, %v4976_v45 }
  0x80   :  { %785 = vmatmul.mubr.bf16.vlgmr.msra.gmra.mxu0 %v4725_v12  ;;  %3741 = vmatprep.subr.bf16.mxu1 %v5863_v61  ;;  %v4823_v12 = vld [vmem:[#allocation10 + $0x4] ss:$12 sps:$4 sm:$0xff]  }
  0x81   :  { %1220 = vmatpush1.bf16.msra.mxu0 %v4748_v53  ;;  %794 = vmatprep.mubr.bf16.mxu0 %v5867_v0  ;;  %5924 = vst [vmem:[#allocation23_spill] sm:$0xff] %v4823_v12  ;;  %v161_v44 = vrot.slane %v148_v47, %v5873_v55 }
  0x82   :  { %1221 = vmatprep.subr.bf16.mxu0 %v4751_v54  ;;  %3734 = vmatmul.mubr.bf16.vlgmr.msra.gmra.mxu1 %v4730_v31 }
  0x83   :  { %3742 = vmatpush3.bf16.msra.mxu1 %v4767_v60  ;;  %3737 = vmatprep.mubr.bf16.mxu1 %v4734_v37 }
  0x84   :  { %3743 = vmatprep.subr.bf16.mxu1 %v5863_v61 }
  0x85   :  { %1222 = vmatpush1.bf16.msra.mxu0 %v4755_v56 }
  0x86   :  { %1223 = vmatprep.subr.bf16.mxu0 %v4759_v57 }
  0x87   :  { %3744 = vmatpush3.bf16.msra.mxu1 %v4780_v1 }
  0x88   :  { %795 = vmatmul.mubr.bf16.gmra.mxu0 %v4730_v31  ;;  %3745 = vmatprep.subr.bf16.mxu1 %v5863_v61  ;;  %v4890_v31 = vld [vmem:[#allocation13 + $0x48] ss:$12 sps:$4 sm:$0xff]  }
  0x89   :  { %1224 = vmatpush1.bf16.msra.mxu0 %v4762_v58  ;;  %804 = vmatprep.mubr.bf16.mxu0 %v5867_v0 }
  0x8a   :  { %1225 = vmatprep.subr.bf16.mxu0 %v4765_v59  ;;  %3738 = vmatmul.mubr.bf16.gmra.mxu1 %v4739_v42 }
  0x8b   :  { %3746 = vmatpush3.bf16.msra.mxu1 %v4799_v6  ;;  %3757 = vmatprep.mubr.msk.bf16.mxu1 %vm4630_vm2, %v5863_v61 }
  0x8c   :  { %3747 = vmatprep.subr.bf16.mxu1 %v5863_v61 }
  0x8d   :  { %1226 = vmatpush1.bf16.msra.mxu0 %v4772_v62 }
  0x8e   :  { %1227 = vmatprep.subr.bf16.mxu0 %v4776_v63 }
  0x8f   :  { %3748 = vmatpush3.bf16.msra.mxu1 %v4813_v10 }
  0x90   :  { %805 = vmatmul.mubr.bf16.gmra.mxu0 %v4734_v37  ;;  %3749 = vmatprep.subr.bf16.mxu1 %v5863_v61  ;;  %v4910_v37 = vld [vmem:[#allocation13 + $0x18] ss:$12 sps:$4 sm:$0xff]  }
  0x91   :  { %1228 = vmatpush1.bf16.msra.mxu0 %v4790_v3  ;;  %814 = vmatprep.mubr.bf16.mxu0 %v5867_v0 }
  0x92   :  { %1229 = vmatprep.subr.bf16.mxu0 %v4794_v4 }
  0x93   :  { %3750 = vmatpush3.bf16.msra.mxu1 %v4826_v13 }
  0x94   :  { %3751 = vmatprep.subr.bf16.mxu1 %v5863_v61 }
  0x95   :  { %1230 = vmatpush1.bf16.msra.mxu0 %v4804_v7 }
  0x96   :  { %1231 = vmatprep.subr.bf16.mxu0 %v4809_v9 }
  0x97   :  { %3752 = vmatpush3.bf16.msra.mxu1 %v4840_v17 }
  0x98   :  { %815 = vmatmul.mubr.bf16.gmra.mxu0 %v4739_v42  ;;  %3753 = vmatprep.subr.bf16.mxu1 %v5863_v61  ;;  %v4930_v42 = vld [vmem:[#allocation13 + $0x20] ss:$12 sps:$4 sm:$0xff]  }
  0x99   :  { %1232 = vmatpush1.bf16.msra.mxu0 %v4820_v11  ;;  %1251 = vmatprep.mubr.bf16.mxu0 %v5867_v0 }
  0x9a   :  { %1233 = vmatprep.subr.bf16.mxu0 %v4823_v12 }
  0x9b   :  { %3754 = vmatpush3.bf16.msra.mxu1 %v4851_v21 }
  0x9c   :  { %3755 = vmatprep.subr.bf16.mxu1 %v5863_v61 }
  0x9d   :  { %1234 = vmatpush1.bf16.msra.mxu0 %v4833_v15 }
  0x9e   :  { %1467 = vmatprep.subr.bf16.mxu0 %v4837_v16 }
  0x9f   :  { %3756 = vmatpush3.bf16.msra.mxu1 %v4863_v24 }
  0xa0   :  { %1252 = vmatmul.mubr.bf16.vlgmr.msra.gmra.mxu0 %v5867_v0  ;;  %3761 = vmatprep.subr.bf16.mxu1 %v5863_v61 }
  0xa1   :  { %1468 = vmatpush1.bf16.msra.mxu0 %v4845_v19  ;;  %1499 = vmatprep.mubr.bf16.mxu0 %v5867_v0 }
  0xa2   :  { %1469 = vmatprep.subr.bf16.mxu0 %v4848_v20  ;;  %3758 = vmatmul.mubr.bf16.vlgmr.msra.gmra.mxu1 %v5867_v0 }
  0xa3   :  { %3762 = vmatpush3.bf16.msra.mxu1 %v4873_v27  ;;  %3777 = vmatprep.mubr.msk.bf16.mxu1 %vm4630_vm2, %v5863_v61 }
  0xa4   :  { %3763 = vmatprep.subr.bf16.mxu1 %v5863_v61 }
  0xa5   :  { %1470 = vmatpush1.bf16.msra.mxu0 %v4856_v22 }
  0xa6   :  { %1471 = vmatprep.subr.bf16.mxu0 %v4860_v23 }
  0xa7   :  { %3764 = vmatpush3.bf16.msra.mxu1 %v4884_v30 }
  0xa8   :  { %3765 = vmatprep.subr.bf16.mxu1 %v5863_v61 }
  0xa9   :  { %1472 = vmatpush1.bf16.msra.mxu0 %v4867_v25 }
  0xaa   :  { %1473 = vmatprep.subr.bf16.mxu0 %v4870_v26 }
  0xab   :  { %3766 = vmatpush3.bf16.msra.mxu1 %v4896_v33 }
  0xac   :  { %3767 = vmatprep.subr.bf16.mxu1 %v5863_v61 }
  0xad   :  { %1474 = vmatpush1.bf16.msra.mxu0 %v4877_v28 }
  0xae   :  { %1475 = vmatprep.subr.bf16.mxu0 %v4880_v29 }
  0xaf   :  { %3768 = vmatpush3.bf16.msra.mxu1 %v4906_v36 }
  0xb0   :  { %3769 = vmatprep.subr.bf16.mxu1 %v5863_v61 }
  0xb1   :  { %1476 = vmatpush1.bf16.msra.mxu0 %v4890_v31 }
  0xb2   :  { %1477 = vmatprep.subr.bf16.mxu0 %v4893_v32 }
  0xb3   :  { %3770 = vmatpush3.bf16.msra.mxu1 %v4916_v39 }
  0xb4   :  { %3771 = vmatprep.subr.bf16.mxu1 %v5863_v61 }
  0xb5   :  { %1478 = vmatpush1.bf16.msra.mxu0 %v4900_v34 }
  0xb6   :  { %1479 = vmatprep.subr.bf16.mxu0 %v4903_v35 }
  0xb7   :  { %3772 = vmatpush3.bf16.msra.mxu1 %v4924_v41 }
  0xb8   :  { %3773 = vmatprep.subr.bf16.mxu1 %v5863_v61 }
  0xb9   :  { %1480 = vmatpush1.bf16.msra.mxu0 %v4910_v37 }
  0xba   :  { %1481 = vmatprep.subr.bf16.mxu0 %v4913_v38 }
  0xbb   :  { %3774 = vmatpush3.bf16.msra.mxu1 %v4930_v42 }
  0xbc   :  { %3775 = vmatprep.subr.bf16.mxu1 %v5863_v61 }
  0xbd   :  { %1482 = vmatpush1.bf16.msra.mxu0 %v4920_v40 }
  0xbe   :  { %1589 = vmatprep.subr.bf16.mxu0 %v4746_v51 }
  0xbf   :  { %3776 = vmatpush3.bf16.msra.mxu1 %v4938_v43 }
  0xc0   :  { %1500 = vmatmul.mubr.bf16.vlgmr.msra.gmra.mxu0 %v5867_v0  ;;  %3781 = vmatprep.subr.bf16.mxu1 %v5863_v61 }
  0xc1   :  { %1590 = vmatpush1.bf16.msra.mxu0 %v4748_v53  ;;  %1621 = vmatprep.mubr.bf16.mxu0 %v5867_v0 }
  0xc2   :  { %1591 = vmatprep.subr.bf16.mxu0 %v4751_v54  ;;  %3778 = vmatmul.mubr.bf16.vlgmr.msra.gmra.mxu1 %v5867_v0 }
  0xc3   :  { %3782 = vmatpush3.bf16.msra.mxu1 %v4767_v60  ;;  %3797 = vmatprep.mubr.msk.bf16.mxu1 %vm4630_vm2, %v5863_v61 }
  0xc4   :  { %3783 = vmatprep.subr.bf16.mxu1 %v5863_v61 }
  0xc5   :  { %1592 = vmatpush1.bf16.msra.mxu0 %v4755_v56 }
  0xc6   :  { %1593 = vmatprep.subr.bf16.mxu0 %v4759_v57 }
  0xc7   :  { %3784 = vmatpush3.bf16.msra.mxu1 %v4780_v1 }
  0xc8   :  { %3785 = vmatprep.subr.bf16.mxu1 %v5863_v61 }
  0xc9   :  { %1594 = vmatpush1.bf16.msra.mxu0 %v4762_v58 }
  0xca   :  { %1595 = vmatprep.subr.bf16.mxu0 %v4765_v59 }
  0xcb   :  { %3786 = vmatpush3.bf16.msra.mxu1 %v4799_v6 }
  0xcc   :  { %3787 = vmatprep.subr.bf16.mxu1 %v5863_v61 }
  0xcd   :  { %1596 = vmatpush1.bf16.msra.mxu0 %v4772_v62 }
  0xce   :  { %1597 = vmatprep.subr.bf16.mxu0 %v4776_v63 }
  0xcf   :  { %3788 = vmatpush3.bf16.msra.mxu1 %v4813_v10 }
  0xd0   :  { %3789 = vmatprep.subr.bf16.mxu1 %v5863_v61 }
  0xd1   :  { %1598 = vmatpush1.bf16.msra.mxu0 %v4790_v3 }
  0xd2   :  { %1599 = vmatprep.subr.bf16.mxu0 %v4794_v4 }
  0xd3   :  { %3790 = vmatpush3.bf16.msra.mxu1 %v4826_v13 }
  0xd4   :  { %3791 = vmatprep.subr.bf16.mxu1 %v5863_v61 }
  0xd5   :  { %1600 = vmatpush1.bf16.msra.mxu0 %v4804_v7 }
  0xd6   :  { %1601 = vmatprep.subr.bf16.mxu0 %v4809_v9 }
  0xd7   :  { %3792 = vmatpush3.bf16.msra.mxu1 %v4840_v17 }
  0xd8   :  { %3793 = vmatprep.subr.bf16.mxu1 %v5863_v61 }
  0xd9   :  { %1602 = vmatpush1.bf16.msra.mxu0 %v4820_v11 }
  0xda   :  { %1603 = vmatprep.subr.bf16.mxu0 %v4823_v12 }
  0xdb   :  { %3794 = vmatpush3.bf16.msra.mxu1 %v4851_v21 }
  0xdc   :  { %3795 = vmatprep.subr.bf16.mxu1 %v5863_v61 }
  0xdd   :  { %1604 = vmatpush1.bf16.msra.mxu0 %v4833_v15 }
  0xde   :  { %1712 = vmatprep.subr.bf16.mxu0 %v4837_v16 }
  0xdf   :  { %3796 = vmatpush3.bf16.msra.mxu1 %v4863_v24 }
  0xe0   :  { %3801 = vmatprep.subr.bf16.mxu1 %v5863_v61 }
 0x120   :  { %v351_v51 = vpop.f32.mrf.mxu0 }
 0x121   :  { %v352_v52 = vadd.f32 %v351_v51, %v4985_v49 }
 0x122   :  { %v353_v53 = vpop.f32.mrf.mxu0 }
 0x123   :  { %v354_v54 = vadd.f32 %v353_v53, %v4989_v50  ;;  %v3711_v53 = vpop.f32.mrf.mxu1 }
 0x124   :  { %v355_v56 = vpop.f32.mrf.mxu0  ;;  %v433_v16 = vadd.f32 %v3711_v53, %v161_v44 }
 0x125   :  { %v4994_v5 = vpack.c.bf16 %v354_v54, %v352_v52  ;;  %v356_v14 = vadd.f32 %v355_v56, %v4985_v49  ;;  %v424_v54 = vpop.f32.mrf.mxu1 }
 0x126   :  { %v357_v8 = vpop.f32.mrf.mxu0  ;;  %v3498_v56 = vpack.c.bf16 %v433_v16, %v433_v16  ;;  %v425_v15 = vadd.f32 %v424_v54, %v161_v44 }
 0x127   :  { %v358_v18 = vadd.f32 %v357_v8, %v4989_v50  ;;  %v3712_v12 = vpop.f32.mrf.mxu1 }
 0x128   :  { %v361_v61 = vpop.f32.mrf.mxu0  ;;  %564 = vst [vmem:[#allocation2 + $0x20] sm:$0xf] %v3498_v56 }
 0x129   :  { %v5000_v48 = vpack.c.bf16 %v358_v18, %v356_v14  ;;  %v362_v51 = vadd.f32 %v361_v61, %v4985_v49  ;;  %v3494_v18 = vpack.c.bf16 %v425_v15, %v425_v15  ;;  %v436_v61 = vadd.f32 %v3712_v12, %v161_v44 }
 0x12a   :  { %v363_v46 = vpop.f32.mrf.mxu0 }
 0x12b   :  { %5929 = vst [vmem:[#allocation28_spill] sm:$0xff] %v5000_v48  ;;  %v364_v0 = vadd.f32 %v363_v46, %v4989_v50  ;;  %v427_v48 = vpop.f32.mrf.mxu1  ;;  %560 = vst [vmem:[#allocation2 + $0x8] sm:$0xf] %v3494_v18  ;;  %v3500_v53 = vpack.c.bf16 %v436_v61, %v436_v61 }
 0x12c   :  { %v365_v52 = vpop.f32.mrf.mxu0 }
 0x12d   :  { %v5004_v24 = vpack.c.bf16 %v364_v0, %v362_v51  ;;  %v366_v47 = vadd.f32 %v365_v52, %v4985_v49  ;;  %v428_v0 = vadd.f32 %v427_v48, %v161_v44  ;;  %v3715_v16 = vpop.f32.mrf.mxu1  ;;  %566 = vst [vmem:[#allocation2 + $0x2c] sm:$0xf] %v3500_v53 }
 0x12e   :  { %v367_v8 = vpop.f32.mrf.mxu0 }
 0x12f   :  { %5930 = vst [vmem:[#allocation29_spill] sm:$0xff] %v5004_v24  ;;  %v368_v14 = vadd.f32 %v367_v8, %v4989_v50  ;;  %v3496_v52 = vpack.c.bf16 %v428_v0, %v428_v0  ;;  %v449_v24 = vadd.f32 %v3715_v16, %v161_v44  ;;  %v440_v56 = vpop.f32.mrf.mxu1 }
 0x130   :  { %v371_v55 = vpop.f32.mrf.mxu0  ;;  %v441_v11 = vadd.f32 %v440_v56, %v161_v44  ;;  %v5931_v56 = vmov 0  }
 0x131   :  { %v3499_v21 = vpack.c.bf16 %v368_v14, %v366_v47  ;;  %v372_v46 = vadd.f32 %v371_v55, %v4985_v49  ;;  %562 = vst [vmem:[#allocation2 + $0x14] sm:$0xf] %v3496_v52  ;;  %v3506_v12 = vpack.c.bf16 %v449_v24, %v449_v24  ;;  %v3716_v14 = vpop.f32.mrf.mxu1 }
 0x132   :  { %v373_v51 = vpop.f32.mrf.mxu0  ;;  %v452_v18 = vadd.f32 %v3716_v14, %v161_v44 }
 0x133   :  { %565 = vst [vmem:[#allocation2 + $0x24] sm:$0xff] %v3499_v21  ;;  %v374_v54 = vadd.f32 %v373_v51, %v4989_v50  ;;  %572 = vst [vmem:[#allocation2 + $0x50] sm:$0xf] %v3506_v12  ;;  %v3502_v21 = vpack.c.bf16 %v441_v11, %v441_v11  ;;  %v443_v53 = vpop.f32.mrf.mxu1 }
 0x134   :  { %v375_v8 = vpop.f32.mrf.mxu0  ;;  %v444_v16 = vadd.f32 %v443_v53, %v161_v44  ;;  %v5932_v44 = vsub.s32 0, %v4976_v45 }
 0x135   :  { %v3501_v15 = vpack.c.bf16 %v374_v54, %v372_v46  ;;  %v376_v55 = vadd.f32 %v375_v8, %v4985_v49  ;;  %568 = vst [vmem:[#allocation2 + $0x38] sm:$0xf] %v3502_v21  ;;  %v3508_v46 = vpack.c.bf16 %v452_v18, %v452_v18  ;;  %v607_v54 = vld [vmem:[%s5859_s8] sm:$0x7]  ;;  %v5933_v18 = vsub.s32 1, %v4976_v45 }
 0x136   :  { %v377_v47 = vpop.f32.mrf.mxu0  ;;  %v3504_v8 = vpack.c.bf16 %v444_v16, %v444_v16  ;;  %v2068_v16 = vsel %vm2067_vm7, 1, %v5931_v56 }
 0x137   :  { %567 = vst [vmem:[#allocation2 + $0x30] sm:$0xff] %v3501_v15  ;;  %v378_v48 = vadd.f32 %v377_v47, %v4989_v50  ;;  %574 = vst [vmem:[#allocation2 + $0x5c] sm:$0xf] %v3508_v46  ;;  %v1699_v15 = vsel %vm1698_vm5, 1, %v5931_v56  ;;  %v5022_v47 = vrot.slane %v607_v54, %v5932_v44 }
 0x138   :  { %v381_v61 = vpop.f32.mrf.mxu0  ;;  %570 = vst [vmem:[#allocation2 + $0x44] sm:$0xf] %v3504_v8  ;;  %1701 = vperm.xlu1 %4078, %v1699_v15   ;;  %v2314_v8 = vsel %vm2313_vm8, 1, %v5931_v56 }
 0x139   :  { %v3503_v0 = vpack.c.bf16 %v378_v48, %v376_v55  ;;  %v382_v51 = vadd.f32 %v381_v61, %v4985_v49  ;;  %v1822_v55 = vsel %vm1821_vm6, 1, %v5931_v56  ;;  %v5029_v61 = vrot.slane %v607_v54, %v5933_v18 }
 0x13a   :  { %v383_v24 = vpop.f32.mrf.mxu0 }
 0x13b   :  { %569 = vst [vmem:[#allocation2 + $0x3c] sm:$0xff] %v3503_v0  ;;  %v384_v52 = vadd.f32 %v383_v24, %v4989_v50 }
 0x13c   :  { %v385_v11 = vpop.f32.mrf.mxu0  ;;  %1824 = vperm.xlu1 %4078, %v1822_v55  }
 0x13d   :  { %v3505_v12 = vpack.c.bf16 %v384_v52, %v382_v51  ;;  %v386_v48 = vadd.f32 %v385_v11, %v4985_v49 }
 0x13e   :  { %v387_v14 = vpop.f32.mrf.mxu0 }
 0x13f   :  { %571 = vst [vmem:[#allocation2 + $0x48] sm:$0xff] %v3505_v12  ;;  %v388_v21 = vadd.f32 %v387_v14, %v4989_v50  ;;  %v5934_v12 = vsub.s32 2, %v4976_v45 }
 0x140   :  { %v786_v53 = vpop.f32.mrf.mxu0  ;;  %2070 = vperm.xlu1 %4078, %v2068_v16  }
 0x141   :  { %v3507_v0 = vpack.c.bf16 %v388_v21, %v386_v48  ;;  %v787_v51 = vadd.f32 %v786_v53, %v5022_v47  ;;  %v620_v44 = vrot.slane %v607_v54, %v5934_v12 }
 0x142   :  { %v788_v46 = vpop.f32.mrf.mxu0  ;;  %v3735_v21 = vpop.f32.mrf.mxu1 }
 0x143   :  { %573 = vst [vmem:[#allocation2 + $0x54] sm:$0xff] %v3507_v0  ;;  %v789_v24 = vadd.f32 %v788_v46, %v5029_v61  ;;  %v868_v53 = vadd.f32 %v3735_v21, %v620_v44 }
 0x144   :  { %v790_v49 = vpop.f32.mrf.mxu0  ;;  %2316 = vperm.xlu1 %4078, %v2314_v8  }
 0x145   :  { %v3509_v50 = vpack.c.bf16 %v789_v24, %v787_v51  ;;  %v791_v11 = vadd.f32 %v790_v49, %v5022_v47  ;;  %v859_v51 = vpop.f32.mrf.mxu1  ;;  %v3514_v16 = vpack.c.bf16 %v868_v53, %v868_v53 }
 0x146   :  { %v792_v52 = vpop.f32.mrf.mxu0  ;;  %v860_v24 = vadd.f32 %v859_v51, %v620_v44 }
 0x147   :  { %994 = vst [vmem:[#allocation3] sm:$0xff] %v3509_v50  ;;  %v793_v15 = vadd.f32 %v792_v52, %v5029_v61  ;;  %v3736_v50 = vpop.f32.mrf.mxu1  ;;  %999 = vst [vmem:[#allocation3 + $0x20] sm:$0xf] %v3514_v16 }
 0x148   :  { %v796_v14 = vpop.f32.mrf.mxu0  ;;  %v3510_v52 = vpack.c.bf16 %v860_v24, %v860_v24  ;;  %v871_v8 = vadd.f32 %v3736_v50, %v620_v44 }
 0x149   :  { %v3511_v55 = vpack.c.bf16 %v793_v15, %v791_v11  ;;  %v797_v48 = vadd.f32 %v796_v14, %v5022_v47  ;;  %v862_v15 = vpop.f32.mrf.mxu1 }
 0x14a   :  { %v798_v2 = vpop.f32.mrf.mxu0  ;;  %995 = vst [vmem:[#allocation3 + $0x8] sm:$0xf] %v3510_v52 }
 0x14b   :  { %996 = vst [vmem:[#allocation3 + $0xc] sm:$0xff] %v3511_v55  ;;  %v799_v18 = vadd.f32 %v798_v2, %v5029_v61  ;;  %v3516_v55 = vpack.c.bf16 %v871_v8, %v871_v8  ;;  %v3739_v21 = vpop.f32.mrf.mxu1 }
 0x14c   :  { %v800_v0 = vpop.f32.mrf.mxu0 }
 0x14d   :  { %v3513_v46 = vpack.c.bf16 %v799_v18, %v797_v48  ;;  %v801_v45 = vadd.f32 %v800_v0, %v5022_v47  ;;  %v863_v48 = vadd.f32 %v862_v15, %v620_v44  ;;  %1001 = vst [vmem:[#allocation3 + $0x2c] sm:$0xf] %v3516_v55  ;;  %v884_v0 = vadd.f32 %v3739_v21, %v620_v44 }
 0x14e   :  { %v802_v49 = vpop.f32.mrf.mxu0 }
 0x14f   :  { %998 = vst [vmem:[#allocation3 + $0x18] sm:$0xff] %v3513_v46  ;;  %v803_v54 = vadd.f32 %v802_v49, %v5029_v61  ;;  %v3512_v53 = vpack.c.bf16 %v863_v48, %v863_v48  ;;  %v875_v46 = vpop.f32.mrf.mxu1  ;;  %v3522_v24 = vpack.c.bf16 %v884_v0, %v884_v0 }
 0x150   :  { %v806_v11 = vpop.f32.mrf.mxu0  ;;  %v876_v49 = vadd.f32 %v875_v46, %v620_v44 }
 0x151   :  { %v3515_v12 = vpack.c.bf16 %v803_v54, %v801_v45  ;;  %v807_v14 = vadd.f32 %v806_v11, %v5022_v47  ;;  %997 = vst [vmem:[#allocation3 + $0x14] sm:$0xf] %v3512_v53  ;;  %v3740_v45 = vpop.f32.mrf.mxu1  ;;  %1007 = vst [vmem:[#allocation3 + $0x50] sm:$0xf] %v3522_v24 }
 0x152   :  { %v808_v2 = vpop.f32.mrf.mxu0  ;;  %v3518_v8 = vpack.c.bf16 %v876_v49, %v876_v49  ;;  %v887_v11 = vadd.f32 %v3740_v45, %v620_v44  ;;  %v1300_v49 = vunpack.c.l.bf16 %v4994_v5 }
 0x153   :  { %1000 = vst [vmem:[#allocation3 + $0x24] sm:$0xff] %v3515_v12  ;;  %v809_v18 = vadd.f32 %v808_v2, %v5029_v61  ;;  %v878_v12 = vpop.f32.mrf.mxu1 }
 0x154   :  { %v810_v51 = vpop.f32.mrf.mxu0  ;;  %1003 = vst [vmem:[#allocation3 + $0x38] sm:$0xf] %v3518_v8  ;;  %v879_v2 = vadd.f32 %v878_v12, %v620_v44  ;;  %v1309_v44 = vrot.slane %v4994_v5, 4  ;;  %v5062_v5 = vld [vmem:[%s5856_s5] ss:$0 sm:$0xff] }
 0x155   :  { %v3517_v16 = vpack.c.bf16 %v809_v18, %v807_v14  ;;  %v811_v54 = vadd.f32 %v810_v51, %v5022_v47  ;;  %v3524_v14 = vpack.c.bf16 %v887_v11, %v887_v11 }
 0x156   :  { %v812_v50 = vpop.f32.mrf.mxu0  ;;  %v3520_v53 = vpack.c.bf16 %v879_v2, %v879_v2 }
 0x157   :  { %1002 = vst [vmem:[#allocation3 + $0x30] sm:$0xff] %v3517_v16  ;;  %v813_v52 = vadd.f32 %v812_v50, %v5029_v61  ;;  %1009 = vst [vmem:[#allocation3 + $0x5c] sm:$0xf] %v3524_v14 }
 0x158   :  { %v816_v15 = vpop.f32.mrf.mxu0  ;;  %1005 = vst [vmem:[#allocation3 + $0x44] sm:$0xf] %v3520_v53 }
 0x159   :  { %v5049_v55 = vpack.c.bf16 %v813_v52, %v811_v54  ;;  %v817_v48 = vadd.f32 %v816_v15, %v5022_v47  ;;  %v1311_v15 = vunpack.c.l.bf16 %v1309_v44 }
 0x15a   :  { %v818_v21 = vpop.f32.mrf.mxu0 }
 0x15b   :  { %5935 = vst [vmem:[#allocation30_spill] sm:$0xff] %v5049_v55  ;;  %v819_v18 = vadd.f32 %v818_v21, %v5029_v61  ;;  %v5068_v55 = vpop.permute.xlu0 %1331 }
 0x15c   :  { %v820_v0 = vpop.f32.mrf.mxu0  ;;  %5936 = vst [vmem:[#allocation31_spill] sm:$0xff] %v5068_v55  ;;  %vm1333_vm9 = vcmp.eq.s32.totalorder %v5068_v55, 1 }
 0x15d   :  { %v5053_v51 = vpack.c.bf16 %v819_v18, %v817_v48  ;;  %v821_v16 = vadd.f32 %v820_v0, %v5022_v47  ;;  %vm3453_vm10 = vmpackc.low %vm1333_vm9, %vm1333_vm9 }
 0x15e   :  { %v822_v46 = vpop.f32.mrf.mxu0 }
 0x15f   :  { %v823_v24 = vadd.f32 %v822_v46, %v5029_v61 }
 0x160   :  { %v1253_v50 = vpop.f32.mrf.mxu0 }
 0x161   :  { %v3523_v45 = vpack.c.bf16 %v823_v24, %v821_v16  ;;  %v1301_v54 = vadd.f32 %v1300_v49, %v1253_v50  ;;  %v5065_v49 = vld [vmem:[#allocation2 + $0x8] ss:$12 sps:$4 sm:$0xff]  }
 0x162   :  { %v1255_v52 = vpop.f32.mrf.mxu0  ;;  %v1294_v14 = vpop.f32.mrf.mxu1 }
 0x163   :  { %v3425_v8 = vmul.f32 -1.442695, %v1301_v54  ;;  %v1312_v48 = vadd.f32 %v1311_v15, %v1255_v52  ;;  %v1319_v16 = vadd.f32 %v5062_v5, %v1294_v14  ;;  %v1548_v24 = vunpack.c.l.bf16 %v3523_v45 }
 0x164   :  { %v1257_v11 = vpop.f32.mrf.mxu0  ;;  %v3759_v21 = vpop.f32.mrf.mxu1  ;;  %v1557_v44 = vrot.slane %v3523_v45, 4  ;;  %v1321_v15 = vunpack.c.l.bf16 %v5065_v49 }
 0x165   :  { %4211 = vpow2.f32 %v3425_v8  ;;  %v3426_v2 = vmul.f32 -1.442695, %v1312_v48 }
 0x166   :  { %v1258_v12 = vpop.f32.mrf.mxu0  ;;  %v1297_v47 = vpop.f32.mrf.mxu1  ;;  %v1559_v21 = vunpack.c.l.bf16 %v1557_v44 }
 0x167   :  { %4213 = vpow2.f32 %v3426_v2 }
 0x168   :  { %v3760_v61 = vpop.f32.mrf.mxu1 }
 0x172   :  { %v4212_v18 = vpop.eup %4211 }
 0x173   :  { %v1305_v53 = vadd.f32 1.0, %v4212_v18 }
 0x174   :  { %v4214_v0 = vpop.eup %4213 }
 0x175   :  { %4215 = vrcp.f32 %v1305_v53  ;;  %v1316_v46 = vadd.f32 1.0, %v4214_v0 }
 0x177   :  { %4217 = vrcp.f32 %v1316_v46 }
 0x180   :  { %v1501_v50 = vpop.f32.mrf.mxu0 }
 0x181   :  { %v1549_v54 = vadd.f32 %v1548_v24, %v1501_v50 }
 0x182   :  { %v4216_v52 = vpop.eup %4215  ;;  %v1503_v8 = vpop.f32.mrf.mxu0 }
 0x183   :  { %v1320_v11 = vmul.f32 %v4216_v52, %v1319_v16  ;;  %v3451_v12 = vmul.f32 -1.442695, %v1549_v54  ;;  %v1560_v14 = vadd.f32 %v1559_v21, %v1503_v8  ;;  %v1542_v61 = vpop.f32.mrf.mxu1 }
 0x184   :  { %v1505_v48 = vpop.f32.mrf.mxu0  ;;  %v4218_v45 = vpop.eup %4217 }
 0x185   :  { %v1322_v2 = vadd.f32 %v1321_v15, %v1320_v11  ;;  %4219 = vpow2.f32 %v3451_v12  ;;  %v3452_v18 = vmul.f32 -1.442695, %v1560_v14  ;;  %v3779_v53 = vpop.f32.mrf.mxu1  ;;  %v1324_v16 = vsub.f32 1.0, %v4218_v45  ;;  %v5082_v48 = vld [vmem:[%s5860_s9] ss:$0 sm:$0xff] }
 0x186   :  { %v1506_v47 = vpop.f32.mrf.mxu0  ;;  %v1326_v11 = vmul.f32 0.0, %v4218_v45  ;;  %v5092_v14 = vld [vmem:[#allocation3 + $0x50] ss:$12 sps:$4 sm:$0xff]  }
 0x187   :  { %4221 = vtanh.f32 %v1322_v2  ;;  %v1545_v0 = vpop.f32.mrf.mxu1  ;;  %v5937_v2 = vmov 0.0   ;;  %v1567_v47 = vadd.f32 %v5082_v48, %v1542_v61 }
 0x188   :  { %4223 = vpow2.f32 %v3452_v18  ;;  %v1569_v0 = vunpack.c.h.bf16 %v5092_v14 }
 0x189   :  { %v3780_v24 = vpop.f32.mrf.mxu1 }
 0x192   :  { %v4220_v50 = vpop.eup %4219 }
 0x193   :  { %v1553_v46 = vadd.f32 1.0, %v4220_v50 }
 0x194   :  { %v4222_v52 = vpop.eup %4221 }
 0x195   :  { %4225 = vrcp.f32 %v1553_v46  ;;  %v1325_v54 = vmul.f32 %v4222_v52, %v1324_v16  ;;  %v4224_v12 = vpop.eup %4223  ;;  %v5119_v52 = vpop.permute.xlu0 %1579 }
 0x196   :  { %v1564_v21 = vadd.f32 1.0, %v4224_v12  ;;  %5938 = vst [vmem:[#allocation32_spill] sm:$0xff] %v5119_v52  ;;  %vm1581_vm11 = vcmp.eq.s32.totalorder %v5119_v52, 1  ;;  %v5139_v12 = vld [vmem:[#allocation10 + $0x94] ss:$12 sps:$4 sm:$0xff]  }
 0x197   :  { %v1327_v44 = vadd.f32 %v1326_v11, %v1325_v54  ;;  %vm3461_vm12 = vmpackc.low %vm1581_vm11, %vm1581_vm11  ;;  %v5424_v52 = vld [vmem:[#allocation13 + $0x4] ss:$12 sps:$4 sm:$0xff]  }
 0x198   :  { %4227 = vrcp.f32 %v1564_v21  ;;  %v5146_v21 = vld [vmem:[#allocation10 + $0x90] ss:$12 sps:$4 sm:$0xff]  }
 0x199   :  { %v5076_v8 = vsel %vm1333_vm9, %v1327_v44, 0.0  ;;  %v3454_v15 = vpack.c.bf16 %v1327_v44, %v1327_v44  ;;  %v5128_v44 = vld [vmem:[#allocation10 + $0xac] ss:$12 sps:$4 sm:$0xff]  }
 0x19a   :  { %1335 = vst [vmem:[#allocation14] sm:$0xff] %v5076_v8 }
 0x19b   :  { %3455 = vmatmul.mubr.msk.bf16.vlgmr.msra.gmra.mxu0 %vm3453_vm10, %v3454_v15  ;;  %3798 = vmatmul.mubr.msk.bf16.vlgmr.msra.gmra.mxu1 %vm3453_vm10, %v3454_v15  ;;  %v5135_v15 = vld [vmem:[#allocation10 + $0xa8] ss:$12 sps:$4 sm:$0xff]  }
 0x19c   :  { %1713 = vmatpush1.bf16.msra.mxu0 %v4845_v19  ;;  %3802 = vmatpush3.bf16.msra.mxu1 %v4873_v27 }
 0x19d   :  { %1714 = vmatprep.subr.bf16.mxu0 %v4848_v20  ;;  %3803 = vmatprep.subr.bf16.mxu1 %v5937_v2 }
 0x19e   :  { %1744 = vmatprep.mubr.bf16.mxu0 %v5931_v56  ;;  %3817 = vmatprep.mubr.msk.bf16.mxu1 %vm4630_vm2, %v5937_v2 }
 0x1a0   :  { %1715 = vmatpush1.bf16.msra.mxu0 %v4856_v22  ;;  %3804 = vmatpush3.bf16.msra.mxu1 %v4884_v30 }
 0x1a1   :  { %1716 = vmatprep.subr.bf16.mxu0 %v4860_v23  ;;  %3805 = vmatprep.subr.bf16.mxu1 %v5937_v2 }
 0x1a2   :  { %v4226_v18 = vpop.eup %4225 }
 0x1a3   :  { %v1568_v53 = vmul.f32 %v4226_v18, %v1567_v47 }
 0x1a4   :  { %1717 = vmatpush1.bf16.msra.mxu0 %v4867_v25  ;;  %3806 = vmatpush3.bf16.msra.mxu1 %v4896_v33 }
 0x1a5   :  { %v1570_v61 = vadd.f32 %v1569_v0, %v1568_v53  ;;  %1718 = vmatprep.subr.bf16.mxu0 %v4870_v26  ;;  %3807 = vmatprep.subr.bf16.mxu1 %v5937_v2  ;;  %v4228_v45 = vpop.eup %4227 }
 0x1a6   :  { %v1572_v24 = vsub.f32 1.0, %v4228_v45  ;;  %v1574_v16 = vmul.f32 0.0, %v4228_v45 }
 0x1a7   :  { %4229 = vtanh.f32 %v1570_v61 }
 0x1a8   :  { %1719 = vmatpush1.bf16.msra.mxu0 %v4877_v28  ;;  %3808 = vmatpush3.bf16.msra.mxu1 %v4906_v36 }
 0x1a9   :  { %1720 = vmatprep.subr.bf16.mxu0 %v4880_v29  ;;  %3809 = vmatprep.subr.bf16.mxu1 %v5937_v2 }
 0x1ac   :  { %1721 = vmatpush1.bf16.msra.mxu0 %v4890_v31  ;;  %3810 = vmatpush3.bf16.msra.mxu1 %v4916_v39 }
 0x1ad   :  { %1722 = vmatprep.subr.bf16.mxu0 %v4893_v32  ;;  %3811 = vmatprep.subr.bf16.mxu1 %v5937_v2 }
 0x1b0   :  { %1723 = vmatpush1.bf16.msra.mxu0 %v4900_v34  ;;  %3812 = vmatpush3.bf16.msra.mxu1 %v4924_v41 }
 0x1b1   :  { %1724 = vmatprep.subr.bf16.mxu0 %v4903_v35  ;;  %3813 = vmatprep.subr.bf16.mxu1 %v5937_v2 }
 0x1b4   :  { %v4230_v50 = vpop.eup %4229  ;;  %1725 = vmatpush1.bf16.msra.mxu0 %v4910_v37  ;;  %3814 = vmatpush3.bf16.msra.mxu1 %v4930_v42 }
 0x1b5   :  { %1726 = vmatprep.subr.bf16.mxu0 %v4913_v38  ;;  %3815 = vmatprep.subr.bf16.mxu1 %v5937_v2  ;;  %v1573_v46 = vmul.f32 %v4230_v50, %v1572_v24 }
 0x1b7   :  { %v5122_v54 = vadd.f32 %v1574_v16, %v1573_v46 }
 0x1b8   :  { %1727 = vmatpush1.bf16.msra.mxu0 %v4920_v40  ;;  %3816 = vmatpush3.bf16.msra.mxu1 %v4938_v43 }
 0x1b9   :  { %v3462_v11 = vpack.c.bf16 %v5122_v54, %v5122_v54  ;;  %1835 = vmatprep.subr.bf16.mxu0 %v5128_v44  ;;  %3821 = vmatprep.subr.bf16.mxu1 %v5937_v2 }
 0x1bb   :  { %3463 = vmatmul.mubr.msk.bf16.vlgmr.msra.gmra.mxu0 %vm3461_vm12, %v3462_v11  ;;  %3818 = vmatmul.mubr.msk.bf16.vlgmr.msra.gmra.mxu1 %vm3461_vm12, %v3462_v11 }
 0x1bc   :  { %1836 = vmatpush1.bf16.msra.mxu0 %v5135_v15  ;;  %3822 = vmatpush3.bf16.msra.mxu1 %v4767_v60  ;;  %v5942_v60 = vld [vmem:[#allocation24_spill] sm:$0xff] }
 0x1bd   :  { %1837 = vmatprep.subr.bf16.mxu0 %v5139_v12  ;;  %3823 = vmatprep.subr.bf16.mxu1 %v5937_v2 }
 0x1be   :  { %1867 = vmatprep.mubr.bf16.mxu0 %v5931_v56  ;;  %3837 = vmatprep.mubr.msk.bf16.mxu1 %vm4630_vm2, %v5937_v2 }
 0x1c0   :  { %1838 = vmatpush1.bf16.msra.mxu0 %v5146_v21  ;;  %3824 = vmatpush3.bf16.msra.mxu1 %v4780_v1  ;;  %v5945_v1 = vld [vmem:[#allocation28_spill] sm:$0xff] }
 0x1c1   :  { %1839 = vmatprep.subr.bf16.mxu0 %v4759_v57  ;;  %3825 = vmatprep.subr.bf16.mxu1 %v5937_v2  ;;  %v5939_v57 = vld [vmem:[#allocation22_spill] sm:$0xff] }
 0x1c4   :  { %1840 = vmatpush1.bf16.msra.mxu0 %v4762_v58  ;;  %3826 = vmatpush3.bf16.msra.mxu1 %v4799_v6  ;;  %v5940_v58 = vld [vmem:[#allocation26_spill] sm:$0xff] }
 0x1c5   :  { %1841 = vmatprep.subr.bf16.mxu0 %v4765_v59  ;;  %3827 = vmatprep.subr.bf16.mxu1 %v5937_v2  ;;  %v5941_v59 = vld [vmem:[#allocation23_spill] sm:$0xff] }
 0x1c8   :  { %1842 = vmatpush1.bf16.msra.mxu0 %v4772_v62  ;;  %3828 = vmatpush3.bf16.msra.mxu1 %v4813_v10  ;;  %v5943_v62 = vld [vmem:[#allocation27_spill] sm:$0xff] }
 0x1c9   :  { %1843 = vmatprep.subr.bf16.mxu0 %v4776_v63  ;;  %3829 = vmatprep.subr.bf16.mxu1 %v5937_v2  ;;  %v5944_v63 = vld [vmem:[#allocation25_spill] sm:$0xff] }
 0x1cc   :  { %1844 = vmatpush1.bf16.msra.mxu0 %v4790_v3  ;;  %3830 = vmatpush3.bf16.msra.mxu1 %v4826_v13  ;;  %v1670_v3 = vunpack.c.l.bf16 %v5945_v1 }
 0x1cd   :  { %1845 = vmatprep.subr.bf16.mxu0 %v4794_v4  ;;  %3831 = vmatprep.subr.bf16.mxu1 %v5937_v2 }
 0x1d0   :  { %1846 = vmatpush1.bf16.msra.mxu0 %v4804_v7  ;;  %3832 = vmatpush3.bf16.msra.mxu1 %v4840_v17 }
 0x1d1   :  { %1847 = vmatprep.subr.bf16.mxu0 %v4809_v9  ;;  %3833 = vmatprep.subr.bf16.mxu1 %v5937_v2  ;;  %v1679_v9 = vrot.slane %v5945_v1, 4 }
 0x1d3   :  { %v1681_v53 = vunpack.c.l.bf16 %v1679_v9  ;;  %v1691_v9 = vunpack.c.h.bf16 %v5065_v49  ;;  %v5182_v49 = vpop.permute.xlu1 %1701 }
 0x1d4   :  { %1848 = vmatpush1.bf16.msra.mxu0 %v5939_v57  ;;  %3834 = vmatpush3.bf16.msra.mxu1 %v5940_v58  ;;  %v1793_v57 = vunpack.c.l.bf16 %v5053_v51  ;;  %5946 = vst [vmem:[#allocation22_spill] sm:$0xff] %v5182_v49  ;;  %vm1703_vm13 = vcmp.eq.s32.totalorder %v5182_v49, 1 }
 0x1d5   :  { %1849 = vmatprep.subr.bf16.mxu0 %v5941_v59  ;;  %3835 = vmatprep.subr.bf16.mxu1 %v5937_v2 }
 0x1d8   :  { %1850 = vmatpush1.bf16.msra.mxu0 %v5942_v60  ;;  %3836 = vmatpush3.bf16.msra.mxu1 %v5943_v62 }
 0x1d9   :  { %1958 = vmatprep.subr.bf16.mxu0 %v5944_v63  ;;  %3841 = vmatprep.subr.bf16.mxu1 %v5937_v2  ;;  %v1802_v63 = vrot.slane %v5053_v51, 4 }
 0x25b   :  { %v1623_v4 = vpop.f32.mrf.mxu0  ;;  %v1664_v6 = vpop.f32.mrf.mxu1 }
 0x25c   :  { %v1671_v7 = vadd.f32 %v1670_v3, %v1623_v4  ;;  %v1689_v60 = vadd.f32 %v5062_v5, %v1664_v6 }
 0x25d   :  { %v1625_v10 = vpop.f32.mrf.mxu0  ;;  %v3799_v13 = vpop.f32.mrf.mxu1 }
 0x25e   :  { %v3459_v17 = vmul.f32 -1.442695, %v1671_v7  ;;  %v1682_v45 = vadd.f32 %v1681_v53, %v1625_v10 }
 0x25f   :  { %v1627_v47 = vpop.f32.mrf.mxu0  ;;  %v1667_v18 = vpop.f32.mrf.mxu1 }
 0x260   :  { %4231 = vpow2.f32 %v3459_v17  ;;  %v3460_v24 = vmul.f32 -1.442695, %v1682_v45  ;;  %v1804_v18 = vunpack.c.l.bf16 %v1802_v63 }
 0x261   :  { %v1628_v0 = vpop.f32.mrf.mxu0  ;;  %v3800_v61 = vpop.f32.mrf.mxu1 }
 0x262   :  { %4233 = vpow2.f32 %v3460_v24 }
 0x26d   :  { %v4232_v50 = vpop.eup %4231 }
 0x26e   :  { %v1675_v46 = vadd.f32 1.0, %v4232_v50 }
 0x26f   :  { %v4234_v16 = vpop.eup %4233 }
 0x270   :  { %4235 = vrcp.f32 %v1675_v46  ;;  %v1686_v11 = vadd.f32 1.0, %v4234_v16 }
 0x272   :  { %4237 = vrcp.f32 %v1686_v11 }
 0x27b   :  { %v1746_v58 = vpop.f32.mrf.mxu0  ;;  %v1787_v59 = vpop.f32.mrf.mxu1 }
 0x27c   :  { %v1794_v62 = vadd.f32 %v1793_v57, %v1746_v58 }
 0x27d   :  { %v4236_v1 = vpop.eup %4235  ;;  %v1748_v3 = vpop.f32.mrf.mxu0 }
 0x27e   :  { %v3819_v4 = vpop.f32.mrf.mxu1  ;;  %v1690_v7 = vmul.f32 %v4236_v1, %v1689_v60  ;;  %v3467_v10 = vmul.f32 -1.442695, %v1794_v62  ;;  %v1805_v6 = vadd.f32 %v1804_v18, %v1748_v3  ;;  %v5324_v18 = vld [vmem:[#allocation13 + $0xac] ss:$12 sps:$4 sm:$0xff]  }
 0x27f   :  { %v1750_v13 = vpop.f32.mrf.mxu0  ;;  %v4238_v51 = vpop.eup %4237  ;;  %v5301_v4 = vld [vmem:[#allocation10 + $0x38] ss:$12 sps:$4 sm:$0xff]   ;;  %5963 = vst [vmem:[#allocation43_spill] sm:$0xff] %v5324_v18 }
 0x280   :  { %v1790_v17 = vpop.f32.mrf.mxu1  ;;  %v1692_v47 = vadd.f32 %v1691_v9, %v1690_v7  ;;  %4239 = vpow2.f32 %v3467_v10  ;;  %v3468_v61 = vmul.f32 -1.442695, %v1805_v6  ;;  %v1694_v50 = vsub.f32 1.0, %v4238_v51  ;;  %5956 = vst [vmem:[#allocation36_spill] sm:$0xff] %v5301_v4  ;;  %v5304_v7 = vld [vmem:[#allocation10 + $0x1c] ss:$12 sps:$4 sm:$0xff]  }
 0x281   :  { %v1751_v53 = vpop.f32.mrf.mxu0  ;;  %v1696_v11 = vmul.f32 %v4238_v51, %v5076_v8  ;;  %5957 = vst [vmem:[#allocation37_spill] sm:$0xff] %v5304_v7  ;;  %v5308_v9 = vld [vmem:[#allocation10 + $0x18] ss:$12 sps:$4 sm:$0xff]   ;;  %v5311_v10 = vld [vmem:[#allocation10 + $0x20] ss:$12 sps:$4 sm:$0xff]  }
 0x282   :  { %v3820_v0 = vpop.f32.mrf.mxu1  ;;  %4241 = vtanh.f32 %v1692_v47  ;;  %5958 = vst [vmem:[#allocation38_spill] sm:$0xff] %v5308_v9  ;;  %5959 = vst [vmem:[#allocation39_spill] sm:$0xff] %v5311_v10  ;;  %v5314_v13 = vld [vmem:[#allocation10 + $0x4] ss:$12 sps:$4 sm:$0xff]   ;;  %v5318_v17 = vld [vmem:[#allocation10] ss:$12 sps:$4 sm:$0xff]  }
 0x283   :  { %4243 = vpow2.f32 %v3468_v61  ;;  %5960 = vst [vmem:[#allocation40_spill] sm:$0xff] %v5314_v13  ;;  %5961 = vst [vmem:[#allocation41_spill] sm:$0xff] %v5318_v17  ;;  %v5321_v47 = vld [vmem:[#allocation10 + $0x8] ss:$12 sps:$4 sm:$0xff]  }
 0x284   :  { %5962 = vst [vmem:[#allocation42_spill] sm:$0xff] %v5321_v47  ;;  %v5964_v53 = vld [vmem:[#allocation29_spill] sm:$0xff] }
 0x285   :  { %v1916_v0 = vunpack.c.l.bf16 %v5964_v53 }
 0x28d   :  { %v4240_v45 = vpop.eup %4239 }
 0x28e   :  { %v1798_v24 = vadd.f32 1.0, %v4240_v45  ;;  %v1925_v45 = vrot.slane %v5964_v53, 4 }
 0x28f   :  { %v4242_v46 = vpop.eup %4241 }
 0x290   :  { %4245 = vrcp.f32 %v1798_v24  ;;  %v1695_v16 = vmul.f32 %v4242_v46, %v1694_v50  ;;  %v4244_v63 = vpop.eup %4243 }
 0x291   :  { %v1809_v1 = vadd.f32 1.0, %v4244_v63 }
 0x292   :  { %v1697_v57 = vadd.f32 %v1696_v11, %v1695_v16 }
 0x293   :  { %4247 = vrcp.f32 %v1809_v1 }
 0x294   :  { %v1704_v58 = vsel %vm1703_vm13, %v1697_v57, 0.0  ;;  %v5191_v60 = vsel %vm1703_vm13, %v1697_v57, %v5076_v8  ;;  %v1812_v8 = vadd.f32 %v5082_v48, %v1787_v59  ;;  %v5298_v59 = vld [vmem:[#allocation10 + $0x30] ss:$12 sps:$4 sm:$0xff]   ;;  %v1927_v57 = vunpack.c.l.bf16 %v1925_v45 }
 0x295   :  { %1706 = vst [vmem:[#allocation14 + $0x8] sm:$0xff] %v1704_v58  ;;  %v1834_v62 = vpack.c.bf16 %v5191_v60, %v5191_v60  ;;  %5955 = vst [vmem:[#allocation35_spill] sm:$0xff] %v5298_v59 }
 0x297   :  { %1868 = vmatmul.mubr.bf16.vlgmr.msra.gmra.mxu0 %v1834_v62  ;;  %3838 = vmatmul.mubr.bf16.vlgmr.msra.gmra.mxu1 %v1834_v62 }
 0x298   :  { %1959 = vmatpush1.bf16.msra.mxu0 %v4845_v19  ;;  %3842 = vmatpush3.bf16.msra.mxu1 %v4873_v27 }
 0x299   :  { %1960 = vmatprep.subr.bf16.mxu0 %v4848_v20  ;;  %3843 = vmatprep.subr.bf16.mxu1 %v5937_v2  ;;  %v1814_v20 = vunpack.c.l.bf16 %v5092_v14  ;;  %v5291_v14 = vld [vmem:[#allocation10 + $0x50] ss:$12 sps:$4 sm:$0xff]  }
 0x29a   :  { %1990 = vmatprep.mubr.bf16.mxu0 %v5931_v56  ;;  %3857 = vmatprep.mubr.msk.bf16.mxu1 %vm4630_vm2, %v5937_v2  ;;  %5953 = vst [vmem:[#allocation33_spill] sm:$0xff] %v5291_v14 }
 0x29c   :  { %1961 = vmatpush1.bf16.msra.mxu0 %v4856_v22  ;;  %3844 = vmatpush3.bf16.msra.mxu1 %v4884_v30  ;;  %v5234_v30 = vpop.permute.xlu1 %1824 }
 0x29d   :  { %v4246_v3 = vpop.eup %4245  ;;  %1962 = vmatprep.subr.bf16.mxu0 %v4860_v23  ;;  %3845 = vmatprep.subr.bf16.mxu1 %v5937_v2  ;;  %5948 = vst [vmem:[#allocation23_spill] sm:$0xff] %v5234_v30  ;;  %vm1826_vm14 = vcmp.eq.s32.totalorder %v5234_v30, 1 }
 0x29e   :  { %v1813_v19 = vmul.f32 %v4246_v3, %v1812_v8 }
 0x2a0   :  { %v1815_v27 = vadd.f32 %v1814_v20, %v1813_v19  ;;  %1963 = vmatpush1.bf16.msra.mxu0 %v4867_v25  ;;  %3846 = vmatpush3.bf16.msra.mxu1 %v4896_v33  ;;  %v4248_v22 = vpop.eup %4247  ;;  %v5428_v49 = vpop.permute.xlu1 %2070 }
 0x2a1   :  { %1964 = vmatprep.subr.bf16.mxu0 %v4870_v26  ;;  %3847 = vmatprep.subr.bf16.mxu1 %v5937_v2  ;;  %v1817_v23 = vsub.f32 1.0, %v4248_v22  ;;  %v5227_v26 = vsel %vm1581_vm11, %v5122_v54, 0.0  ;;  %v5294_v54 = vld [vmem:[#allocation10 + $0x34] ss:$12 sps:$4 sm:$0xff]   ;;  %5968 = vst [vmem:[#allocation44_spill] sm:$0xff] %v5428_v49  ;;  %vm2072_vm0 = vcmp.eq.s32.totalorder %v5428_v49, 1 }
 0x2a2   :  { %4249 = vtanh.f32 %v1815_v27  ;;  %5947 = vst [vmem:[#allocation26_spill] sm:$0xff] %v5227_v26  ;;  %5954 = vst [vmem:[#allocation34_spill] sm:$0xff] %v5294_v54  ;;  %v5965_v27 = vld [vmem:[#allocation30_spill] sm:$0xff] }
 0x2a3   :  { %v2048_v53 = vrot.slane %v5965_v27, 4 }
 0x2a4   :  { %1965 = vmatpush1.bf16.msra.mxu0 %v4877_v28  ;;  %3848 = vmatpush3.bf16.msra.mxu1 %v4906_v36  ;;  %v5264_v36 = vld [vmem:[#allocation10 + $0x7c] ss:$12 sps:$4 sm:$0xff]  }
 0x2a5   :  { %1966 = vmatprep.subr.bf16.mxu0 %v4880_v29  ;;  %3849 = vmatprep.subr.bf16.mxu1 %v5937_v2  ;;  %v1819_v29 = vmul.f32 %v4248_v22, %v5227_v26  ;;  %v2039_v22 = vunpack.c.l.bf16 %v5965_v27 }
 0x2a8   :  { %1967 = vmatpush1.bf16.msra.mxu0 %v4890_v31  ;;  %3850 = vmatpush3.bf16.msra.mxu1 %v4916_v39  ;;  %v5274_v39 = vld [vmem:[#allocation10 + $0x64] ss:$12 sps:$4 sm:$0xff]  }
 0x2a9   :  { %1968 = vmatprep.subr.bf16.mxu0 %v4893_v32  ;;  %3851 = vmatprep.subr.bf16.mxu1 %v5937_v2 }
 0x2ac   :  { %1969 = vmatpush1.bf16.msra.mxu0 %v4900_v34  ;;  %3852 = vmatpush3.bf16.msra.mxu1 %v4924_v41  ;;  %v5252_v34 = vld [vmem:[#allocation10 + $0xb0] ss:$12 sps:$4 sm:$0xff]   ;;  %v5281_v41 = vld [vmem:[#allocation10 + $0x68] ss:$12 sps:$4 sm:$0xff]  }
 0x2ad   :  { %1970 = vmatprep.subr.bf16.mxu0 %v4903_v35  ;;  %3853 = vmatprep.subr.bf16.mxu1 %v5937_v2  ;;  %v5261_v35 = vld [vmem:[#allocation10 + $0x98] ss:$12 sps:$4 sm:$0xff]   ;;  %5950 = vst [vmem:[#allocation27_spill] sm:$0xff] %v5281_v41 }
 0x2af   :  { %v4250_v25 = vpop.eup %4249 }
 0x2b0   :  { %v1818_v28 = vmul.f32 %v4250_v25, %v1817_v23  ;;  %1971 = vmatpush1.bf16.msra.mxu0 %v4910_v37  ;;  %3854 = vmatpush3.bf16.msra.mxu1 %v4930_v42  ;;  %v5268_v37 = vld [vmem:[#allocation10 + $0x78] ss:$12 sps:$4 sm:$0xff]   ;;  %v5331_v23 = vld [vmem:[#allocation2 + $0x20] ss:$12 sps:$4 sm:$0xff]  }
 0x2b1   :  { %1972 = vmatprep.subr.bf16.mxu0 %v4913_v38  ;;  %3855 = vmatprep.subr.bf16.mxu1 %v5937_v2  ;;  %v5271_v38 = vld [vmem:[#allocation10 + $0x80] ss:$12 sps:$4 sm:$0xff]  }
 0x2b2   :  { %v5236_v31 = vadd.f32 %v1819_v29, %v1818_v28  ;;  %v5284_v42 = vld [vmem:[#allocation10 + $0x4c] ss:$12 sps:$4 sm:$0xff]  }
 0x2b3   :  { %5951 = vst [vmem:[#allocation25_spill] sm:$0xff] %v5284_v42 }
 0x2b4   :  { %5949 = vst [vmem:[#allocation24_spill] sm:$0xff] %v5236_v31  ;;  %v5243_v32 = vsel %vm1826_vm14, %v5236_v31, %v5227_v26  ;;  %1973 = vmatpush1.bf16.msra.mxu0 %v4920_v40  ;;  %3856 = vmatpush3.bf16.msra.mxu1 %v4938_v43  ;;  %v5278_v40 = vld [vmem:[#allocation10 + $0x60] ss:$12 sps:$4 sm:$0xff]   ;;  %v5288_v43 = vld [vmem:[#allocation10 + $0x48] ss:$12 sps:$4 sm:$0xff]  }
 0x2b5   :  { %v1957_v33 = vpack.c.bf16 %v5243_v32, %v5243_v32  ;;  %2081 = vmatprep.subr.bf16.mxu0 %v5128_v44  ;;  %3861 = vmatprep.subr.bf16.mxu1 %v5937_v2  ;;  %5952 = vst [vmem:[#allocation28_spill] sm:$0xff] %v5288_v43  ;;  %v5433_v31 = vld [vmem:[#allocation13] ss:$12 sps:$4 sm:$0xff]  }
 0x2b7   :  { %1991 = vmatmul.mubr.bf16.vlgmr.msra.gmra.mxu0 %v1957_v33  ;;  %3858 = vmatmul.mubr.bf16.vlgmr.msra.gmra.mxu1 %v1957_v33 }
 0x2b8   :  { %2082 = vmatpush1.bf16.msra.mxu0 %v5135_v15  ;;  %3862 = vmatpush3.bf16.msra.mxu1 %v5252_v34 }
 0x2b9   :  { %2083 = vmatprep.subr.bf16.mxu0 %v5139_v12  ;;  %3863 = vmatprep.subr.bf16.mxu1 %v5937_v2 }
 0x2ba   :  { %2113 = vmatprep.mubr.bf16.mxu0 %v5931_v56  ;;  %3877 = vmatprep.mubr.msk.bf16.mxu1 %vm4630_vm2, %v5937_v2 }
 0x2bc   :  { %2084 = vmatpush1.bf16.msra.mxu0 %v5146_v21  ;;  %3864 = vmatpush3.bf16.msra.mxu1 %v5261_v35 }
 0x2bd   :  { %2085 = vmatprep.subr.bf16.mxu0 %v5264_v36  ;;  %3865 = vmatprep.subr.bf16.mxu1 %v5937_v2 }
 0x2c0   :  { %2086 = vmatpush1.bf16.msra.mxu0 %v5268_v37  ;;  %3866 = vmatpush3.bf16.msra.mxu1 %v5271_v38 }
 0x2c1   :  { %2087 = vmatprep.subr.bf16.mxu0 %v5274_v39  ;;  %3867 = vmatprep.subr.bf16.mxu1 %v5937_v2 }
 0x2c4   :  { %2088 = vmatpush1.bf16.msra.mxu0 %v5278_v40  ;;  %3868 = vmatpush3.bf16.msra.mxu1 %v5281_v41 }
 0x2c5   :  { %2089 = vmatprep.subr.bf16.mxu0 %v5284_v42  ;;  %3869 = vmatprep.subr.bf16.mxu1 %v5937_v2 }
 0x2c8   :  { %2090 = vmatpush1.bf16.msra.mxu0 %v5288_v43  ;;  %3870 = vmatpush3.bf16.msra.mxu1 %v5291_v14 }
 0x2c9   :  { %2091 = vmatprep.subr.bf16.mxu0 %v5294_v54  ;;  %3871 = vmatprep.subr.bf16.mxu1 %v5937_v2 }
 0x2cc   :  { %2092 = vmatpush1.bf16.msra.mxu0 %v5298_v59  ;;  %3872 = vmatpush3.bf16.msra.mxu1 %v5301_v4 }
 0x2cd   :  { %2093 = vmatprep.subr.bf16.mxu0 %v5304_v7  ;;  %3873 = vmatprep.subr.bf16.mxu1 %v5937_v2 }
 0x2d0   :  { %2094 = vmatpush1.bf16.msra.mxu0 %v5308_v9  ;;  %3874 = vmatpush3.bf16.msra.mxu1 %v5311_v10 }
 0x2d1   :  { %2095 = vmatprep.subr.bf16.mxu0 %v5314_v13  ;;  %3875 = vmatprep.subr.bf16.mxu1 %v5937_v2 }
 0x2d4   :  { %2096 = vmatpush1.bf16.msra.mxu0 %v5318_v17  ;;  %3876 = vmatpush3.bf16.msra.mxu1 %v5321_v47 }
 0x2d5   :  { %2204 = vmatprep.subr.bf16.mxu0 %v5324_v18  ;;  %3881 = vmatprep.subr.bf16.mxu1 %v5937_v2 }
 0x357   :  { %v1869_v6 = vpop.f32.mrf.mxu0  ;;  %v1910_v61 = vpop.f32.mrf.mxu1 }
 0x358   :  { %v1917_v51 = vadd.f32 %v1916_v0, %v1869_v6  ;;  %v1935_v29 = vadd.f32 %v5062_v5, %v1910_v61 }
 0x359   :  { %v1871_v24 = vpop.f32.mrf.mxu0  ;;  %v3839_v50 = vpop.f32.mrf.mxu1 }
 0x35a   :  { %v3469_v46 = vmul.f32 -1.442695, %v1917_v51  ;;  %v1928_v63 = vadd.f32 %v1927_v57, %v1871_v24  ;;  %v1937_v24 = vunpack.c.l.bf16 %v5331_v23  ;;  %v2050_v57 = vunpack.c.l.bf16 %v2048_v53 }
 0x35b   :  { %v1873_v16 = vpop.f32.mrf.mxu0  ;;  %v1913_v11 = vpop.f32.mrf.mxu1 }
 0x35c   :  { %4251 = vpow2.f32 %v3469_v46  ;;  %v3470_v1 = vmul.f32 -1.442695, %v1928_v63 }
 0x35d   :  { %v1874_v58 = vpop.f32.mrf.mxu0  ;;  %v3840_v62 = vpop.f32.mrf.mxu1 }
 0x35e   :  { %4253 = vpow2.f32 %v3470_v1 }
 0x369   :  { %v4252_v8 = vpop.eup %4251 }
 0x36a   :  { %v1921_v3 = vadd.f32 1.0, %v4252_v8 }
 0x36b   :  { %v4254_v19 = vpop.eup %4253 }
 0x36c   :  { %4255 = vrcp.f32 %v1921_v3  ;;  %v1932_v20 = vadd.f32 1.0, %v4254_v19 }
 0x36e   :  { %4257 = vrcp.f32 %v1932_v20 }
 0x377   :  { %v1992_v25 = vpop.f32.mrf.mxu0  ;;  %v2033_v28 = vpop.f32.mrf.mxu1 }
 0x378   :  { %v2040_v33 = vadd.f32 %v2039_v22, %v1992_v25  ;;  %v5337_v25 = vpop.permute.xlu0 %1947 }
 0x379   :  { %v4256_v0 = vpop.eup %4255  ;;  %v1994_v6 = vpop.f32.mrf.mxu0  ;;  %5966 = vst [vmem:[#allocation29_spill] sm:$0xff] %v5337_v25  ;;  %vm1949_vm15 = vcmp.eq.s32.totalorder %v5337_v25, 1  ;;  %v5436_v25 = vld [vmem:[#allocation13 + $0x8] ss:$12 sps:$4 sm:$0xff]  }
 0x37a   :  { %v3859_v51 = vpop.f32.mrf.mxu1  ;;  %v1936_v45 = vmul.f32 %v4256_v0, %v1935_v29  ;;  %v3471_v50 = vmul.f32 -1.442695, %v2040_v33  ;;  %v2051_v61 = vadd.f32 %v2050_v57, %v1994_v6  ;;  %v5350_v6 = vld [vmem:[#allocation13 + $0xa8] ss:$12 sps:$4 sm:$0xff]  }
 0x37b   :  { %v1996_v46 = vpop.f32.mrf.mxu0  ;;  %v4258_v1 = vpop.eup %4257  ;;  %v5353_v51 = vld [vmem:[#allocation13 + $0xb0] ss:$12 sps:$4 sm:$0xff]  }
 0x37c   :  { %v2036_v16 = vpop.f32.mrf.mxu1  ;;  %v1938_v11 = vadd.f32 %v1937_v24, %v1936_v45  ;;  %4259 = vpow2.f32 %v3471_v50  ;;  %v3472_v63 = vmul.f32 -1.442695, %v2051_v61  ;;  %v1940_v19 = vsub.f32 1.0, %v4258_v1  ;;  %v5356_v45 = vld [vmem:[#allocation13 + $0x94] ss:$12 sps:$4 sm:$0xff]  }
 0x37d   :  { %v1997_v58 = vpop.f32.mrf.mxu0  ;;  %v1942_v20 = vmul.f32 %v4258_v1, %v5191_v60  ;;  %v5363_v24 = vld [vmem:[#allocation3 + $0x38] ss:$12 sps:$4 sm:$0xff]   ;;  %v2058_v50 = vadd.f32 %v5082_v48, %v2033_v28  ;;  %v5366_v46 = vld [vmem:[#allocation13 + $0x90] ss:$12 sps:$4 sm:$0xff]  }
 0x37e   :  { %v3860_v62 = vpop.f32.mrf.mxu1  ;;  %4261 = vtanh.f32 %v1938_v11  ;;  %v5369_v16 = vld [vmem:[#allocation13 + $0x98] ss:$12 sps:$4 sm:$0xff]   ;;  %v5372_v57 = vld [vmem:[#allocation13 + $0x7c] ss:$12 sps:$4 sm:$0xff]  }
 0x37f   :  { %4263 = vpow2.f32 %v3472_v63  ;;  %v2060_v62 = vunpack.c.h.bf16 %v5363_v24  ;;  %v5377_v61 = vld [vmem:[#allocation13 + $0x78] ss:$12 sps:$4 sm:$0xff]   ;;  %v5380_v63 = vld [vmem:[#allocation13 + $0x80] ss:$12 sps:$4 sm:$0xff]  }
 0x380   :  { %v5383_v1 = vld [vmem:[#allocation13 + $0x64] ss:$12 sps:$4 sm:$0xff]  }
 0x389   :  { %v4260_v8 = vpop.eup %4259 }
 0x38a   :  { %v2044_v3 = vadd.f32 1.0, %v4260_v8  ;;  %v5387_v8 = vld [vmem:[#allocation13 + $0x60] ss:$12 sps:$4 sm:$0xff]  }
 0x38b   :  { %v4262_v27 = vpop.eup %4261 }
 0x38c   :  { %4265 = vrcp.f32 %v2044_v3  ;;  %v1941_v22 = vmul.f32 %v4262_v27, %v1940_v19  ;;  %v4264_v0 = vpop.eup %4263  ;;  %v5390_v3 = vld [vmem:[#allocation13 + $0x68] ss:$12 sps:$4 sm:$0xff]   ;;  %v5393_v19 = vld [vmem:[#allocation13 + $0x4c] ss:$12 sps:$4 sm:$0xff]  }
 0x38d   :  { %v5397_v27 = vld [vmem:[#allocation13 + $0x48] ss:$12 sps:$4 sm:$0xff]  }
 0x38e   :  { %v5339_v29 = vadd.f32 %v1942_v20, %v1941_v22  ;;  %v5400_v22 = vld [vmem:[#allocation13 + $0x50] ss:$12 sps:$4 sm:$0xff]   ;;  %v5403_v20 = vld [vmem:[#allocation13 + $0x34] ss:$12 sps:$4 sm:$0xff]  }
 0x390   :  { %5967 = vst [vmem:[#allocation30_spill] sm:$0xff] %v5339_v29  ;;  %v5346_v33 = vsel %vm1949_vm15, %v5339_v29, %v5191_v60  ;;  %v2055_v60 = vadd.f32 1.0, %v4264_v0  ;;  %v5407_v0 = vld [vmem:[#allocation13 + $0x30] ss:$12 sps:$4 sm:$0xff]  }
 0x391   :  { %v2080_v53 = vpack.c.bf16 %v5346_v33, %v5346_v33 }
 0x392   :  { %4267 = vrcp.f32 %v2055_v60  ;;  %v5410_v60 = vld [vmem:[#allocation13 + $0x38] ss:$12 sps:$4 sm:$0xff]  }
 0x393   :  { %2114 = vmatmul.mubr.bf16.vlgmr.msra.gmra.mxu0 %v2080_v53  ;;  %3878 = vmatmul.mubr.bf16.vlgmr.msra.gmra.mxu1 %v2080_v53 }
 0x394   :  { %2205 = vmatpush1.bf16.msra.mxu0 %v5350_v6  ;;  %3882 = vmatpush3.bf16.msra.mxu1 %v5353_v51 }
 0x395   :  { %2206 = vmatprep.subr.bf16.mxu0 %v5356_v45  ;;  %3883 = vmatprep.subr.bf16.mxu1 %v5937_v2 }
 0x396   :  { %2236 = vmatprep.mubr.bf16.mxu0 %v5931_v56  ;;  %3897 = vmatprep.mubr.msk.bf16.mxu1 %vm4630_vm2, %v5937_v2 }
 0x398   :  { %2207 = vmatpush1.bf16.msra.mxu0 %v5366_v46  ;;  %3884 = vmatpush3.bf16.msra.mxu1 %v5369_v16 }
 0x399   :  { %v4266_v11 = vpop.eup %4265  ;;  %2208 = vmatprep.subr.bf16.mxu0 %v5372_v57  ;;  %3885 = vmatprep.subr.bf16.mxu1 %v5937_v2 }
 0x39a   :  { %v2059_v58 = vmul.f32 %v4266_v11, %v2058_v50  ;;  %v5413_v50 = vld [vmem:[#allocation13 + $0x1c] ss:$12 sps:$4 sm:$0xff]  }
 0x39c   :  { %v2061_v28 = vadd.f32 %v2060_v62, %v2059_v58  ;;  %2209 = vmatpush1.bf16.msra.mxu0 %v5377_v61  ;;  %3886 = vmatpush3.bf16.msra.mxu1 %v5380_v63  ;;  %v5417_v62 = vld [vmem:[#allocation13 + $0x18] ss:$12 sps:$4 sm:$0xff]  }
 0x39d   :  { %2210 = vmatprep.subr.bf16.mxu0 %v5383_v1  ;;  %3887 = vmatprep.subr.bf16.mxu1 %v5937_v2 }
 0x39e   :  { %4269 = vtanh.f32 %v2061_v28  ;;  %v5420_v28 = vld [vmem:[#allocation13 + $0x20] ss:$12 sps:$4 sm:$0xff]  }
 0x39f   :  { %v4268_v53 = vpop.eup %4267 }
 0x3a0   :  { %2211 = vmatpush1.bf16.msra.mxu0 %v5387_v8  ;;  %3888 = vmatpush3.bf16.msra.mxu1 %v5390_v3  ;;  %v2063_v11 = vsub.f32 1.0, %v4268_v53  ;;  %v2065_v26 = vmul.f32 %v4268_v53, %v5243_v32 }
 0x3a1   :  { %2212 = vmatprep.subr.bf16.mxu0 %v5393_v19  ;;  %3889 = vmatprep.subr.bf16.mxu1 %v5937_v2 }
 0x3a4   :  { %2213 = vmatpush1.bf16.msra.mxu0 %v5397_v27  ;;  %3890 = vmatpush3.bf16.msra.mxu1 %v5400_v22 }
 0x3a5   :  { %2214 = vmatprep.subr.bf16.mxu0 %v5403_v20  ;;  %3891 = vmatprep.subr.bf16.mxu1 %v5937_v2 }
 0x3a8   :  { %2215 = vmatpush1.bf16.msra.mxu0 %v5407_v0  ;;  %3892 = vmatpush3.bf16.msra.mxu1 %v5410_v60 }
 0x3a9   :  { %2216 = vmatprep.subr.bf16.mxu0 %v5413_v50  ;;  %3893 = vmatprep.subr.bf16.mxu1 %v5937_v2 }
 0x3ab   :  { %v4270_v58 = vpop.eup %4269 }
 0x3ac   :  { %2217 = vmatpush1.bf16.msra.mxu0 %v5417_v62  ;;  %3894 = vmatpush3.bf16.msra.mxu1 %v5420_v28  ;;  %v2064_v55 = vmul.f32 %v4270_v58, %v2063_v11 }
 0x3ad   :  { %2218 = vmatprep.subr.bf16.mxu0 %v5424_v52  ;;  %3895 = vmatprep.subr.bf16.mxu1 %v5937_v2 }
 0x3ae   :  { %v5430_v30 = vadd.f32 %v2065_v26, %v2064_v55  ;;  %v2078_v26 = vld [vmem:[#allocation2 + $0x24] sm:$0xff] }
 0x3af   :  { %v2171_v29 = vrot.slane %v2078_v26, 4 }
 0x3b0   :  { %5969 = vst [vmem:[#allocation45_spill] sm:$0xff] %v5430_v30  ;;  %2219 = vmatpush1.bf16.msra.mxu0 %v5433_v31  ;;  %3896 = vmatpush3.bf16.msra.mxu1 %v5436_v25  ;;  %v5443_v53 = vsel %vm2072_vm0, %v5430_v30, %v5243_v32  ;;  %v2162_v32 = vunpack.c.l.bf16 %v2078_v26 }
 0x3b1   :  { %v2203_v55 = vpack.c.bf16 %v5443_v53, %v5443_v53  ;;  %2326 = vmatprep.subr.bf16.mxu0 %v5128_v44  ;;  %3901 = vmatprep.subr.bf16.mxu1 %v5937_v2 }
 0x3b3   :  { %2237 = vmatmul.mubr.bf16.vlgmr.msra.gmra.mxu0 %v2203_v55  ;;  %3898 = vmatmul.mubr.bf16.vlgmr.msra.gmra.mxu1 %v2203_v55 }
 0x3b4   :  { %2327 = vmatpush1.bf16.msra.mxu0 %v5135_v15  ;;  %3902 = vmatpush3.bf16.msra.mxu1 %v5252_v34 }
 0x3b5   :  { %2328 = vmatprep.subr.bf16.mxu0 %v5139_v12  ;;  %3903 = vmatprep.subr.bf16.mxu1 %v5937_v2 }
 0x3b6   :  { %2358 = vmatprep.mubr.bf16.mxu0 %v5931_v56  ;;  %3917 = vmatprep.mubr.msk.bf16.mxu1 %vm4630_vm2, %v5937_v2 }
 0x3b8   :  { %2329 = vmatpush1.bf16.msra.mxu0 %v5146_v21  ;;  %3904 = vmatpush3.bf16.msra.mxu1 %v5261_v35 }
 0x3b9   :  { %2330 = vmatprep.subr.bf16.mxu0 %v5264_v36  ;;  %3905 = vmatprep.subr.bf16.mxu1 %v5937_v2 }
 0x3bc   :  { %2331 = vmatpush1.bf16.msra.mxu0 %v5268_v37  ;;  %3906 = vmatpush3.bf16.msra.mxu1 %v5271_v38 }
 0x3bd   :  { %2332 = vmatprep.subr.bf16.mxu0 %v5274_v39  ;;  %3907 = vmatprep.subr.bf16.mxu1 %v5937_v2 }
 0x3c0   :  { %2333 = vmatpush1.bf16.msra.mxu0 %v5278_v40  ;;  %3908 = vmatpush3.bf16.msra.mxu1 %v5281_v41 }
 0x3c1   :  { %2334 = vmatprep.subr.bf16.mxu0 %v5284_v42  ;;  %3909 = vmatprep.subr.bf16.mxu1 %v5937_v2 }
 0x3c4   :  { %2335 = vmatpush1.bf16.msra.mxu0 %v5288_v43  ;;  %3910 = vmatpush3.bf16.msra.mxu1 %v5291_v14  ;;  %v2201_v43 = vld [vmem:[#allocation3 + $0x30] sm:$0xff] }
 0x3c5   :  { %2336 = vmatprep.subr.bf16.mxu0 %v5294_v54  ;;  %3911 = vmatprep.subr.bf16.mxu1 %v5937_v2 }
 0x3c8   :  { %2337 = vmatpush1.bf16.msra.mxu0 %v5298_v59  ;;  %3912 = vmatpush3.bf16.msra.mxu1 %v5301_v4 }
 0x3c9   :  { %2338 = vmatprep.subr.bf16.mxu0 %v5304_v7  ;;  %3913 = vmatprep.subr.bf16.mxu1 %v5937_v2  ;;  %v2173_v7 = vunpack.c.l.bf16 %v2171_v29 }
 0x3cc   :  { %2339 = vmatpush1.bf16.msra.mxu0 %v5308_v9  ;;  %3914 = vmatpush3.bf16.msra.mxu1 %v5311_v10 }
 0x3cd   :  { %2340 = vmatprep.subr.bf16.mxu0 %v5314_v13  ;;  %3915 = vmatprep.subr.bf16.mxu1 %v5937_v2 }
 0x3d0   :  { %2341 = vmatpush1.bf16.msra.mxu0 %v5318_v17  ;;  %3916 = vmatpush3.bf16.msra.mxu1 %v5321_v47 }
 0x3d1   :  { %2443 = vmatprep.subr.bf16.mxu0 %v5324_v18  ;;  %3921 = vmatprep.subr.bf16.mxu1 %v5937_v2 }
 0x453   :  { %v2115_v11 = vpop.f32.mrf.mxu0  ;;  %v2156_v58 = vpop.f32.mrf.mxu1 }
 0x454   :  { %v2163_v55 = vadd.f32 %v2162_v32, %v2115_v11  ;;  %v2285_v32 = vunpack.c.l.bf16 %v2201_v43 }
 0x455   :  { %v2117_v49 = vpop.f32.mrf.mxu0  ;;  %v3879_v30 = vpop.f32.mrf.mxu1 }
 0x456   :  { %v3473_v10 = vmul.f32 -1.442695, %v2163_v55  ;;  %v2174_v47 = vadd.f32 %v2173_v7, %v2117_v49  ;;  %v2181_v30 = vadd.f32 %v5062_v5, %v2156_v58  ;;  %v2183_v49 = vunpack.c.h.bf16 %v5331_v23 }
 0x457   :  { %v2119_v13 = vpop.f32.mrf.mxu0  ;;  %v2159_v9 = vpop.f32.mrf.mxu1 }
 0x458   :  { %4271 = vpow2.f32 %v3473_v10  ;;  %v3474_v59 = vmul.f32 -1.442695, %v2174_v47  ;;  %v2294_v9 = vrot.slane %v2201_v43, 4 }
 0x459   :  { %v2120_v17 = vpop.f32.mrf.mxu0  ;;  %v3880_v4 = vpop.f32.mrf.mxu1 }
 0x45a   :  { %4273 = vpow2.f32 %v3474_v59 }
 0x465   :  { %v4272_v18 = vpop.eup %4271 }
 0x466   :  { %v2167_v54 = vadd.f32 1.0, %v4272_v18 }
 0x467   :  { %v4274_v14 = vpop.eup %4273 }
 0x468   :  { %4275 = vrcp.f32 %v2167_v54  ;;  %v2178_v42 = vadd.f32 1.0, %v4274_v14  ;;  %v2296_v14 = vunpack.c.l.bf16 %v2294_v9 }
 0x46a   :  { %4277 = vrcp.f32 %v2178_v42 }
 0x473   :  { %v2238_v26 = vpop.f32.mrf.mxu0  ;;  %v2279_v11 = vpop.f32.mrf.mxu1 }
 0x474   :  { %v2286_v13 = vadd.f32 %v2285_v32, %v2238_v26 }
 0x475   :  { %v4276_v10 = vpop.eup %4275  ;;  %v2240_v29 = vpop.f32.mrf.mxu0 }
 0x476   :  { %v3899_v17 = vpop.f32.mrf.mxu1  ;;  %v2182_v4 = vmul.f32 %v4276_v10, %v2181_v30  ;;  %v3475_v59 = vmul.f32 -1.442695, %v2286_v13  ;;  %v2297_v41 = vadd.f32 %v2296_v14, %v2240_v29  ;;  %v5486_v10 = vpop.permute.xlu0 %2193 }
 0x477   :  { %v2242_v7 = vpop.f32.mrf.mxu0  ;;  %v4278_v43 = vpop.eup %4277  ;;  %vm2195_vm1 = vcmp.eq.s32.totalorder %v5486_v10, 1  ;;  %v5671_v10 = vld [vmem:[#allocation10 + $0x94] ss:$12 sps:$4 sm:$0xff]  }
 0x478   :  { %v2282_v54 = vpop.f32.mrf.mxu1  ;;  %v2184_v47 = vadd.f32 %v2183_v49, %v2182_v4  ;;  %4279 = vpow2.f32 %v3475_v59  ;;  %v3476_v5 = vmul.f32 -1.442695, %v2297_v41  ;;  %v2186_v26 = vsub.f32 1.0, %v4278_v43 }
 0x479   :  { %v2243_v18 = vpop.f32.mrf.mxu0  ;;  %v2188_v23 = vmul.f32 %v4278_v43, %v5346_v33  ;;  %v2306_v59 = vunpack.c.l.bf16 %v5363_v24  ;;  %v5529_v54 = vpop.permute.xlu1 %2316  ;;  %v5975_v43 = vld [vmem:[#allocation35_spill] sm:$0xff] }
 0x47a   :  { %v3900_v55 = vpop.f32.mrf.mxu1  ;;  %4281 = vtanh.f32 %v2184_v47  ;;  %vm2318_vm3 = vcmp.eq.s32.totalorder %v5529_v54, 1  ;;  %v5620_v54 = vld [vmem:[%s5860_s9] ss:$0 sm:$0xff]  ;;  %s4631_s9 = smov [#allocation15]  }
 0x47b   :  { %4283 = vpow2.f32 %v3476_v5  ;;  %s3297_s12 = sshll.u32 %s4631_s9, 4  ;;  %s3298_s12 = int_to_ptr.vmem [resolvable:$true] %s3297_s12 }
 0x47c   :  { %s4569_s15 = scalar_lea.vmem %s3298_s12, 256  ;;  %p4574_p12 = scmp.lt.s32.totalorder %s3298_s12, %s3298_s12 }
 0x47d   :  { %p4570_p11 = scmp.ne.s32.totalorder %s3298_s12, %s4569_s15  ;;  %p4575_p13 = scmp.lt.s32.totalorder %s4569_s15, %s4569_s15 }
 0x47f   :  { %p4576_p0 = por %p4575_p13, %p4574_p12 }
 0x481   :  { %p4577_p1 = pnand %p4576_p0, %p4570_p11 }
 0x485   :  { %v4280_v58 = vpop.eup %4279 }
 0x486   :  { %v2290_v32 = vadd.f32 1.0, %v4280_v58  ;;  %v5976_v58 = vld [vmem:[#allocation36_spill] sm:$0xff] }
 0x487   :  { %v4282_v30 = vpop.eup %4281 }
 0x488   :  { %4285 = vrcp.f32 %v2290_v32  ;;  %v2187_v42 = vmul.f32 %v4282_v30, %v2186_v26  ;;  %v4284_v29 = vpop.eup %4283  ;;  %v5977_v32 = vld [vmem:[#allocation37_spill] sm:$0xff]  ;;  %v5978_v26 = vld [vmem:[#allocation38_spill] sm:$0xff]  ;;  %v5979_v30 = vld [vmem:[#allocation39_spill] sm:$0xff] }
 0x489   :  { %v2301_v17 = vadd.f32 1.0, %v4284_v29  ;;  %v5983_v29 = vld [vmem:[#allocation43_spill] sm:$0xff] }
 0x48a   :  { %v5489_v13 = vadd.f32 %v2188_v23, %v2187_v42  ;;  %v5980_v42 = vld [vmem:[#allocation40_spill] sm:$0xff]  ;;  %v5981_v23 = vld [vmem:[#allocation41_spill] sm:$0xff] }
 0x48b   :  { %4287 = vrcp.f32 %v2301_v17  ;;  %v2323_v17 = vld [vmem:[#allocation2 + $0x30] sm:$0xff] }
 0x48c   :  { %v5496_v41 = vsel %vm2195_vm1, %v5489_v13, %v5346_v33  ;;  %v2304_v33 = vadd.f32 %v5082_v48, %v2279_v11 }
 0x48d   :  { %v2325_v9 = vpack.c.bf16 %v5496_v41, %v5496_v41 }
 0x48f   :  { %2359 = vmatmul.mubr.bf16.vlgmr.msra.gmra.mxu0 %v2325_v9  ;;  %3918 = vmatmul.mubr.bf16.vlgmr.msra.gmra.mxu1 %v2325_v9  ;;  %v5982_v9 = vld [vmem:[#allocation42_spill] sm:$0xff] }
 0x490   :  { %2444 = vmatpush1.bf16.msra.mxu0 %v5350_v6  ;;  %3922 = vmatpush3.bf16.msra.mxu1 %v5353_v51 }
 0x491   :  { %2445 = vmatprep.subr.bf16.mxu0 %v5356_v45  ;;  %3923 = vmatprep.subr.bf16.mxu1 %v5937_v2 }
 0x492   :  { %2475 = vmatprep.mubr.bf16.mxu0 %v5931_v56  ;;  %3937 = vmatprep.mubr.msk.bf16.mxu1 %vm4630_vm2, %v5937_v2 }
 0x494   :  { %2446 = vmatpush1.bf16.msra.mxu0 %v5366_v46  ;;  %3924 = vmatpush3.bf16.msra.mxu1 %v5369_v16 }
 0x495   :  { %v4286_v4 = vpop.eup %4285  ;;  %2447 = vmatprep.subr.bf16.mxu0 %v5372_v57  ;;  %3925 = vmatprep.subr.bf16.mxu1 %v5937_v2 }
 0x496   :  { %v2305_v49 = vmul.f32 %v4286_v4, %v2304_v33  ;;  %v2407_v33 = vunpack.c.l.bf16 %v2323_v17 }
 0x498   :  { %v2307_v7 = vadd.f32 %v2306_v59, %v2305_v49  ;;  %2448 = vmatpush1.bf16.msra.mxu0 %v5377_v61  ;;  %3926 = vmatpush3.bf16.msra.mxu1 %v5380_v63  ;;  %v4288_v48 = vpop.eup %4287 }
 0x499   :  { %2449 = vmatprep.subr.bf16.mxu0 %v5383_v1  ;;  %3927 = vmatprep.subr.bf16.mxu1 %v5937_v2  ;;  %v2309_v24 = vsub.f32 1.0, %v4288_v48  ;;  %v2311_v14 = vmul.f32 %v4288_v48, %v5443_v53 }
 0x49a   :  { %4289 = vtanh.f32 %v2307_v7  ;;  %v2416_v7 = vrot.slane %v2323_v17, 4  ;;  %v5586_v17 = vld [vmem:[#allocation2 + $0x38] ss:$12 sps:$4 sm:$0xff]  }
 0x49c   :  { %2450 = vmatpush1.bf16.msra.mxu0 %v5387_v8  ;;  %3928 = vmatpush3.bf16.msra.mxu1 %v5390_v3 }
 0x49d   :  { %2451 = vmatprep.subr.bf16.mxu0 %v5393_v19  ;;  %3929 = vmatprep.subr.bf16.mxu1 %v5937_v2 }
 0x4a0   :  { %2452 = vmatpush1.bf16.msra.mxu0 %v5397_v27  ;;  %3930 = vmatpush3.bf16.msra.mxu1 %v5400_v22 }
 0x4a1   :  { %2453 = vmatprep.subr.bf16.mxu0 %v5403_v20  ;;  %3931 = vmatprep.subr.bf16.mxu1 %v5937_v2 }
 0x4a4   :  { %2454 = vmatpush1.bf16.msra.mxu0 %v5407_v0  ;;  %3932 = vmatpush3.bf16.msra.mxu1 %v5410_v60 }
 0x4a5   :  { %2455 = vmatprep.subr.bf16.mxu0 %v5413_v50  ;;  %3933 = vmatprep.subr.bf16.mxu1 %v5937_v2 }
 0x4a7   :  { %v4290_v11 = vpop.eup %4289 }
 0x4a8   :  { %2456 = vmatpush1.bf16.msra.mxu0 %v5417_v62  ;;  %3934 = vmatpush3.bf16.msra.mxu1 %v5420_v28  ;;  %v2310_v47 = vmul.f32 %v4290_v11, %v2309_v24 }
 0x4a9   :  { %2457 = vmatprep.subr.bf16.mxu0 %v5424_v52  ;;  %3935 = vmatprep.subr.bf16.mxu1 %v5937_v2 }
 0x4aa   :  { %v5536_v18 = vadd.f32 %v2311_v14, %v2310_v47 }
 0x4ac   :  { %2458 = vmatpush1.bf16.msra.mxu0 %v5433_v31  ;;  %3936 = vmatpush3.bf16.msra.mxu1 %v5436_v25  ;;  %v5545_v55 = vsel %vm2318_vm3, %v5536_v18, %v5443_v53  ;;  %v5974_v53 = vld [vmem:[#allocation34_spill] sm:$0xff] }
 0x4ad   :  { %v2442_v5 = vpack.c.bf16 %v5545_v55, %v5545_v55  ;;  %2561 = vmatprep.subr.bf16.mxu0 %v5128_v44  ;;  %3941 = vmatprep.subr.bf16.mxu1 %v5937_v2  ;;  %v5970_v44 = vld [vmem:[#allocation27_spill] sm:$0xff] }
 0x4af   :  { %2476 = vmatmul.mubr.bf16.vlgmr.msra.gmra.mxu0 %v2442_v5  ;;  %3938 = vmatmul.mubr.bf16.vlgmr.msra.gmra.mxu1 %v2442_v5  ;;  %v2418_v5 = vunpack.c.l.bf16 %v2416_v7  ;;  %v5591_v7 = vld [vmem:[%s5856_s5] ss:$0 sm:$0xff] }
 0x4b0   :  { %2562 = vmatpush1.bf16.msra.mxu0 %v5135_v15  ;;  %3942 = vmatpush3.bf16.msra.mxu1 %v5252_v34  ;;  %v5971_v15 = vld [vmem:[#allocation25_spill] sm:$0xff] }
 0x4b1   :  { %2563 = vmatprep.subr.bf16.mxu0 %v5139_v12  ;;  %3943 = vmatprep.subr.bf16.mxu1 %v5937_v2  ;;  %v5972_v12 = vld [vmem:[#allocation28_spill] sm:$0xff] }
 0x4b2   :  { %2593 = vmatprep.mubr.bf16.mxu0 %v5931_v56  ;;  %3957 = vmatprep.mubr.msk.bf16.mxu1 %vm4630_vm2, %v5937_v2 }
 0x4b4   :  { %2564 = vmatpush1.bf16.msra.mxu0 %v5146_v21  ;;  %3944 = vmatpush3.bf16.msra.mxu1 %v5261_v35  ;;  %v5973_v21 = vld [vmem:[#allocation33_spill] sm:$0xff] }
 0x4b5   :  { %2565 = vmatprep.subr.bf16.mxu0 %v5264_v36  ;;  %3945 = vmatprep.subr.bf16.mxu1 %v5937_v2 }
 0x4b8   :  { %2566 = vmatpush1.bf16.msra.mxu0 %v5268_v37  ;;  %3946 = vmatpush3.bf16.msra.mxu1 %v5271_v38 }
 0x4b9   :  { %2567 = vmatprep.subr.bf16.mxu0 %v5274_v39  ;;  %3947 = vmatprep.subr.bf16.mxu1 %v5937_v2 }
 0x4bc   :  { %2568 = vmatpush1.bf16.msra.mxu0 %v5278_v40  ;;  %3948 = vmatpush3.bf16.msra.mxu1 %v5970_v44 }
 0x4bd   :  { %2569 = vmatprep.subr.bf16.mxu0 %v5971_v15  ;;  %3949 = vmatprep.subr.bf16.mxu1 %v5937_v2 }
 0x4c0   :  { %2570 = vmatpush1.bf16.msra.mxu0 %v5972_v12  ;;  %3950 = vmatpush3.bf16.msra.mxu1 %v5973_v21 }
 0x4c1   :  { %2571 = vmatprep.subr.bf16.mxu0 %v5974_v53  ;;  %3951 = vmatprep.subr.bf16.mxu1 %v5937_v2 }
 0x4c4   :  { %2572 = vmatpush1.bf16.msra.mxu0 %v5975_v43  ;;  %3952 = vmatpush3.bf16.msra.mxu1 %v5976_v58  ;;  %v2440_v58 = vld [vmem:[#allocation3 + $0x24] sm:$0xff] }
 0x4c5   :  { %2573 = vmatprep.subr.bf16.mxu0 %v5977_v32  ;;  %3953 = vmatprep.subr.bf16.mxu1 %v5937_v2 }
 0x4c8   :  { %2574 = vmatpush1.bf16.msra.mxu0 %v5978_v26  ;;  %3954 = vmatpush3.bf16.msra.mxu1 %v5979_v30 }
 0x4c9   :  { %2575 = vmatprep.subr.bf16.mxu0 %v5980_v42  ;;  %3955 = vmatprep.subr.bf16.mxu1 %v5937_v2 }
 0x4cc   :  { %2576 = vmatpush1.bf16.msra.mxu0 %v5981_v23  ;;  %3956 = vmatpush3.bf16.msra.mxu1 %v5982_v9 }
 0x4cd   :  { %2678 = vmatprep.subr.bf16.mxu0 %v5983_v29  ;;  %3961 = vmatprep.subr.bf16.mxu1 %v5937_v2 }
 0x54f   :  { %v2360_v4 = vpop.f32.mrf.mxu0  ;;  %v2401_v49 = vpop.f32.mrf.mxu1 }
 0x550   :  { %v2408_v59 = vadd.f32 %v2407_v33, %v2360_v4  ;;  %v2524_v33 = vunpack.c.l.bf16 %v2440_v58 }
 0x551   :  { %v2362_v48 = vpop.f32.mrf.mxu0  ;;  %v3919_v24 = vpop.f32.mrf.mxu1 }
 0x552   :  { %v3477_v11 = vmul.f32 -1.442695, %v2408_v59  ;;  %v2419_v9 = vadd.f32 %v2418_v5, %v2362_v48 }
 0x553   :  { %v2364_v47 = vpop.f32.mrf.mxu0  ;;  %v2404_v14 = vpop.f32.mrf.mxu1 }
 0x554   :  { %4291 = vpow2.f32 %v3477_v11  ;;  %v3478_v30 = vmul.f32 -1.442695, %v2419_v9 }
 0x555   :  { %v2365_v23 = vpop.f32.mrf.mxu0  ;;  %v3920_v42 = vpop.f32.mrf.mxu1 }
 0x556   :  { %4293 = vpow2.f32 %v3478_v30  ;;  %v2426_v42 = vadd.f32 %v5591_v7, %v2401_v49  ;;  %v2533_v30 = vrot.slane %v2440_v58, 4 }
 0x558   :  { %v2535_v5 = vunpack.c.l.bf16 %v2533_v30  ;;  %v2319_v30 = vsel %vm2318_vm3, %v5536_v18, 0.0 }
 0x561   :  { %v4292_v29 = vpop.eup %4291 }
 0x562   :  { %v2412_v26 = vadd.f32 1.0, %v4292_v29 }
 0x563   :  { %v4294_v32 = vpop.eup %4293 }
 0x564   :  { %4295 = vrcp.f32 %v2412_v26  ;;  %v2423_v43 = vadd.f32 1.0, %v4294_v32  ;;  %v2428_v32 = vunpack.c.l.bf16 %v5586_v17 }
 0x566   :  { %4297 = vrcp.f32 %v2423_v43 }
 0x56f   :  { %v2477_v4 = vpop.f32.mrf.mxu0  ;;  %v2518_v59 = vpop.f32.mrf.mxu1 }
 0x570   :  { %v2525_v23 = vadd.f32 %v2524_v33, %v2477_v4 }
 0x571   :  { %v4296_v9 = vpop.eup %4295  ;;  %v2479_v29 = vpop.f32.mrf.mxu0 }
 0x572   :  { %v3939_v26 = vpop.f32.mrf.mxu1  ;;  %v2427_v48 = vmul.f32 %v4296_v9, %v2426_v42  ;;  %v3479_v24 = vmul.f32 -1.442695, %v2525_v23  ;;  %v2536_v12 = vadd.f32 %v2535_v5, %v2479_v29 }
 0x573   :  { %v2481_v11 = vpop.f32.mrf.mxu0  ;;  %v4298_v58 = vpop.eup %4297 }
 0x574   :  { %v2521_v47 = vpop.f32.mrf.mxu1  ;;  %v2429_v14 = vadd.f32 %v2428_v32, %v2427_v48  ;;  %4299 = vpow2.f32 %v3479_v24  ;;  %v3480_v49 = vmul.f32 -1.442695, %v2536_v12  ;;  %v2431_v26 = vsub.f32 1.0, %v4298_v58 }
 0x575   :  { %v2482_v53 = vpop.f32.mrf.mxu0  ;;  %v2433_v43 = vmul.f32 %v4298_v58, %v5496_v41  ;;  %v2543_v32 = vadd.f32 %v5620_v54, %v2518_v59 }
 0x576   :  { %v3940_v21 = vpop.f32.mrf.mxu1  ;;  %4301 = vtanh.f32 %v2429_v14 }
 0x577   :  { %4303 = vpow2.f32 %v3480_v49 }
 0x581   :  { %v4300_v33 = vpop.eup %4299 }
 0x582   :  { %v2529_v4 = vadd.f32 1.0, %v4300_v33 }
 0x583   :  { %v4302_v42 = vpop.eup %4301 }
 0x584   :  { %4305 = vrcp.f32 %v2529_v4  ;;  %v2432_v9 = vmul.f32 %v4302_v42, %v2431_v26  ;;  %v4304_v48 = vpop.eup %4303  ;;  %v2196_v26 = vsel %vm2195_vm1, %v5489_v13, 0.0  ;;  %v5667_v13 = vld [vmem:[#allocation10 + $0xa8] ss:$12 sps:$4 sm:$0xff]  }
 0x585   :  { %v2540_v18 = vadd.f32 1.0, %v4304_v48  ;;  %v2558_v48 = vld [vmem:[#allocation2 + $0x3c] sm:$0xff] }
 0x586   :  { %v2434_v23 = vadd.f32 %v2433_v43, %v2432_v9 }
 0x587   :  { %4307 = vrcp.f32 %v2540_v18  ;;  %v2642_v18 = vunpack.c.l.bf16 %v2558_v48 }
 0x588   :  { %v2435_v21 = vsel %vm2318_vm3, %v2434_v23, 0.0  ;;  %v5604_v12 = vsel %vm2318_vm3, %v2434_v23, %v5496_v41  ;;  %v5615_v41 = vld [vmem:[#allocation3 + $0x20] ss:$12 sps:$4 sm:$0xff]  }
 0x589   :  { %v2560_v53 = vpack.c.bf16 %v5604_v12, %v5604_v12  ;;  %v3272_v29 = vadd.f32 %v2435_v21, %v2319_v30  ;;  %v2545_v47 = vunpack.c.h.bf16 %v5615_v41  ;;  %v5663_v30 = vld [vmem:[#allocation10 + $0xac] ss:$12 sps:$4 sm:$0xff]  }
 0x58a   :  { %v5993_v21 = vld [vmem:[#allocation41_spill] sm:$0xff] }
 0x58b   :  { %2594 = vmatmul.mubr.bf16.vlgmr.msra.gmra.mxu0 %v2560_v53  ;;  %3276 = vst [vmem:[#allocation14 + $0x20] sm:$0xff] %v3272_v29  ;;  %3958 = vmatmul.mubr.bf16.vlgmr.msra.gmra.mxu1 %v2560_v53  ;;  %v5994_v53 = vld [vmem:[#allocation42_spill] sm:$0xff]  ;;  %v5995_v29 = vld [vmem:[#allocation43_spill] sm:$0xff] }
 0x58c   :  { %2679 = vmatpush1.bf16.msra.mxu0 %v5350_v6  ;;  %3962 = vmatpush3.bf16.msra.mxu1 %v5353_v51 }
 0x58d   :  { %2680 = vmatprep.subr.bf16.mxu0 %v5356_v45  ;;  %3963 = vmatprep.subr.bf16.mxu1 %v5937_v2 }
 0x58e   :  { %2710 = vmatprep.mubr.bf16.mxu0 %v5931_v56  ;;  %3977 = vmatprep.mubr.msk.bf16.mxu1 %vm4630_vm2, %v5937_v2 }
 0x590   :  { %2681 = vmatpush1.bf16.msra.mxu0 %v5366_v46  ;;  %3964 = vmatpush3.bf16.msra.mxu1 %v5369_v16 }
 0x591   :  { %v4306_v24 = vpop.eup %4305  ;;  %2682 = vmatprep.subr.bf16.mxu0 %v5372_v57  ;;  %3965 = vmatprep.subr.bf16.mxu1 %v5937_v2 }
 0x592   :  { %v2544_v11 = vmul.f32 %v4306_v24, %v2543_v32 }
 0x594   :  { %v2546_v14 = vadd.f32 %v2545_v47, %v2544_v11  ;;  %2683 = vmatpush1.bf16.msra.mxu0 %v5377_v61  ;;  %3966 = vmatpush3.bf16.msra.mxu1 %v5380_v63  ;;  %v4308_v59 = vpop.eup %4307  ;;  %v2651_v47 = vrot.slane %v2558_v48, 4 }
 0x595   :  { %2684 = vmatprep.subr.bf16.mxu0 %v5383_v1  ;;  %3967 = vmatprep.subr.bf16.mxu1 %v5937_v2  ;;  %v2548_v5 = vsub.f32 1.0, %v4308_v59  ;;  %v2550_v33 = vmul.f32 %v4308_v59, %v5545_v55 }
 0x596   :  { %4309 = vtanh.f32 %v2546_v14 }
 0x598   :  { %2685 = vmatpush1.bf16.msra.mxu0 %v5387_v8  ;;  %3968 = vmatpush3.bf16.msra.mxu1 %v5390_v3 }
 0x599   :  { %2686 = vmatprep.subr.bf16.mxu0 %v5393_v19  ;;  %3969 = vmatprep.subr.bf16.mxu1 %v5937_v2 }
 0x59c   :  { %2687 = vmatpush1.bf16.msra.mxu0 %v5397_v27  ;;  %3970 = vmatpush3.bf16.msra.mxu1 %v5400_v22 }
 0x59d   :  { %2688 = vmatprep.subr.bf16.mxu0 %v5403_v20  ;;  %3971 = vmatprep.subr.bf16.mxu1 %v5937_v2 }
 0x5a0   :  { %2689 = vmatpush1.bf16.msra.mxu0 %v5407_v0  ;;  %3972 = vmatpush3.bf16.msra.mxu1 %v5410_v60 }
 0x5a1   :  { %2690 = vmatprep.subr.bf16.mxu0 %v5413_v50  ;;  %3973 = vmatprep.subr.bf16.mxu1 %v5937_v2 }
 0x5a3   :  { %v4310_v49 = vpop.eup %4309 }
 0x5a4   :  { %2691 = vmatpush1.bf16.msra.mxu0 %v5417_v62  ;;  %3974 = vmatpush3.bf16.msra.mxu1 %v5420_v28  ;;  %v2549_v58 = vmul.f32 %v4310_v49, %v2548_v5 }
 0x5a5   :  { %2692 = vmatprep.subr.bf16.mxu0 %v5424_v52  ;;  %3975 = vmatprep.subr.bf16.mxu1 %v5937_v2 }
 0x5a6   :  { %v2551_v4 = vadd.f32 %v2550_v33, %v2549_v58  ;;  %v2653_v33 = vunpack.c.l.bf16 %v2651_v47 }
 0x5a8   :  { %2693 = vmatpush1.bf16.msra.mxu0 %v5433_v31  ;;  %3976 = vmatpush3.bf16.msra.mxu1 %v5436_v25  ;;  %v2552_v42 = vsel %vm2195_vm1, %v2551_v4, 0.0  ;;  %v5659_v9 = vsel %vm2195_vm1, %v2551_v4, %v5545_v55  ;;  %v5678_v55 = vld [vmem:[#allocation10 + $0x90] ss:$12 sps:$4 sm:$0xff]  }
 0x5a9   :  { %v2555_v43 = vadd.f32 %v2552_v42, %v2196_v26  ;;  %v2677_v23 = vpack.c.bf16 %v5659_v9, %v5659_v9  ;;  %2796 = vmatprep.subr.bf16.mxu0 %v5663_v30  ;;  %3981 = vmatprep.subr.bf16.mxu1 %v5937_v2 }
 0x5ab   :  { %2556 = vst [vmem:[#allocation14 + $0x18] sm:$0xff] %v2555_v43  ;;  %2711 = vmatmul.mubr.bf16.vlgmr.msra.gmra.mxu0 %v2677_v23  ;;  %3978 = vmatmul.mubr.bf16.vlgmr.msra.gmra.mxu1 %v2677_v23 }
 0x5ac   :  { %2797 = vmatpush1.bf16.msra.mxu0 %v5667_v13  ;;  %3982 = vmatpush3.bf16.msra.mxu1 %v5252_v34  ;;  %v5984_v34 = vld [vmem:[#allocation28_spill] sm:$0xff] }
 0x5ad   :  { %2798 = vmatprep.subr.bf16.mxu0 %v5671_v10  ;;  %3983 = vmatprep.subr.bf16.mxu1 %v5937_v2 }
 0x5ae   :  { %2828 = vmatprep.mubr.bf16.mxu0 %v5931_v56  ;;  %3997 = vmatprep.mubr.msk.bf16.mxu1 %vm4630_vm2, %v5937_v2 }
 0x5b0   :  { %2799 = vmatpush1.bf16.msra.mxu0 %v5678_v55  ;;  %3984 = vmatpush3.bf16.msra.mxu1 %v5261_v35  ;;  %v5985_v35 = vld [vmem:[#allocation33_spill] sm:$0xff] }
 0x5b1   :  { %2800 = vmatprep.subr.bf16.mxu0 %v5264_v36  ;;  %3985 = vmatprep.subr.bf16.mxu1 %v5937_v2  ;;  %v5986_v36 = vld [vmem:[#allocation34_spill] sm:$0xff] }
 0x5b4   :  { %2801 = vmatpush1.bf16.msra.mxu0 %v5268_v37  ;;  %3986 = vmatpush3.bf16.msra.mxu1 %v5271_v38  ;;  %v5987_v37 = vld [vmem:[#allocation35_spill] sm:$0xff]  ;;  %v5988_v38 = vld [vmem:[#allocation36_spill] sm:$0xff] }
 0x5b5   :  { %2802 = vmatprep.subr.bf16.mxu0 %v5274_v39  ;;  %3987 = vmatprep.subr.bf16.mxu1 %v5937_v2  ;;  %v5989_v39 = vld [vmem:[#allocation37_spill] sm:$0xff] }
 0x5b8   :  { %2803 = vmatpush1.bf16.msra.mxu0 %v5278_v40  ;;  %3988 = vmatpush3.bf16.msra.mxu1 %v5970_v44  ;;  %v5990_v40 = vld [vmem:[#allocation38_spill] sm:$0xff]  ;;  %v5991_v44 = vld [vmem:[#allocation39_spill] sm:$0xff] }
 0x5b9   :  { %2804 = vmatprep.subr.bf16.mxu0 %v5971_v15  ;;  %3989 = vmatprep.subr.bf16.mxu1 %v5937_v2  ;;  %v5992_v15 = vld [vmem:[#allocation40_spill] sm:$0xff] }
 0x5bc   :  { %2805 = vmatpush1.bf16.msra.mxu0 %v5984_v34  ;;  %3990 = vmatpush3.bf16.msra.mxu1 %v5985_v35 }
 0x5bd   :  { %2806 = vmatprep.subr.bf16.mxu0 %v5986_v36  ;;  %3991 = vmatprep.subr.bf16.mxu1 %v5937_v2  ;;  %v2675_v36 = vld [vmem:[#allocation3 + $0x18] sm:$0xff] }
 0x5c0   :  { %2807 = vmatpush1.bf16.msra.mxu0 %v5987_v37  ;;  %3992 = vmatpush3.bf16.msra.mxu1 %v5988_v38  ;;  %v2759_v38 = vunpack.c.l.bf16 %v2675_v36 }
 0x5c1   :  { %2808 = vmatprep.subr.bf16.mxu0 %v5989_v39  ;;  %3993 = vmatprep.subr.bf16.mxu1 %v5937_v2 }
 0x5c4   :  { %2809 = vmatpush1.bf16.msra.mxu0 %v5990_v40  ;;  %3994 = vmatpush3.bf16.msra.mxu1 %v5991_v44 }
 0x5c5   :  { %2810 = vmatprep.subr.bf16.mxu0 %v5992_v15  ;;  %3995 = vmatprep.subr.bf16.mxu1 %v5937_v2 }
 0x5c8   :  { %2811 = vmatpush1.bf16.msra.mxu0 %v5993_v21  ;;  %3996 = vmatpush3.bf16.msra.mxu1 %v5994_v53  ;;  %v2768_v21 = vrot.slane %v2675_v36, 4  ;;  %v5996_v36 = vld [vmem:[#allocation45_spill] sm:$0xff] }
 0x5c9   :  { %2913 = vmatprep.subr.bf16.mxu0 %v5995_v29  ;;  %4001 = vmatprep.subr.bf16.mxu1 %v5937_v2 }
 0x64b   :  { %v2595_v32 = vpop.f32.mrf.mxu0  ;;  %v2636_v24 = vpop.f32.mrf.mxu1 }
 0x64c   :  { %v2643_v11 = vadd.f32 %v2642_v18, %v2595_v32  ;;  %v2661_v44 = vadd.f32 %v5591_v7, %v2636_v24  ;;  %v2663_v32 = vunpack.c.h.bf16 %v5586_v17 }
 0x64d   :  { %v2597_v14 = vpop.f32.mrf.mxu0  ;;  %v3959_v59 = vpop.f32.mrf.mxu1 }
 0x64e   :  { %v3481_v5 = vmul.f32 -1.442695, %v2643_v11  ;;  %v2654_v42 = vadd.f32 %v2653_v33, %v2597_v14 }
 0x64f   :  { %v2599_v49 = vpop.f32.mrf.mxu0  ;;  %v2639_v58 = vpop.f32.mrf.mxu1 }
 0x650   :  { %4311 = vpow2.f32 %v3481_v5  ;;  %v3482_v43 = vmul.f32 -1.442695, %v2654_v42  ;;  %v2770_v5 = vunpack.c.l.bf16 %v2768_v21 }
 0x651   :  { %v2600_v4 = vpop.f32.mrf.mxu0  ;;  %v3960_v26 = vpop.f32.mrf.mxu1 }
 0x652   :  { %4313 = vpow2.f32 %v3482_v43 }
 0x65d   :  { %v4312_v23 = vpop.eup %4311 }
 0x65e   :  { %v2647_v34 = vadd.f32 1.0, %v4312_v23 }
 0x65f   :  { %v4314_v35 = vpop.eup %4313 }
 0x660   :  { %4315 = vrcp.f32 %v2647_v34  ;;  %v2658_v37 = vadd.f32 1.0, %v4314_v35 }
 0x662   :  { %4317 = vrcp.f32 %v2658_v37 }
 0x66b   :  { %v2712_v39 = vpop.f32.mrf.mxu0  ;;  %v2753_v40 = vpop.f32.mrf.mxu1 }
 0x66c   :  { %v2760_v15 = vadd.f32 %v2759_v38, %v2712_v39  ;;  %v2073_v38 = vsel %vm2072_vm0, %v5996_v36, 0.0 }
 0x66d   :  { %v4316_v53 = vpop.eup %4315  ;;  %v2714_v29 = vpop.f32.mrf.mxu0 }
 0x66e   :  { %v3979_v48 = vpop.f32.mrf.mxu1  ;;  %v2662_v18 = vmul.f32 %v4316_v53, %v2661_v44  ;;  %v3483_v11 = vmul.f32 -1.442695, %v2760_v15  ;;  %v2771_v33 = vadd.f32 %v2770_v5, %v2714_v29  ;;  %v4445_v5 = vld [vmem:[#allocation13 + $0xac] ss:$12 sps:$4 sm:$0xff]  }
 0x66f   :  { %v2716_v47 = vpop.f32.mrf.mxu0  ;;  %v4318_v4 = vpop.eup %4317 }
 0x670   :  { %v2756_v14 = vpop.f32.mrf.mxu1  ;;  %v2664_v59 = vadd.f32 %v2663_v32, %v2662_v18  ;;  %4319 = vpow2.f32 %v3483_v11  ;;  %v3484_v24 = vmul.f32 -1.442695, %v2771_v33  ;;  %v2666_v43 = vsub.f32 1.0, %v4318_v4  ;;  %v4439_v18 = vld [vmem:[#allocation10 + $0x1c] ss:$12 sps:$4 sm:$0xff]  }
 0x671   :  { %v2717_v49 = vpop.f32.mrf.mxu0  ;;  %v2668_v34 = vmul.f32 %v4318_v4, %v5604_v12  ;;  %v4440_v32 = vld [vmem:[#allocation10 + $0x18] ss:$12 sps:$4 sm:$0xff]   ;;  %v4441_v11 = vld [vmem:[#allocation10 + $0x20] ss:$12 sps:$4 sm:$0xff]  }
 0x672   :  { %v3980_v58 = vpop.f32.mrf.mxu1  ;;  %4321 = vtanh.f32 %v2664_v59  ;;  %v4442_v47 = vld [vmem:[#allocation10 + $0x4] ss:$12 sps:$4 sm:$0xff]   ;;  %v4443_v14 = vld [vmem:[#allocation10] ss:$12 sps:$4 sm:$0xff]   ;;  %v4444_v59 = vld [vmem:[#allocation10 + $0x8] ss:$12 sps:$4 sm:$0xff]  }
 0x673   :  { %4323 = vpow2.f32 %v3484_v24  ;;  %v2793_v49 = vld [vmem:[#allocation2 + $0x48] sm:$0xff] }
 0x674   :  { %v2877_v58 = vunpack.c.l.bf16 %v2793_v49 }
 0x67d   :  { %v4320_v26 = vpop.eup %4319 }
 0x67e   :  { %v2764_v42 = vadd.f32 1.0, %v4320_v26  ;;  %v2886_v26 = vrot.slane %v2793_v49, 4  ;;  %v4446_v49 = vld [vmem:[#allocation13 + $0xa8] ss:$12 sps:$4 sm:$0xff]  }
 0x67f   :  { %v4322_v23 = vpop.eup %4321 }
 0x680   :  { %4325 = vrcp.f32 %v2764_v42  ;;  %v2667_v17 = vmul.f32 %v4322_v23, %v2666_v43  ;;  %v4324_v53 = vpop.eup %4323 }
 0x681   :  { %v2775_v29 = vadd.f32 1.0, %v4324_v53 }
 0x682   :  { %v2669_v35 = vadd.f32 %v2668_v34, %v2667_v17 }
 0x683   :  { %4327 = vrcp.f32 %v2775_v29  ;;  %v2910_v29 = vld [vmem:[#allocation3 + $0xc] sm:$0xff] }
 0x684   :  { %v2670_v39 = vsel %vm2072_vm0, %v2669_v35, 0.0  ;;  %v5719_v44 = vsel %vm2072_vm0, %v2669_v35, %v5604_v12  ;;  %v2778_v12 = vadd.f32 %v5620_v54, %v2753_v40  ;;  %v4438_v40 = vld [vmem:[#allocation10 + $0x38] ss:$12 sps:$4 sm:$0xff]   ;;  %v2888_v35 = vunpack.c.l.bf16 %v2886_v26  ;;  %v4449_v26 = vld [vmem:[#allocation13 + $0x90] ss:$12 sps:$4 sm:$0xff]  }
 0x685   :  { %v2795_v15 = vpack.c.bf16 %v5719_v44, %v5719_v44  ;;  %v3273_v21 = vadd.f32 %v2670_v39, %v2073_v38 }
 0x687   :  { %2829 = vmatmul.mubr.bf16.vlgmr.msra.gmra.mxu0 %v2795_v15  ;;  %3277 = vst [vmem:[#allocation14 + $0x28] sm:$0xff] %v3273_v21  ;;  %3998 = vmatmul.mubr.bf16.vlgmr.msra.gmra.mxu1 %v2795_v15 }
 0x688   :  { %2914 = vmatpush1.bf16.msra.mxu0 %v5350_v6  ;;  %4002 = vmatpush3.bf16.msra.mxu1 %v5353_v51  ;;  %v2780_v51 = vunpack.c.l.bf16 %v5615_v41  ;;  %v4432_v41 = vld [vmem:[#allocation10 + $0x68] ss:$12 sps:$4 sm:$0xff]  }
 0x689   :  { %2915 = vmatprep.subr.bf16.mxu0 %v5356_v45  ;;  %4003 = vmatprep.subr.bf16.mxu1 %v5937_v2 }
 0x68a   :  { %2945 = vmatprep.mubr.bf16.mxu0 %v5931_v56  ;;  %4017 = vmatprep.mubr.msk.bf16.mxu1 %vm4630_vm2, %v5937_v2 }
 0x68c   :  { %2916 = vmatpush1.bf16.msra.mxu0 %v5366_v46  ;;  %4004 = vmatpush3.bf16.msra.mxu1 %v5369_v16 }
 0x68d   :  { %v4326_v48 = vpop.eup %4325  ;;  %2917 = vmatprep.subr.bf16.mxu0 %v5372_v57  ;;  %4005 = vmatprep.subr.bf16.mxu1 %v5937_v2 }
 0x68e   :  { %v2779_v6 = vmul.f32 %v4326_v48, %v2778_v12  ;;  %v2994_v48 = vunpack.c.l.bf16 %v2910_v29 }
 0x690   :  { %v2781_v45 = vadd.f32 %v2780_v51, %v2779_v6  ;;  %2918 = vmatpush1.bf16.msra.mxu0 %v5377_v61  ;;  %4006 = vmatpush3.bf16.msra.mxu1 %v5380_v63  ;;  %v4328_v46 = vpop.eup %4327  ;;  %v5787_v6 = vld [vmem:[#allocation2 + $0x50] ss:$12 sps:$4 sm:$0xff]  }
 0x691   :  { %2919 = vmatprep.subr.bf16.mxu0 %v5383_v1  ;;  %4007 = vmatprep.subr.bf16.mxu1 %v5937_v2  ;;  %v2783_v16 = vsub.f32 1.0, %v4328_v46  ;;  %v2785_v63 = vmul.f32 %v4328_v46, %v5659_v9 }
 0x692   :  { %4329 = vtanh.f32 %v2781_v45 }
 0x694   :  { %2920 = vmatpush1.bf16.msra.mxu0 %v5387_v8  ;;  %4008 = vmatpush3.bf16.msra.mxu1 %v5390_v3  ;;  %v5998_v8 = vld [vmem:[#allocation30_spill] sm:$0xff]  ;;  %v2898_v3 = vunpack.c.l.bf16 %v5787_v6 }
 0x695   :  { %2921 = vmatprep.subr.bf16.mxu0 %v5393_v19  ;;  %4009 = vmatprep.subr.bf16.mxu1 %v5937_v2  ;;  %v1950_v19 = vsel %vm1949_vm15, %v5998_v8, 0.0 }
 0x698   :  { %2922 = vmatpush1.bf16.msra.mxu0 %v5397_v27  ;;  %4010 = vmatpush3.bf16.msra.mxu1 %v5400_v22 }
 0x699   :  { %2923 = vmatprep.subr.bf16.mxu0 %v5403_v20  ;;  %4011 = vmatprep.subr.bf16.mxu1 %v5937_v2 }
 0x69c   :  { %2924 = vmatpush1.bf16.msra.mxu0 %v5407_v0  ;;  %4012 = vmatpush3.bf16.msra.mxu1 %v5410_v60  ;;  %v4427_v0 = vld [vmem:[#allocation10 + $0x7c] ss:$12 sps:$4 sm:$0xff]   ;;  %v4428_v60 = vld [vmem:[#allocation10 + $0x78] ss:$12 sps:$4 sm:$0xff]  }
 0x69d   :  { %2925 = vmatprep.subr.bf16.mxu0 %v5413_v50  ;;  %4013 = vmatprep.subr.bf16.mxu1 %v5937_v2  ;;  %v4429_v50 = vld [vmem:[#allocation10 + $0x80] ss:$12 sps:$4 sm:$0xff]  }
 0x69f   :  { %v4330_v57 = vpop.eup %4329 }
 0x6a0   :  { %2926 = vmatpush1.bf16.msra.mxu0 %v5417_v62  ;;  %4014 = vmatpush3.bf16.msra.mxu1 %v5420_v28  ;;  %v2784_v61 = vmul.f32 %v4330_v57, %v2783_v16  ;;  %v4430_v62 = vld [vmem:[#allocation10 + $0x64] ss:$12 sps:$4 sm:$0xff]   ;;  %v4431_v28 = vld [vmem:[#allocation10 + $0x60] ss:$12 sps:$4 sm:$0xff]   ;;  %v3003_v57 = vrot.slane %v2910_v29, 4 }
 0x6a1   :  { %2927 = vmatprep.subr.bf16.mxu0 %v5424_v52  ;;  %4015 = vmatprep.subr.bf16.mxu1 %v5937_v2  ;;  %v4460_v29 = vld [vmem:[#allocation13 + $0x34] ss:$12 sps:$4 sm:$0xff]  }
 0x6a2   :  { %v2786_v1 = vadd.f32 %v2785_v63, %v2784_v61 }
 0x6a4   :  { %2928 = vmatpush1.bf16.msra.mxu0 %v5433_v31  ;;  %4016 = vmatpush3.bf16.msra.mxu1 %v5436_v25  ;;  %v2787_v27 = vsel %vm1949_vm15, %v2786_v1, 0.0  ;;  %v5767_v22 = vsel %vm1949_vm15, %v2786_v1, %v5659_v9  ;;  %v4425_v31 = vld [vmem:[#allocation10 + $0xb0] ss:$12 sps:$4 sm:$0xff]   ;;  %v4426_v25 = vld [vmem:[#allocation10 + $0x98] ss:$12 sps:$4 sm:$0xff]  }
 0x6a5   :  { %v2790_v52 = vadd.f32 %v2787_v27, %v1950_v19  ;;  %v2912_v20 = vpack.c.bf16 %v5767_v22, %v5767_v22  ;;  %3031 = vmatprep.subr.bf16.mxu0 %v5663_v30  ;;  %4021 = vmatprep.subr.bf16.mxu1 %v5937_v2  ;;  %v4433_v9 = vld [vmem:[#allocation10 + $0x4c] ss:$12 sps:$4 sm:$0xff]   ;;  %v4434_v30 = vld [vmem:[#allocation10 + $0x48] ss:$12 sps:$4 sm:$0xff]  }
 0x6a7   :  { %2791 = vst [vmem:[#allocation14 + $0x10] sm:$0xff] %v2790_v52  ;;  %2946 = vmatmul.mubr.bf16.vlgmr.msra.gmra.mxu0 %v2912_v20  ;;  %4018 = vmatmul.mubr.bf16.vlgmr.msra.gmra.mxu1 %v2912_v20 }
 0x6a8   :  { %3032 = vmatpush1.bf16.msra.mxu0 %v5667_v13  ;;  %4022 = vmatpush3.bf16.msra.mxu1 %v4425_v31  ;;  %v4435_v13 = vld [vmem:[#allocation10 + $0x50] ss:$12 sps:$4 sm:$0xff]   ;;  %v3005_v31 = vunpack.c.l.bf16 %v3003_v57  ;;  %v4464_v57 = vld [vmem:[#allocation13 + $0x18] ss:$12 sps:$4 sm:$0xff]  }
 0x6a9   :  { %3033 = vmatprep.subr.bf16.mxu0 %v5671_v10  ;;  %4023 = vmatprep.subr.bf16.mxu1 %v5937_v2  ;;  %v4436_v10 = vld [vmem:[#allocation10 + $0x34] ss:$12 sps:$4 sm:$0xff]  }
 0x6aa   :  { %3063 = vmatprep.mubr.bf16.mxu0 %v5931_v56  ;;  %4037 = vmatprep.mubr.msk.bf16.mxu1 %vm4630_vm2, %v5937_v2 }
 0x6ac   :  { %3034 = vmatpush1.bf16.msra.mxu0 %v5678_v55  ;;  %4024 = vmatpush3.bf16.msra.mxu1 %v4426_v25  ;;  %v4437_v55 = vld [vmem:[#allocation10 + $0x30] ss:$12 sps:$4 sm:$0xff]  }
 0x6ad   :  { %3035 = vmatprep.subr.bf16.mxu0 %v4427_v0  ;;  %4025 = vmatprep.subr.bf16.mxu1 %v5937_v2 }
 0x6b0   :  { %3036 = vmatpush1.bf16.msra.mxu0 %v4428_v60  ;;  %4026 = vmatpush3.bf16.msra.mxu1 %v4429_v50 }
 0x6b1   :  { %3037 = vmatprep.subr.bf16.mxu0 %v4430_v62  ;;  %4027 = vmatprep.subr.bf16.mxu1 %v5937_v2 }
 0x6b4   :  { %3038 = vmatpush1.bf16.msra.mxu0 %v4431_v28  ;;  %4028 = vmatpush3.bf16.msra.mxu1 %v4432_v41 }
 0x6b5   :  { %3039 = vmatprep.subr.bf16.mxu0 %v4433_v9  ;;  %4029 = vmatprep.subr.bf16.mxu1 %v5937_v2 }
 0x6b8   :  { %3040 = vmatpush1.bf16.msra.mxu0 %v4434_v30  ;;  %4030 = vmatpush3.bf16.msra.mxu1 %v4435_v13 }
 0x6b9   :  { %3041 = vmatprep.subr.bf16.mxu0 %v4436_v10  ;;  %4031 = vmatprep.subr.bf16.mxu1 %v5937_v2 }
 0x6bc   :  { %3042 = vmatpush1.bf16.msra.mxu0 %v4437_v55  ;;  %4032 = vmatpush3.bf16.msra.mxu1 %v4438_v40  ;;  %v6000_v40 = vld [vmem:[#allocation24_spill] sm:$0xff] }
 0x6bd   :  { %3043 = vmatprep.subr.bf16.mxu0 %v4439_v18  ;;  %4033 = vmatprep.subr.bf16.mxu1 %v5937_v2 }
 0x6c0   :  { %3044 = vmatpush1.bf16.msra.mxu0 %v4440_v32  ;;  %4034 = vmatpush3.bf16.msra.mxu1 %v4441_v11  ;;  %v1827_v32 = vsel %vm1826_vm14, %v6000_v40, 0.0 }
 0x6c1   :  { %3045 = vmatprep.subr.bf16.mxu0 %v4442_v47  ;;  %4035 = vmatprep.subr.bf16.mxu1 %v5937_v2 }
 0x6c4   :  { %3046 = vmatpush1.bf16.msra.mxu0 %v4443_v14  ;;  %4036 = vmatpush3.bf16.msra.mxu1 %v4444_v59 }
 0x6c5   :  { %3147 = vmatprep.subr.bf16.mxu0 %v4445_v5  ;;  %4041 = vmatprep.subr.bf16.mxu1 %v5937_v2 }
 0x747   :  { %v2830_v33 = vpop.f32.mrf.mxu0  ;;  %v2871_v24 = vpop.f32.mrf.mxu1 }
 0x748   :  { %v2878_v4 = vadd.f32 %v2877_v58, %v2830_v33  ;;  %v2896_v46 = vadd.f32 %v5591_v7, %v2871_v24  ;;  %v4447_v58 = vld [vmem:[#allocation13 + $0xb0] ss:$12 sps:$4 sm:$0xff]   ;;  %v4448_v33 = vld [vmem:[#allocation13 + $0x94] ss:$12 sps:$4 sm:$0xff]  }
 0x749   :  { %v2832_v42 = vpop.f32.mrf.mxu0  ;;  %v3999_v43 = vpop.f32.mrf.mxu1 }
 0x74a   :  { %v3485_v23 = vmul.f32 -1.442695, %v2878_v4  ;;  %v2889_v38 = vadd.f32 %v2888_v35, %v2832_v42  ;;  %v4450_v42 = vld [vmem:[#allocation13 + $0x98] ss:$12 sps:$4 sm:$0xff]  }
 0x74b   :  { %v2834_v17 = vpop.f32.mrf.mxu0  ;;  %v2874_v34 = vpop.f32.mrf.mxu1  ;;  %v4452_v35 = vld [vmem:[#allocation13 + $0x78] ss:$12 sps:$4 sm:$0xff]  }
 0x74c   :  { %4331 = vpow2.f32 %v3485_v23  ;;  %v3486_v39 = vmul.f32 -1.442695, %v2889_v38  ;;  %v4451_v23 = vld [vmem:[#allocation13 + $0x7c] ss:$12 sps:$4 sm:$0xff]   ;;  %v4455_v38 = vld [vmem:[#allocation13 + $0x60] ss:$12 sps:$4 sm:$0xff]  }
 0x74d   :  { %v2835_v36 = vpop.f32.mrf.mxu0  ;;  %v4000_v37 = vpop.f32.mrf.mxu1 }
 0x74e   :  { %4333 = vpow2.f32 %v3486_v39  ;;  %v4453_v36 = vld [vmem:[#allocation13 + $0x80] ss:$12 sps:$4 sm:$0xff]   ;;  %v4454_v37 = vld [vmem:[#allocation13 + $0x64] ss:$12 sps:$4 sm:$0xff]   ;;  %v4456_v39 = vld [vmem:[#allocation13 + $0x68] ss:$12 sps:$4 sm:$0xff]  }
 0x759   :  { %v4332_v15 = vpop.eup %4331 }
 0x75a   :  { %v2882_v21 = vadd.f32 1.0, %v4332_v15  ;;  %v4457_v15 = vld [vmem:[#allocation13 + $0x4c] ss:$12 sps:$4 sm:$0xff]  }
 0x75b   :  { %v4334_v53 = vpop.eup %4333 }
 0x75c   :  { %4335 = vrcp.f32 %v2882_v21  ;;  %v2893_v12 = vadd.f32 1.0, %v4334_v53  ;;  %v4458_v21 = vld [vmem:[#allocation13 + $0x48] ss:$12 sps:$4 sm:$0xff]   ;;  %v4459_v53 = vld [vmem:[#allocation13 + $0x50] ss:$12 sps:$4 sm:$0xff]  }
 0x75e   :  { %4337 = vrcp.f32 %v2893_v12 }
 0x767   :  { %v2947_v51 = vpop.f32.mrf.mxu0  ;;  %v2988_v45 = vpop.f32.mrf.mxu1 }
 0x768   :  { %v2995_v16 = vadd.f32 %v2994_v48, %v2947_v51  ;;  %v3013_v4 = vadd.f32 %v5620_v54, %v2988_v45  ;;  %v4461_v48 = vld [vmem:[#allocation13 + $0x30] ss:$12 sps:$4 sm:$0xff]   ;;  %v4462_v51 = vld [vmem:[#allocation13 + $0x38] ss:$12 sps:$4 sm:$0xff]  }
 0x769   :  { %v4336_v61 = vpop.eup %4335  ;;  %v2949_v63 = vpop.f32.mrf.mxu0  ;;  %v4463_v45 = vld [vmem:[#allocation13 + $0x1c] ss:$12 sps:$4 sm:$0xff]  }
 0x76a   :  { %v4019_v1 = vpop.f32.mrf.mxu1  ;;  %v2897_v8 = vmul.f32 %v4336_v61, %v2896_v46  ;;  %v3487_v19 = vmul.f32 -1.442695, %v2995_v16  ;;  %v3006_v60 = vadd.f32 %v3005_v31, %v2949_v63  ;;  %v4465_v61 = vld [vmem:[#allocation13 + $0x20] ss:$12 sps:$4 sm:$0xff]  }
 0x76b   :  { %v2951_v27 = vpop.f32.mrf.mxu0  ;;  %v4338_v62 = vpop.eup %4337 }
 0x76c   :  { %v2991_v52 = vpop.f32.mrf.mxu1  ;;  %v2899_v20 = vadd.f32 %v2898_v3, %v2897_v8  ;;  %4339 = vpow2.f32 %v3487_v19  ;;  %v3488_v50 = vmul.f32 -1.442695, %v3006_v60  ;;  %v2901_v9 = vsub.f32 1.0, %v4338_v62  ;;  %v4466_v8 = vld [vmem:[#allocation13 + $0x4] ss:$12 sps:$4 sm:$0xff]  }
 0x76d   :  { %v2952_v25 = vpop.f32.mrf.mxu0  ;;  %v2903_v10 = vmul.f32 %v4338_v62, %v5719_v44  ;;  %v4467_v19 = vld [vmem:[#allocation13] ss:$12 sps:$4 sm:$0xff]   ;;  %v4468_v27 = vld [vmem:[#allocation13 + $0x8] ss:$12 sps:$4 sm:$0xff]  }
 0x76e   :  { %v4020_v0 = vpop.f32.mrf.mxu1  ;;  %4341 = vtanh.f32 %v2899_v20  ;;  %v3024_v25 = vld [vmem:[#allocation14 + $0x8] sm:$0xff] }
 0x76f   :  { %4343 = vpow2.f32 %v3488_v50 }
 0x779   :  { %v4340_v28 = vpop.eup %4339 }
 0x77a   :  { %v2999_v41 = vadd.f32 1.0, %v4340_v28 }
 0x77b   :  { %v4342_v30 = vpop.eup %4341 }
 0x77c   :  { %4345 = vrcp.f32 %v2999_v41  ;;  %v2902_v13 = vmul.f32 %v4342_v30, %v2901_v9  ;;  %v4344_v5 = vpop.eup %4343 }
 0x77d   :  { %v3010_v24 = vadd.f32 1.0, %v4344_v5 }
 0x77e   :  { %v2904_v55 = vadd.f32 %v2903_v10, %v2902_v13 }
 0x77f   :  { %4347 = vrcp.f32 %v3010_v24 }
 0x780   :  { %v2905_v11 = vsel %vm1826_vm14, %v2904_v55, 0.0  ;;  %v5800_v47 = vsel %vm1826_vm14, %v2904_v55, %v5719_v44  ;;  %v5808_v44 = vld [vmem:[#allocation3 + $0x8] ss:$12 sps:$4 sm:$0xff]  }
 0x781   :  { %v3030_v14 = vpack.c.bf16 %v5800_v47, %v5800_v47  ;;  %v3274_v59 = vadd.f32 %v2905_v11, %v1827_v32  ;;  %v3015_v34 = vunpack.c.h.bf16 %v5808_v44 }
 0x783   :  { %3064 = vmatmul.mubr.bf16.vlgmr.msra.gmra.mxu0 %v3030_v14  ;;  %3278 = vst [vmem:[#allocation14 + $0x30] sm:$0xff] %v3274_v59  ;;  %4038 = vmatmul.mubr.bf16.vlgmr.msra.gmra.mxu1 %v3030_v14 }
 0x784   :  { %3148 = vmatpush1.bf16.msra.mxu0 %v4446_v49  ;;  %4042 = vmatpush3.bf16.msra.mxu1 %v4447_v58  ;;  %v3144_v58 = vld [vmem:[#allocation3] sm:$0xff] }
 0x785   :  { %3149 = vmatprep.subr.bf16.mxu0 %v4448_v33  ;;  %4043 = vmatprep.subr.bf16.mxu1 %v5937_v2  ;;  %v3228_v24 = vunpack.c.l.bf16 %v3144_v58 }
 0x786   :  { %3179 = vmatprep.mubr.bf16.mxu0 %v5931_v56  ;;  %4057 = vmatprep.mubr.msk.bf16.mxu1 %vm4630_vm2, %v5937_v2 }
 0x788   :  { %3150 = vmatpush1.bf16.msra.mxu0 %v4449_v26  ;;  %4044 = vmatpush3.bf16.msra.mxu1 %v4450_v42 }
 0x789   :  { %v4346_v43 = vpop.eup %4345  ;;  %3151 = vmatprep.subr.bf16.mxu0 %v4451_v23  ;;  %4045 = vmatprep.subr.bf16.mxu1 %v5937_v2  ;;  %v3237_v23 = vrot.slane %v3144_v58, 4 }
 0x78a   :  { %v3014_v17 = vmul.f32 %v4346_v43, %v3013_v4 }
 0x78c   :  { %v3016_v56 = vadd.f32 %v3015_v34, %v3014_v17  ;;  %3152 = vmatpush1.bf16.msra.mxu0 %v4452_v35  ;;  %4046 = vmatpush3.bf16.msra.mxu1 %v4453_v36  ;;  %v4348_v12 = vpop.eup %4347  ;;  %v3133_v36 = vunpack.c.h.bf16 %v5787_v6 }
 0x78d   :  { %3153 = vmatprep.subr.bf16.mxu0 %v4454_v37  ;;  %4047 = vmatprep.subr.bf16.mxu1 %v5937_v2  ;;  %v3018_v46 = vsub.f32 1.0, %v4348_v12  ;;  %v3020_v1 = vmul.f32 %v4348_v12, %v5767_v22 }
 0x78e   :  { %4349 = vtanh.f32 %v3016_v56 }
 0x790   :  { %3154 = vmatpush1.bf16.msra.mxu0 %v4455_v38  ;;  %4048 = vmatpush3.bf16.msra.mxu1 %v4456_v39 }
 0x791   :  { %3155 = vmatprep.subr.bf16.mxu0 %v4457_v15  ;;  %4049 = vmatprep.subr.bf16.mxu1 %v5937_v2 }
 0x794   :  { %3156 = vmatpush1.bf16.msra.mxu0 %v4458_v21  ;;  %4050 = vmatpush3.bf16.msra.mxu1 %v4459_v53  ;;  %v3239_v21 = vunpack.c.l.bf16 %v3237_v23 }
 0x795   :  { %3157 = vmatprep.subr.bf16.mxu0 %v4460_v29  ;;  %4051 = vmatprep.subr.bf16.mxu1 %v5937_v2 }
 0x798   :  { %3158 = vmatpush1.bf16.msra.mxu0 %v4461_v48  ;;  %4052 = vmatpush3.bf16.msra.mxu1 %v4462_v51 }
 0x799   :  { %3159 = vmatprep.subr.bf16.mxu0 %v4463_v45  ;;  %4053 = vmatprep.subr.bf16.mxu1 %v5937_v2 }
 0x79b   :  { %v4350_v16 = vpop.eup %4349 }
 0x79c   :  { %3160 = vmatpush1.bf16.msra.mxu0 %v4464_v57  ;;  %4054 = vmatpush3.bf16.msra.mxu1 %v4465_v61  ;;  %v3019_v63 = vmul.f32 %v4350_v16, %v3018_v46 }
 0x79d   :  { %3161 = vmatprep.subr.bf16.mxu0 %v4466_v8  ;;  %4055 = vmatprep.subr.bf16.mxu1 %v5937_v2  ;;  %v3028_v2 = vld [vmem:[#allocation2 + $0x54] sm:$0xff] }
 0x79e   :  { %v3021_v3 = vadd.f32 %v3020_v1, %v3019_v63  ;;  %v3112_v50 = vunpack.c.l.bf16 %v3028_v2  ;;  %v3121_v9 = vrot.slane %v3028_v2, 4 }
 0x7a0   :  { %3162 = vmatpush1.bf16.msra.mxu0 %v4467_v19  ;;  %4056 = vmatpush3.bf16.msra.mxu1 %v4468_v27  ;;  %v3022_v20 = vsel %vm1703_vm13, %v3021_v3, 0.0  ;;  %v5824_v31 = vsel %vm1703_vm13, %v3021_v3, %v5767_v22  ;;  %v3123_v40 = vunpack.c.l.bf16 %v3121_v9  ;;  %v6004_v3 = vld [vmem:[#allocation26_spill] sm:$0xff] }
 0x7a1   :  { %v3025_v0 = vadd.f32 %v3024_v25, %v3022_v20  ;;  %v3146_v60 = vpack.c.bf16 %v5824_v31, %v5824_v31 }
 0x7a3   :  { %3026 = vst [vmem:[#allocation14 + $0x8] sm:$0xff] %v3025_v0  ;;  %3180 = vmatmul.mubr.bf16.vlgmr.msra.gmra.mxu0 %v3146_v60  ;;  %4058 = vmatmul.mubr.bf16.vlgmr.msra.gmra.mxu1 %v3146_v60  ;;  %v3249_v60 = vunpack.c.l.bf16 %v5808_v44 }
 0x843   :  { %v3065_v62 = vpop.f32.mrf.mxu0  ;;  %v3106_v28 = vpop.f32.mrf.mxu1 }
 0x844   :  { %v3113_v41 = vadd.f32 %v3112_v50, %v3065_v62  ;;  %v3131_v42 = vadd.f32 %v5591_v7, %v3106_v28 }
 0x845   :  { %v3067_v30 = vpop.f32.mrf.mxu0  ;;  %v4039_v13 = vpop.f32.mrf.mxu1 }
 0x846   :  { %v3489_v10 = vmul.f32 -1.442695, %v3113_v41  ;;  %v3124_v11 = vadd.f32 %v3123_v40, %v3067_v30  ;;  %v3258_v13 = vld [vmem:[#allocation14] sm:$0xff] }
 0x847   :  { %v3069_v55 = vpop.f32.mrf.mxu0  ;;  %v3109_v22 = vpop.f32.mrf.mxu1 }
 0x848   :  { %4351 = vpow2.f32 %v3489_v10  ;;  %v3490_v14 = vmul.f32 -1.442695, %v3124_v11 }
 0x849   :  { %v3070_v18 = vpop.f32.mrf.mxu0  ;;  %v4040_v32 = vpop.f32.mrf.mxu1 }
 0x84a   :  { %4353 = vpow2.f32 %v3490_v14 }
 0x855   :  { %v4352_v59 = vpop.eup %4351 }
 0x856   :  { %v3117_v5 = vadd.f32 1.0, %v4352_v59 }
 0x857   :  { %v4354_v49 = vpop.eup %4353 }
 0x858   :  { %4355 = vrcp.f32 %v3117_v5  ;;  %v3128_v33 = vadd.f32 1.0, %v4354_v49 }
 0x85a   :  { %4357 = vrcp.f32 %v3128_v33 }
 0x863   :  { %v3181_v4 = vpop.f32.mrf.mxu0  ;;  %v3222_v26 = vpop.f32.mrf.mxu1 }
 0x864   :  { %v3229_v43 = vadd.f32 %v3228_v24, %v3181_v4  ;;  %v3247_v20 = vadd.f32 %v5620_v54, %v3222_v26 }
 0x865   :  { %v4356_v17 = vpop.eup %4355  ;;  %v3183_v34 = vpop.f32.mrf.mxu0 }
 0x866   :  { %v4059_v56 = vpop.f32.mrf.mxu1  ;;  %v3132_v35 = vmul.f32 %v4356_v17, %v3131_v42  ;;  %v3491_v37 = vmul.f32 -1.442695, %v3229_v43  ;;  %v3240_v12 = vadd.f32 %v3239_v21, %v3183_v34 }
 0x867   :  { %v3185_v38 = vpop.f32.mrf.mxu0  ;;  %v4358_v48 = vpop.eup %4357 }
 0x868   :  { %v3225_v39 = vpop.f32.mrf.mxu1  ;;  %v3134_v15 = vadd.f32 %v3133_v36, %v3132_v35  ;;  %4359 = vpow2.f32 %v3491_v37  ;;  %v3492_v7 = vmul.f32 -1.442695, %v3240_v12  ;;  %v3136_v45 = vsub.f32 1.0, %v4358_v48 }
 0x869   :  { %v3186_v53 = vpop.f32.mrf.mxu0  ;;  %v3138_v6 = vmul.f32 %v4358_v48, %v5800_v47 }
 0x86a   :  { %v4060_v29 = vpop.f32.mrf.mxu1  ;;  %4361 = vtanh.f32 %v3134_v15 }
 0x86b   :  { %4363 = vpow2.f32 %v3492_v7 }
 0x875   :  { %v4360_v51 = vpop.eup %4359 }
 0x876   :  { %v3233_v46 = vadd.f32 1.0, %v4360_v51 }
 0x877   :  { %v4362_v16 = vpop.eup %4361 }
 0x878   :  { %v3137_v57 = vmul.f32 %v4362_v16, %v3136_v45  ;;  %4365 = vrcp.f32 %v3233_v46  ;;  %v4364_v27 = vpop.eup %4363 }
 0x879   :  { %v3244_v52 = vadd.f32 1.0, %v4364_v27 }
 0x87a   :  { %v3139_v61 = vadd.f32 %v3138_v6, %v3137_v57 }
 0x87b   :  { %4367 = vrcp.f32 %v3244_v52 }
 0x87c   :  { %v3140_v1 = vsel %vm1581_vm11, %v3139_v61, 0.0  ;;  %v3143_v8 = vsel %vm1581_vm11, %v3139_v61, %v5800_v47 }
 0x87d   :  { %v3275_v19 = vadd.f32 %v3140_v1, %v6004_v3  ;;  %3261 = vst [vmem:[#allocation15] sm:$0xff] %v3143_v8 }
 0x87f   :  { %3279 = vst [vmem:[#allocation14 + $0x38] sm:$0xff] %v3275_v19 }
 0x885   :  { %v4366_v25 = vpop.eup %4365 }
 0x886   :  { %v3248_v0 = vmul.f32 %v4366_v25, %v3247_v20 }
 0x888   :  { %v3250_v2 = vadd.f32 %v3249_v60, %v3248_v0  ;;  %v4368_v50 = vpop.eup %4367 }
 0x889   :  { %v3252_v62 = vsub.f32 1.0, %v4368_v50  ;;  %v3254_v47 = vmul.f32 %v4368_v50, %v5824_v31 }
 0x88a   :  { %4369 = vtanh.f32 %v3250_v2 }
 0x897   :  { %v4370_v28 = vpop.eup %4369 }
 0x898   :  { %v3253_v41 = vmul.f32 %v4370_v28, %v3252_v62 }
 0x89a   :  { %v3255_v9 = vadd.f32 %v3254_v47, %v3253_v41 }
 0x89c   :  { %v3256_v30 = vsel %vm1333_vm9, %v3255_v9, 0.0  ;;  %v3257_v44 = vsel %vm1333_vm9, %v3255_v9, %v5824_v31 }
 0x89d   :  { %v3259_v10 = vadd.f32 %v3258_v13, %v3256_v30  ;;  %3263 = vst [vmem:[#allocation15 + $0x8] sm:$0xff] %v3257_v44 }
 0x89e   :  { %4580 = shalt.err (!%p4577_p1)
}
 0x89f   :  { %s4633_s16 = smov 128   ;;  %s4634_s17 = smov 8   ;;  %3260 = vst [vmem:[#allocation14] sm:$0xff] %v3259_v10 }
 0x8a0   :  { %3303 = dma.vmem_to_hbm [thread:$0]  %s3298_s12, 256, %s5862_s11, [#allocation16], %s4633_s16, %s4633_s16, %s4634_s17  }
 0x8a1   :  { %s4589_s6 = scalar_lea.vmem %s3286_s14, 1024  ;;  %p4594_p3 = scmp.lt.s32.totalorder %s3286_s14, %s3286_s14 }
 0x8a2   :  { %p4590_p2 = scmp.ne.s32.totalorder %s3286_s14, %s4589_s6  ;;  %p4595_p4 = scmp.lt.s32.totalorder %s4589_s6, %s4589_s6 }
 0x8a4   :  { %p4596_p5 = por %p4595_p4, %p4594_p3 }
 0x8a6   :  { %p4597_p6 = pnand %p4596_p5, %p4590_p2 }
 0x8a8   :  { %4600 = shalt.err (!%p4597_p6)
}
 0x8a9   :  { %3291 = dma.vmem_to_hbm [thread:$0]  %s3286_s14, 1024, %s5861_s10, [#allocation7], %s4633_s16, %s4633_s16, %s4634_s17  }
 0x8aa   :  { %4615 = dma.done.wait [#allocation7], 1024  }
 0x8ab   :  { %4616 = vsyncadd [#allocation7], 4294966272 }
 0x8ac   :  { %4617 = dma.done.wait [#allocation16], 256  }
 0x8ad   :  { %4618 = vsyncadd [#allocation16], 4294967040 }
 0x8ae   :  { %3310 = vsyncpa [#allocation6], 1 }
 0x8af   :  { %3311 = vsyncpa [#allocation9], 1 }
 0x8b0   :  { %3312 = vsyncpa [#allocation12], 1 }
 0x8b1   :  { %3313 = vsyncpa [#allocation7], 1 }
 0x8b2   :  { %3314 = vsyncpa [#allocation16], 1 }

</bundles_post_ra>
